<compile_context>
chip_gen: v7x
topology: tpu7x:2x2x1
jax: 0.10.0
libtpu: 0.0.40
codegen_flags: <defaults>
</compile_context>

<pallas_src>
import numpy as np

import jax
import jax.numpy as jnp
from jax import lax
from jax.experimental import pallas as pl
from jax.experimental.pallas import tpu as pltpu


H1, H2, H3 = 28, 14, 7          # spatial sizes: input, after pool1, after pool2
C = 64                           # channels of conv1/conv2
P1, P2, P3 = H1 * H1, H2 * H2, H3 * H3   # 784, 196, 49  (flattened spatial)
NEG_SLOPE = 0.2                  # LeakyReLU slope


# ---------------------------------------------------------------------------
# Constant matrices (built once on host with numpy; pure functions of the arch).
# ---------------------------------------------------------------------------
def _avgpool_matrix(h):
    """(h*h, ho*ho) matrix of AvgPool2d(kernel=3, stride=2, pad=1, count_include_pad=True)."""
    ho = (h + 2 * 1 - 3) // 2 + 1
    m = np.zeros((h * h, ho * ho), np.float32)
    for i in range(ho):
        for j in range(ho):
            q = i * ho + j
            for a in range(3):
                for b in range(3):
                    r, c = 2 * i - 1 + a, 2 * j - 1 + b
                    if 0 <= r < h and 0 <= c < h:
                        m[r * h + c, q] += 1.0 / 9.0
    return m


def _shift_then_pool_matrices(h):
    """(9, h*h, ho*ho): for tap t=a*3+b, 'shift by (a-1,b-1) with zero halo' composed
    with the 3x3/stride2/pad1 average pool.  Right-multiplying a (C, h*h) activation by
    mats[t] yields that channel's tap contribution already pooled to the next stage."""
    pool = _avgpool_matrix(h)                       # (h*h, ho*ho)
    mats = np.zeros((9, h * h, pool.shape[1]), np.float32)
    for a in range(3):
        for b in range(3):
            s = np.zeros((h * h, h * h), np.float32)
            for i in range(h):
                for j in range(h):
                    r, c = i + a - 1, j + b - 1
                    if 0 <= r < h and 0 <= c < h:
                        s[r * h + c, i * h + j] = 1.0
            mats[a * 3 + b] = s @ pool
    return mats


# ---------------------------------------------------------------------------
# Fused kernel: conv1+pool1+LReLU -> conv2+pool2+LReLU -> flatten+linear+sigmoid
# (one image per grid step; channels on sublanes, flattened spatial on lanes).
# ---------------------------------------------------------------------------
def _disc3_kernel(patches_ref, w1_ref, pool1_ref, sp2_ref, w2_ref,
                  wlin_ref, blin_ref, out_ref):
    # patches_ref: (1, 9, P1)   w1_ref: (C, 9)      pool1_ref: (P1, P2)
    # sp2_ref:     (9, P2, P3)  w2_ref: (9, C, C)
    # wlin_ref:    (C, P3)      blin_ref: (1, 1)    out_ref: (1, 1, 1)
    patches = patches_ref[0]                                         # (9, P1)

    # conv1 (3x3, pad 1, no bias) fused with avg-pool #1 — both linear, so pool the
    # nine im2col rows first (cheap order), then mix into the 64 output channels.
    pooled = jnp.dot(patches, pool1_ref[...],
                     preferred_element_type=jnp.float32)             # (9, P2)
    h = jnp.dot(w1_ref[...], pooled,
                preferred_element_type=jnp.float32)                  # (C, P2)
    h = jnp.maximum(h, NEG_SLOPE * h)                                # LeakyReLU(0.2)
    # TODO(synk): Dropout(0.4) is the identity here (inference forward); training-mode
    # stochastic masking is not implemented.

    # conv2 (3x3, pad 1, no bias) fused with avg-pool #2: per tap, shift+pool the
    # activations via a constant matrix (lanes stay dense), then mix channels with the
    # 64x64 tap weight, accumulating in f32.
    acc = jnp.zeros((C, P3), jnp.float32)
    for t in range(9):
        sp = jnp.dot(h, sp2_ref[t], preferred_element_type=jnp.float32)       # (C, P3)
        acc = acc + jnp.dot(w2_ref[t], sp, preferred_element_type=jnp.float32)
    a2 = jnp.maximum(acc, NEG_SLOPE * acc)                           # LeakyReLU(0.2)

    # flatten (PyTorch order: c*49 + i*7 + j) + Linear(3136 -> 1) + sigmoid.
    row = jnp.sum(a2 * wlin_ref[...], axis=1, keepdims=True)         # (C, 1)
    logit = jnp.sum(row, axis=0, keepdims=True) + blin_ref[...]      # (1, 1)
    out_ref[0] = jax.nn.sigmoid(logit)


# ---------------------------------------------------------------------------
# Wrapper: NCHW input like the PyTorch module, (N, 1) output.
# ---------------------------------------------------------------------------
@jax.jit
def discriminator3_forward(x_nchw, params):
    N = x_nchw.shape[0]

    # im2col for conv1 (Cin=1): (N, 9, 784) with spatial on the lane axis, tap t=a*3+b.
    xp = jnp.pad(x_nchw.reshape(N, H1, H1), ((0, 0), (1, 1), (1, 1)))
    patches = jnp.stack([xp[:, a:a + H1, b:b + H1].reshape(N, P1)
                         for a in range(3) for b in range(3)], axis=1)

    # Parameter re-layouts (pure reshapes/transposes of small weights).
    w1 = params["conv1_w"].reshape(C, 9)                              # (64, 9)
    w2 = jnp.transpose(params["conv2_w"], (2, 3, 0, 1)).reshape(9, C, C)
    wlin = params["lin_w"].reshape(C, P3)                             # (64, 49)
    blin = params["lin_b"].reshape(1, 1)

    pool1 = jnp.asarray(_avgpool_matrix(H1))                          # (784, 196)
    sp2 = jnp.asarray(_shift_then_pool_matrices(H2))                  # (9, 196, 49)

    out = pl.pallas_call(
        _disc3_kernel,
        out_shape=jax.ShapeDtypeStruct((N, 1, 1), jnp.float32),
        grid=(N,),
        in_specs=[
            pl.BlockSpec((1, 9, P1), lambda n: (n, 0, 0)),
            pl.BlockSpec((C, 9), lambda n: (0, 0)),
            pl.BlockSpec((P1, P2), lambda n: (0, 0)),
            pl.BlockSpec((9, P2, P3), lambda n: (0, 0, 0)),
            pl.BlockSpec((9, C, C), lambda n: (0, 0, 0)),
            pl.BlockSpec((C, P3), lambda n: (0, 0)),
            pl.BlockSpec((1, 1), lambda n: (0, 0)),
        ],
        out_specs=pl.BlockSpec((1, 1, 1), lambda n: (n, 0, 0)),
        compiler_params=pltpu.CompilerParams(dimension_semantics=("parallel",)),
    )(patches, w1, pool1, sp2, w2, wlin, blin)
    return out.reshape(N, 1)


# ---------------------------------------------------------------------------
# Deterministic parameter init (PyTorch layouts, PyTorch-like uniform bounds).
# ---------------------------------------------------------------------------
def init_params(key):
    ks = jax.random.split(key, 4)

    def u(k, shape, fan_in):
        bound = 1.0 / float(fan_in) ** 0.5
        return jax.random.uniform(k, shape, jnp.float32, -bound, bound)

    return {
        "conv1_w": u(ks[0], (64, 1, 3, 3), 1 * 9),     # Conv2d(1, 64, 3, 1, 1, bias=False)
        "conv2_w": u(ks[1], (64, 64, 3, 3), 64 * 9),   # Conv2d(64, 64, 3, 1, 1, bias=False)
        "lin_w":   u(ks[2], (1, 3136), 3136),          # Linear(3136, 1)
        "lin_b":   u(ks[3], (1,), 3136),
    }


# ---------------------------------------------------------------------------
# Pure-JAX reference (lax.conv / reduce_window) for validation, f32 HIGHEST.
# ---------------------------------------------------------------------------
def reference_forward(x_nchw, params):
    def avgpool(x):   # AvgPool2d(3, 2, 1), count_include_pad=True -> divide by 9
        s = lax.reduce_window(x, 0.0, lax.add, (1, 1, 3, 3), (1, 1, 2, 2),
                              ((0, 0), (0, 0), (1, 1), (1, 1)))
        return s / 9.0

    def lrelu(x):
        return jnp.where(x >= 0, x, NEG_SLOPE * x)

    y = lax.conv_general_dilated(x_nchw, params["conv1_w"], (1, 1), ((1, 1), (1, 1)),
                                 dimension_numbers=("NCHW", "OIHW", "NCHW"),
                                 precision=lax.Precision.HIGHEST)
    y = lrelu(avgpool(y))                       # dropout = identity (eval)
    y = lax.conv_general_dilated(y, params["conv2_w"], (1, 1), ((1, 1), (1, 1)),
                                 dimension_numbers=("NCHW", "OIHW", "NCHW"),
                                 precision=lax.Precision.HIGHEST)
    y = lrelu(avgpool(y))                       # dropout = identity (eval)
    flat = y.reshape(y.shape[0], -1)            # (N, 3136), NCHW flatten order
    logit = jnp.dot(flat, params["lin_w"].T,
                    precision=lax.Precision.HIGHEST) + params["lin_b"]
    return jax.nn.sigmoid(logit)


if __name__ == "__main__":
    key = jax.random.PRNGKey(0)
    pkey, xkey = jax.random.split(key)
    params = init_params(pkey)
    # Input shape implied by Linear(3136=64*7*7): (N, 1, 28, 28)
    x = jax.random.normal(xkey, (2, 1, 28, 28), jnp.float32)

    out = jax.block_until_ready(discriminator3_forward(x, params))
    ref = jax.block_until_ready(reference_forward(x, params))

    assert out.shape == (2, 1), out.shape
    err = float(jnp.max(jnp.abs(out - ref)))
    if err > 5e-3:
        raise AssertionError(f"mismatch vs reference: max abs err = {err}")
    print("KERNEL_OK")
</pallas_src>

<mosaic_0001>
module attributes {stable_mosaic.version = 11 : i64} {
  func.func @_disc3_kernel(%arg0: i32, %arg1: memref<1x9x784xf32, #tpu.memory_space<vmem>>, %arg2: memref<64x9xf32, #tpu.memory_space<vmem>>, %arg3: memref<784x196xf32, #tpu.memory_space<vmem>>, %arg4: memref<9x196x49xf32, #tpu.memory_space<vmem>>, %arg5: memref<9x64x64xf32, #tpu.memory_space<vmem>>, %arg6: memref<64x49xf32, #tpu.memory_space<vmem>>, %arg7: memref<1x1xf32, #tpu.memory_space<vmem>>, %arg8: memref<1x1x1xf32, #tpu.memory_space<vmem>>) attributes {dimension_semantics = [#tpu.dimension_semantics<parallel>], iteration_bounds = array<i64: 2>, scalar_prefetch = 0 : i64, scratch_operands = 0 : i64, tpu.core_type = #tpu.core_type<tc>, window_params = [{transform_indices = @transform_0, window_bounds = array<i64: 1, 9, 784>}, {pipeline_mode = #tpu.pipeline_mode<synchronous>, transform_indices = @transform_1, window_bounds = array<i64: 64, 9>}, {pipeline_mode = #tpu.pipeline_mode<synchronous>, transform_indices = @transform_2, window_bounds = array<i64: 784, 196>}, {pipeline_mode = #tpu.pipeline_mode<synchronous>, transform_indices = @transform_3, window_bounds = array<i64: 9, 196, 49>}, {pipeline_mode = #tpu.pipeline_mode<synchronous>, transform_indices = @transform_4, window_bounds = array<i64: 9, 64, 64>}, {pipeline_mode = #tpu.pipeline_mode<synchronous>, transform_indices = @transform_5, window_bounds = array<i64: 64, 49>}, {pipeline_mode = #tpu.pipeline_mode<synchronous>, transform_indices = @transform_6, window_bounds = array<i64: 1, 1>}, {transform_indices = @transform_7, window_bounds = array<i64: 1, 1, 1>}]} {
    %c0 = arith.constant 0 : index
    %c0_0 = arith.constant 0 : index
    %c0_1 = arith.constant 0 : index
    %0 = vector.load %arg1[%c0, %c0_0, %c0_1] : memref<1x9x784xf32, #tpu.memory_space<vmem>>, vector<1x9x784xf32>
    %1 = vector.shape_cast %0 : vector<1x9x784xf32> to vector<9x784xf32>
    %c0_2 = arith.constant 0 : index
    %c0_3 = arith.constant 0 : index
    %2 = vector.load %arg3[%c0_2, %c0_3] : memref<784x196xf32, #tpu.memory_space<vmem>>, vector<784x196xf32>
    %cst = arith.constant dense<0.000000e+00> : vector<9x196xf32>
    %3 = tpu.matmul %1, %2, %cst {dimension_numbers = #tpu.dot_dimension_numbers<[1], [0], [0], [1], [0, 0, 1, 1], [], []>} : vector<9x784xf32>, vector<784x196xf32>, vector<9x196xf32> -> vector<9x196xf32>
    %c0_4 = arith.constant 0 : index
    %c0_5 = arith.constant 0 : index
    %4 = vector.load %arg2[%c0_4, %c0_5] : memref<64x9xf32, #tpu.memory_space<vmem>>, vector<64x9xf32>
    %cst_6 = arith.constant dense<0.000000e+00> : vector<64x196xf32>
    %5 = tpu.matmul %4, %3, %cst_6 {dimension_numbers = #tpu.dot_dimension_numbers<[1], [0], [0], [1], [0, 0, 1, 1], [], []>} : vector<64x9xf32>, vector<9x196xf32>, vector<64x196xf32> -> vector<64x196xf32>
    %cst_7 = arith.constant 2.000000e-01 : f32
    %6 = vector.broadcast %cst_7 : f32 to vector<64x196xf32>
    %7 = arith.mulf %6, %5 : vector<64x196xf32>
    %8 = arith.maximumf %5, %7 : vector<64x196xf32>
    %cst_8 = arith.constant 0.000000e+00 : f32
    %9 = vector.broadcast %cst_8 : f32 to vector<64x49xf32>
    %c0_9 = arith.constant 0 : index
    %c0_10 = arith.constant 0 : index
    %c0_11 = arith.constant 0 : index
    %10 = vector.load %arg4[%c0_9, %c0_10, %c0_11] : memref<9x196x49xf32, #tpu.memory_space<vmem>>, vector<1x196x49xf32>
    %11 = vector.shape_cast %10 : vector<1x196x49xf32> to vector<196x49xf32>
    %cst_12 = arith.constant dense<0.000000e+00> : vector<64x49xf32>
    %12 = tpu.matmul %8, %11, %cst_12 {dimension_numbers = #tpu.dot_dimension_numbers<[1], [0], [0], [1], [0, 0, 1, 1], [], []>} : vector<64x196xf32>, vector<196x49xf32>, vector<64x49xf32> -> vector<64x49xf32>
    %c0_13 = arith.constant 0 : index
    %c0_14 = arith.constant 0 : index
    %c0_15 = arith.constant 0 : index
    %13 = vector.load %arg5[%c0_13, %c0_14, %c0_15] : memref<9x64x64xf32, #tpu.memory_space<vmem>>, vector<1x64x64xf32>
    %14 = vector.shape_cast %13 : vector<1x64x64xf32> to vector<64x64xf32>
    %cst_16 = arith.constant dense<0.000000e+00> : vector<64x49xf32>
    %15 = tpu.matmul %14, %12, %cst_16 {dimension_numbers = #tpu.dot_dimension_numbers<[1], [0], [0], [1], [0, 0, 1, 1], [], []>} : vector<64x64xf32>, vector<64x49xf32>, vector<64x49xf32> -> vector<64x49xf32>
    %16 = arith.addf %9, %15 : vector<64x49xf32>
    %c1 = arith.constant 1 : index
    %c0_17 = arith.constant 0 : index
    %c0_18 = arith.constant 0 : index
    %17 = vector.load %arg4[%c1, %c0_17, %c0_18] : memref<9x196x49xf32, #tpu.memory_space<vmem>>, vector<1x196x49xf32>
    %18 = vector.shape_cast %17 : vector<1x196x49xf32> to vector<196x49xf32>
    %cst_19 = arith.constant dense<0.000000e+00> : vector<64x49xf32>
    %19 = tpu.matmul %8, %18, %cst_19 {dimension_numbers = #tpu.dot_dimension_numbers<[1], [0], [0], [1], [0, 0, 1, 1], [], []>} : vector<64x196xf32>, vector<196x49xf32>, vector<64x49xf32> -> vector<64x49xf32>
    %c1_20 = arith.constant 1 : index
    %c0_21 = arith.constant 0 : index
    %c0_22 = arith.constant 0 : index
    %20 = vector.load %arg5[%c1_20, %c0_21, %c0_22] : memref<9x64x64xf32, #tpu.memory_space<vmem>>, vector<1x64x64xf32>
    %21 = vector.shape_cast %20 : vector<1x64x64xf32> to vector<64x64xf32>
    %cst_23 = arith.constant dense<0.000000e+00> : vector<64x49xf32>
    %22 = tpu.matmul %21, %19, %cst_23 {dimension_numbers = #tpu.dot_dimension_numbers<[1], [0], [0], [1], [0, 0, 1, 1], [], []>} : vector<64x64xf32>, vector<64x49xf32>, vector<64x49xf32> -> vector<64x49xf32>
    %23 = arith.addf %16, %22 : vector<64x49xf32>
    %c2 = arith.constant 2 : index
    %c0_24 = arith.constant 0 : index
    %c0_25 = arith.constant 0 : index
    %24 = vector.load %arg4[%c2, %c0_24, %c0_25] : memref<9x196x49xf32, #tpu.memory_space<vmem>>, vector<1x196x49xf32>
    %25 = vector.shape_cast %24 : vector<1x196x49xf32> to vector<196x49xf32>
    %cst_26 = arith.constant dense<0.000000e+00> : vector<64x49xf32>
    %26 = tpu.matmul %8, %25, %cst_26 {dimension_numbers = #tpu.dot_dimension_numbers<[1], [0], [0], [1], [0, 0, 1, 1], [], []>} : vector<64x196xf32>, vector<196x49xf32>, vector<64x49xf32> -> vector<64x49xf32>
    %c2_27 = arith.constant 2 : index
    %c0_28 = arith.constant 0 : index
    %c0_29 = arith.constant 0 : index
    %27 = vector.load %arg5[%c2_27, %c0_28, %c0_29] : memref<9x64x64xf32, #tpu.memory_space<vmem>>, vector<1x64x64xf32>
    %28 = vector.shape_cast %27 : vector<1x64x64xf32> to vector<64x64xf32>
    %cst_30 = arith.constant dense<0.000000e+00> : vector<64x49xf32>
    %29 = tpu.matmul %28, %26, %cst_30 {dimension_numbers = #tpu.dot_dimension_numbers<[1], [0], [0], [1], [0, 0, 1, 1], [], []>} : vector<64x64xf32>, vector<64x49xf32>, vector<64x49xf32> -> vector<64x49xf32>
    %30 = arith.addf %23, %29 : vector<64x49xf32>
    %c3 = arith.constant 3 : index
    %c0_31 = arith.constant 0 : index
    %c0_32 = arith.constant 0 : index
    %31 = vector.load %arg4[%c3, %c0_31, %c0_32] : memref<9x196x49xf32, #tpu.memory_space<vmem>>, vector<1x196x49xf32>
    %32 = vector.shape_cast %31 : vector<1x196x49xf32> to vector<196x49xf32>
    %cst_33 = arith.constant dense<0.000000e+00> : vector<64x49xf32>
    %33 = tpu.matmul %8, %32, %cst_33 {dimension_numbers = #tpu.dot_dimension_numbers<[1], [0], [0], [1], [0, 0, 1, 1], [], []>} : vector<64x196xf32>, vector<196x49xf32>, vector<64x49xf32> -> vector<64x49xf32>
    %c3_34 = arith.constant 3 : index
    %c0_35 = arith.constant 0 : index
    %c0_36 = arith.constant 0 : index
    %34 = vector.load %arg5[%c3_34, %c0_35, %c0_36] : memref<9x64x64xf32, #tpu.memory_space<vmem>>, vector<1x64x64xf32>
    %35 = vector.shape_cast %34 : vector<1x64x64xf32> to vector<64x64xf32>
    %cst_37 = arith.constant dense<0.000000e+00> : vector<64x49xf32>
    %36 = tpu.matmul %35, %33, %cst_37 {dimension_numbers = #tpu.dot_dimension_numbers<[1], [0], [0], [1], [0, 0, 1, 1], [], []>} : vector<64x64xf32>, vector<64x49xf32>, vector<64x49xf32> -> vector<64x49xf32>
    %37 = arith.addf %30, %36 : vector<64x49xf32>
    %c4 = arith.constant 4 : index
    %c0_38 = arith.constant 0 : index
    %c0_39 = arith.constant 0 : index
    %38 = vector.load %arg4[%c4, %c0_38, %c0_39] : memref<9x196x49xf32, #tpu.memory_space<vmem>>, vector<1x196x49xf32>
    %39 = vector.shape_cast %38 : vector<1x196x49xf32> to vector<196x49xf32>
    %cst_40 = arith.constant dense<0.000000e+00> : vector<64x49xf32>
    %40 = tpu.matmul %8, %39, %cst_40 {dimension_numbers = #tpu.dot_dimension_numbers<[1], [0], [0], [1], [0, 0, 1, 1], [], []>} : vector<64x196xf32>, vector<196x49xf32>, vector<64x49xf32> -> vector<64x49xf32>
    %c4_41 = arith.constant 4 : index
    %c0_42 = arith.constant 0 : index
    %c0_43 = arith.constant 0 : index
    %41 = vector.load %arg5[%c4_41, %c0_42, %c0_43] : memref<9x64x64xf32, #tpu.memory_space<vmem>>, vector<1x64x64xf32>
    %42 = vector.shape_cast %41 : vector<1x64x64xf32> to vector<64x64xf32>
    %cst_44 = arith.constant dense<0.000000e+00> : vector<64x49xf32>
    %43 = tpu.matmul %42, %40, %cst_44 {dimension_numbers = #tpu.dot_dimension_numbers<[1], [0], [0], [1], [0, 0, 1, 1], [], []>} : vector<64x64xf32>, vector<64x49xf32>, vector<64x49xf32> -> vector<64x49xf32>
    %44 = arith.addf %37, %43 : vector<64x49xf32>
    %c5 = arith.constant 5 : index
    %c0_45 = arith.constant 0 : index
    %c0_46 = arith.constant 0 : index
    %45 = vector.load %arg4[%c5, %c0_45, %c0_46] : memref<9x196x49xf32, #tpu.memory_space<vmem>>, vector<1x196x49xf32>
    %46 = vector.shape_cast %45 : vector<1x196x49xf32> to vector<196x49xf32>
    %cst_47 = arith.constant dense<0.000000e+00> : vector<64x49xf32>
    %47 = tpu.matmul %8, %46, %cst_47 {dimension_numbers = #tpu.dot_dimension_numbers<[1], [0], [0], [1], [0, 0, 1, 1], [], []>} : vector<64x196xf32>, vector<196x49xf32>, vector<64x49xf32> -> vector<64x49xf32>
    %c5_48 = arith.constant 5 : index
    %c0_49 = arith.constant 0 : index
    %c0_50 = arith.constant 0 : index
    %48 = vector.load %arg5[%c5_48, %c0_49, %c0_50] : memref<9x64x64xf32, #tpu.memory_space<vmem>>, vector<1x64x64xf32>
    %49 = vector.shape_cast %48 : vector<1x64x64xf32> to vector<64x64xf32>
    %cst_51 = arith.constant dense<0.000000e+00> : vector<64x49xf32>
    %50 = tpu.matmul %49, %47, %cst_51 {dimension_numbers = #tpu.dot_dimension_numbers<[1], [0], [0], [1], [0, 0, 1, 1], [], []>} : vector<64x64xf32>, vector<64x49xf32>, vector<64x49xf32> -> vector<64x49xf32>
    %51 = arith.addf %44, %50 : vector<64x49xf32>
    %c6 = arith.constant 6 : index
    %c0_52 = arith.constant 0 : index
    %c0_53 = arith.constant 0 : index
    %52 = vector.load %arg4[%c6, %c0_52, %c0_53] : memref<9x196x49xf32, #tpu.memory_space<vmem>>, vector<1x196x49xf32>
    %53 = vector.shape_cast %52 : vector<1x196x49xf32> to vector<196x49xf32>
    %cst_54 = arith.constant dense<0.000000e+00> : vector<64x49xf32>
    %54 = tpu.matmul %8, %53, %cst_54 {dimension_numbers = #tpu.dot_dimension_numbers<[1], [0], [0], [1], [0, 0, 1, 1], [], []>} : vector<64x196xf32>, vector<196x49xf32>, vector<64x49xf32> -> vector<64x49xf32>
    %c6_55 = arith.constant 6 : index
    %c0_56 = arith.constant 0 : index
    %c0_57 = arith.constant 0 : index
    %55 = vector.load %arg5[%c6_55, %c0_56, %c0_57] : memref<9x64x64xf32, #tpu.memory_space<vmem>>, vector<1x64x64xf32>
    %56 = vector.shape_cast %55 : vector<1x64x64xf32> to vector<64x64xf32>
    %cst_58 = arith.constant dense<0.000000e+00> : vector<64x49xf32>
    %57 = tpu.matmul %56, %54, %cst_58 {dimension_numbers = #tpu.dot_dimension_numbers<[1], [0], [0], [1], [0, 0, 1, 1], [], []>} : vector<64x64xf32>, vector<64x49xf32>, vector<64x49xf32> -> vector<64x49xf32>
    %58 = arith.addf %51, %57 : vector<64x49xf32>
    %c7 = arith.constant 7 : index
    %c0_59 = arith.constant 0 : index
    %c0_60 = arith.constant 0 : index
    %59 = vector.load %arg4[%c7, %c0_59, %c0_60] : memref<9x196x49xf32, #tpu.memory_space<vmem>>, vector<1x196x49xf32>
    %60 = vector.shape_cast %59 : vector<1x196x49xf32> to vector<196x49xf32>
    %cst_61 = arith.constant dense<0.000000e+00> : vector<64x49xf32>
    %61 = tpu.matmul %8, %60, %cst_61 {dimension_numbers = #tpu.dot_dimension_numbers<[1], [0], [0], [1], [0, 0, 1, 1], [], []>} : vector<64x196xf32>, vector<196x49xf32>, vector<64x49xf32> -> vector<64x49xf32>
    %c7_62 = arith.constant 7 : index
    %c0_63 = arith.constant 0 : index
    %c0_64 = arith.constant 0 : index
    %62 = vector.load %arg5[%c7_62, %c0_63, %c0_64] : memref<9x64x64xf32, #tpu.memory_space<vmem>>, vector<1x64x64xf32>
    %63 = vector.shape_cast %62 : vector<1x64x64xf32> to vector<64x64xf32>
    %cst_65 = arith.constant dense<0.000000e+00> : vector<64x49xf32>
    %64 = tpu.matmul %63, %61, %cst_65 {dimension_numbers = #tpu.dot_dimension_numbers<[1], [0], [0], [1], [0, 0, 1, 1], [], []>} : vector<64x64xf32>, vector<64x49xf32>, vector<64x49xf32> -> vector<64x49xf32>
    %65 = arith.addf %58, %64 : vector<64x49xf32>
    %c8 = arith.constant 8 : index
    %c0_66 = arith.constant 0 : index
    %c0_67 = arith.constant 0 : index
    %66 = vector.load %arg4[%c8, %c0_66, %c0_67] : memref<9x196x49xf32, #tpu.memory_space<vmem>>, vector<1x196x49xf32>
    %67 = vector.shape_cast %66 : vector<1x196x49xf32> to vector<196x49xf32>
    %cst_68 = arith.constant dense<0.000000e+00> : vector<64x49xf32>
    %68 = tpu.matmul %8, %67, %cst_68 {dimension_numbers = #tpu.dot_dimension_numbers<[1], [0], [0], [1], [0, 0, 1, 1], [], []>} : vector<64x196xf32>, vector<196x49xf32>, vector<64x49xf32> -> vector<64x49xf32>
    %c8_69 = arith.constant 8 : index
    %c0_70 = arith.constant 0 : index
    %c0_71 = arith.constant 0 : index
    %69 = vector.load %arg5[%c8_69, %c0_70, %c0_71] : memref<9x64x64xf32, #tpu.memory_space<vmem>>, vector<1x64x64xf32>
    %70 = vector.shape_cast %69 : vector<1x64x64xf32> to vector<64x64xf32>
    %cst_72 = arith.constant dense<0.000000e+00> : vector<64x49xf32>
    %71 = tpu.matmul %70, %68, %cst_72 {dimension_numbers = #tpu.dot_dimension_numbers<[1], [0], [0], [1], [0, 0, 1, 1], [], []>} : vector<64x64xf32>, vector<64x49xf32>, vector<64x49xf32> -> vector<64x49xf32>
    %72 = arith.addf %65, %71 : vector<64x49xf32>
    %cst_73 = arith.constant 2.000000e-01 : f32
    %73 = vector.broadcast %cst_73 : f32 to vector<64x49xf32>
    %74 = arith.mulf %73, %72 : vector<64x49xf32>
    %75 = arith.maximumf %72, %74 : vector<64x49xf32>
    %c0_74 = arith.constant 0 : index
    %c0_75 = arith.constant 0 : index
    %76 = vector.load %arg6[%c0_74, %c0_75] : memref<64x49xf32, #tpu.memory_space<vmem>>, vector<64x49xf32>
    %77 = arith.mulf %75, %76 : vector<64x49xf32>
    %cst_76 = arith.constant dense<0.000000e+00> : vector<64xf32>
    %78 = vector.multi_reduction <add>, %77, %cst_76 [1] : vector<64x49xf32> to vector<64xf32>
    %79 = vector.shape_cast %78 : vector<64xf32> to vector<64x1xf32>
    %cst_77 = arith.constant dense<0.000000e+00> : vector<1xf32>
    %80 = vector.multi_reduction <add>, %79, %cst_77 [0] : vector<64x1xf32> to vector<1xf32>
    %81 = vector.shape_cast %80 : vector<1xf32> to vector<1x1xf32>
    %c0_78 = arith.constant 0 : index
    %c0_79 = arith.constant 0 : index
    %82 = vector.load %arg7[%c0_78, %c0_79] : memref<1x1xf32, #tpu.memory_space<vmem>>, vector<1x1xf32>
    %83 = arith.addf %81, %82 : vector<1x1xf32>
    %84 = arith.negf %83 : vector<1x1xf32>
    %85 = math.exp %84 : vector<1x1xf32>
    %cst_80 = arith.constant 1.000000e+00 : f32
    %86 = vector.broadcast %cst_80 : f32 to vector<1x1xf32>
    %87 = arith.addf %86, %85 : vector<1x1xf32>
    %88 = arith.divf %86, %87 : vector<1x1xf32>
    %c0_81 = arith.constant 0 : index
    %c0_82 = arith.constant 0 : index
    %c0_83 = arith.constant 0 : index
    %89 = vector.load %arg8[%c0_81, %c0_82, %c0_83] : memref<1x1x1xf32, #tpu.memory_space<vmem>>, vector<1x1x1xf32>
    %90 = vector.shape_cast %89 : vector<1x1x1xf32> to vector<1x1xf32>
    %91 = vector.shape_cast %88 : vector<1x1xf32> to vector<1x1x1xf32>
    tpu.vector_store %arg8[%c0_81, %c0_82, %c0_83], %91 {strides = array<i32>} : memref<1x1x1xf32, #tpu.memory_space<vmem>>, vector<1x1x1xf32>,
    return
  }
  func.func @transform_0(%arg0: i32) -> (i32, i32, i32) {
    %c0_i32 = arith.constant 0 : i32
    %c0_i32_0 = arith.constant 0 : i32
    %c0_i32_1 = arith.constant 0 : i32
    return %arg0, %c0_i32, %c0_i32_0 : i32, i32, i32
  }
  func.func @transform_1(%arg0: i32) -> (i32, i32) {
    %c0_i32 = arith.constant 0 : i32
    %c0_i32_0 = arith.constant 0 : i32
    %c0_i32_1 = arith.constant 0 : i32
    return %c0_i32, %c0_i32_0 : i32, i32
  }
  func.func @transform_2(%arg0: i32) -> (i32, i32) {
    %c0_i32 = arith.constant 0 : i32
    %c0_i32_0 = arith.constant 0 : i32
    %c0_i32_1 = arith.constant 0 : i32
    return %c0_i32, %c0_i32_0 : i32, i32
  }
  func.func @transform_3(%arg0: i32) -> (i32, i32, i32) {
    %c0_i32 = arith.constant 0 : i32
    %c0_i32_0 = arith.constant 0 : i32
    %c0_i32_1 = arith.constant 0 : i32
    %c0_i32_2 = arith.constant 0 : i32
    return %c0_i32, %c0_i32_0, %c0_i32_1 : i32, i32, i32
  }
  func.func @transform_4(%arg0: i32) -> (i32, i32, i32) {
    %c0_i32 = arith.constant 0 : i32
    %c0_i32_0 = arith.constant 0 : i32
    %c0_i32_1 = arith.constant 0 : i32
    %c0_i32_2 = arith.constant 0 : i32
    return %c0_i32, %c0_i32_0, %c0_i32_1 : i32, i32, i32
  }
  func.func @transform_5(%arg0: i32) -> (i32, i32) {
    %c0_i32 = arith.constant 0 : i32
    %c0_i32_0 = arith.constant 0 : i32
    %c0_i32_1 = arith.constant 0 : i32
    return %c0_i32, %c0_i32_0 : i32, i32
  }
  func.func @transform_6(%arg0: i32) -> (i32, i32) {
    %c0_i32 = arith.constant 0 : i32
    %c0_i32_0 = arith.constant 0 : i32
    %c0_i32_1 = arith.constant 0 : i32
    return %c0_i32, %c0_i32_0 : i32, i32
  }
  func.func @transform_7(%arg0: i32) -> (i32, i32, i32) {
    %c0_i32 = arith.constant 0 : i32
    %c0_i32_0 = arith.constant 0 : i32
    %c0_i32_1 = arith.constant 0 : i32
    return %arg0, %c0_i32, %c0_i32_0 : i32, i32, i32
  }
}

</mosaic_0001>

<bundles_post_ra>
// kernel: discriminator3_forward.1
= control target key start
LH: loop header
LB: loop body
LE: loop exit
PB: predicated region body
PF: predicated region fallthrough
CT: control target
= control target key end

     0   :  { %s6921_s0 = inlined_call_operand.vmem [shape: f32[2,9,784], index: 0, kind: input, shape index: {}]   ;;  %s6922_s1 = inlined_call_operand.vmem [shape: f32[64,9], index: 1, kind: input, shape index: {}]   ;;  %s6923_s2 = inlined_call_operand.hbm [shape: f32[784,196], index: 2, kind: input, shape index: {}]   ;;  %s6924_s3 = inlined_call_operand.vmem [shape: f32[9,196,49], index: 3, kind: input, shape index: {}]   ;;  %s6925_s4 = inlined_call_operand.vmem [shape: f32[9,64,64], index: 4, kind: input, shape index: {}]   ;;  %s6926_s5 = inlined_call_operand.vmem [shape: f32[64,49], index: 5, kind: input, shape index: {}]   ;;  %s6927_s6 = inlined_call_operand.<no memory space> [shape: f32[1,1], index: 6, kind: input, shape index: {}]   ;;  %s6928_s7 = inlined_call_operand.vmem [shape: f32[2,1,1], index: 7, kind: output, shape index: {}]  }
   0x1   :  { %v12_v0 = vstv %s6927_s6 }
   0x2   :  { %13 = vst [vmem:[#allocation2] sm:$0x1] %v12_v0 }
   0x3   :  { %14 = vsyncpa [#allocation4], 0  ;;  %s5378_s26 = smov 0  }
   0x4 LB: > { %s5384_s27 = sadd.s32 4294967295, %s5327_s26   ;;  %p3672_p0 = scmp.ge.s32.totalorder %s5327_s26, 1  ;;  %s5327_s26 = sphi %s5378_s26, %s20_s26  }
   0x5   : > { %p203_p1 = scmp.lt.s32.totalorder %s5327_s26, 3  ;;  %s5329_s28 = smov [#allocation3]  }
   0x6   : > { %s218_s6 = sshll.u32 %s5329_s28, 4  ;;  %p6929_p3 = scmp.eq.s32.totalorder %s5384_s27, 0  ;;  %s219_s6 = int_to_ptr.vmem [resolvable:$true] %s218_s6 }
   0x7   : > { %p5388_p2 = pnand %p3672_p0, %p203_p1  ;;  %s5289_s10 = scalar_lea.hbm %s6923_s2, 25088 }
   0x8   : > { %p5290_p6 = scmp.ne.s32.totalorder %s6923_s2, %s5289_s10  ;;  %p5296_p10 = scmp.lt.u32.totalorder %s5289_s10, %s6923_s2 }
   0x9   : > { %s6931_s29 = scalar_select %p5388_p2, 1, 0 }
   0xa   : > { %p5265_p4 = pneg %p5388_p2 }
   0xc   : > { %p5397_p5 = pnand %p6929_p3, %p5265_p4 }
   0xe   : > { %p5291_p7 = pneg %p5397_p5 }
  0x10   : > { %p5292_p8 = pnand %p5291_p7, %p5290_p6 }
  0x12   : > { %p5293_p9 = pneg %p5292_p8 }
  0x14   : > { %p5298_p11 = pnand %p5296_p10, %p5293_p9 }
  0x16   : > { %5301 = shalt.err (!%p5298_p11)
}
  0x17   : > { %s5302_s15 = scalar_lea.vmem %s219_s6, 25088  ;;  %p5310_p1 = scmp.lt.s32.totalorder %s219_s6, %s219_s6 }
  0x18   : > { %p5303_p12 = scmp.ne.s32.totalorder %s219_s6, %s5302_s15  ;;  %p5311_p4 = scmp.lt.s32.totalorder %s5302_s15, %s5302_s15 }
  0x1a   : > { %p5305_p13 = pnand %p5303_p12, %p5291_p7  ;;  %p5312_p3 = por %p5311_p4, %p5310_p1 }
  0x1c   : > { %p5306_p0 = pneg %p5305_p13 }
  0x1e   : > { %p5313_p2 = pnand %p5312_p3, %p5306_p0 }
  0x20   : > { %5316 = shalt.err (!%p5313_p2)
}
  0x21   : > { %s5330_s16 = smov 256   ;;  %s5331_s17 = smov 16  }
  0x22   : > { %5268 = dma.hbm_to_vmem [thread:$0]  (!%p5397_p5), %s6923_s2, 25088, %s219_s6, [#allocation4], %s5330_s16, %s5330_s16, %s5331_s17  }
  0x23   : > { %p6933_p6 = scmp.ne.s32.totalorder %s6931_s29, 0 }
  0x24   : > { %p6934_p8 = scmp.eq.s32.totalorder (!%p6933_p6), %s5384_s27, 0 }
  0x25   : > { %254 = sbr.rel (%p6933_p6) target bundleno = 2378 (0x94a), region = 48 }
  0x2c   : > { %5322 = dma.done.wait (%p6934_p8), [#allocation4], 25088   ;;  %p6935_p7 = pmov %p6934_p8 }
  0x2d   : > { %v307_v1 = vld [vmem:[#allocation3 + $0x8] sm:$0xff]  ;;  %v309_v2 = vld [vmem:[#allocation3 + $0x18] sm:$0xff]  ;;  %v306_v3 = vld [vmem:[#allocation3] sm:$0xff]  ;;  %p284_p2 = scmp.lt.s32.totalorder %s5384_s27, 1  ;;  %vm502_vm0 = vcmask 130048   ;;  %vm850_vm1 = vcmask 1040384  }
  0x2e   : > { %5324 = vsyncadd (%p6935_p7), [#allocation4], 4294942208  ;;  %v4506_v4 = vpack.c.bf16 %v309_v2, %v307_v1  ;;  %v308_v5 = vld [vmem:[#allocation3 + $0x10] sm:$0xff]  ;;  %v311_v6 = vld [vmem:[#allocation3 + $0x28] sm:$0xff]  ;;  %vm5333_vm2 = vmmov 1   ;;  %vm825_vm4 = vcmask 72704  }
  0x2f   : > { %v313_v7 = vld [vmem:[#allocation3 + $0x38] sm:$0xff]  ;;  %v4508_v8 = vpack.c.bf16 %v308_v5, %v306_v3  ;;  %v310_v10 = vld [vmem:[#allocation3 + $0x20] sm:$0xff]  ;;  %v312_v11 = vld [vmem:[#allocation3 + $0x30] sm:$0xff]  ;;  %s6937_s27 = smov (!%p284_p2, %s5384_s27), 1  ;;  %vm1052_vm5 = vcmask 1043456   ;;  %vm1027_vm6 = vcmask 556032  }
  0x30   : > { %v4510_v9 = vpack.c.bf16 %v313_v7, %v311_v6  ;;  %v315_v12 = vld [vmem:[#allocation3 + $0x48] sm:$0xff]  ;;  %4507 = vmatprep.subr.bf16.mxu0 %v4506_v4  ;;  %v317_v13 = vld [vmem:[#allocation3 + $0x58] sm:$0xff]  ;;  %v4512_v14 = vpack.c.bf16 %v312_v11, %v310_v10  ;;  %v314_v16 = vld [vmem:[#allocation3 + $0x40] sm:$0xff]  ;;  %s5260_s20 = smul.u32 112, %s6937_s27  ;;  %vm1312_vm7 = vcmask 523264   ;;  %vm3563_vm8 = vcmask 400384   ;;  %s291_s14 = scalar_lea.vmem %s6928_s7, %s6937_s27 }
  0x31   : > { %4509 = vmatpush1.bf16.msra.mxu0 %v4508_v8  ;;  %v4514_v15 = vpack.c.bf16 %v317_v13, %v315_v12  ;;  %v316_v17 = vld [vmem:[#allocation3 + $0x50] sm:$0xff]  ;;  %v319_v18 = vld [vmem:[#allocation3 + $0x68] sm:$0xff]  ;;  %v321_v19 = vld [vmem:[#allocation3 + $0x78] sm:$0xff]  ;;  %vm3609_vm9 = vcmask 0  }
  0x32   : > { %4511 = vmatprep.subr.bf16.mxu0 %v4510_v9  ;;  %v4516_v20 = vpack.c.bf16 %v316_v17, %v314_v16  ;;  %v4518_v21 = vpack.c.bf16 %v321_v19, %v319_v18  ;;  %v318_v22 = vld [vmem:[#allocation3 + $0x60] sm:$0xff]  ;;  %v320_v23 = vld [vmem:[#allocation3 + $0x70] sm:$0xff]  ;;  %v323_v24 = vld [vmem:[#allocation3 + $0x88] sm:$0xff]  ;;  %s5431_s23 = scalar_lea.vmem %s6921_s0, %s5260_s20 }
  0x33   : > { %v325_v25 = vld [vmem:[#allocation3 + $0x98] sm:$0xff]  ;;  %v4520_v26 = vpack.c.bf16 %v320_v23, %v318_v22  ;;  %v322_v28 = vld [vmem:[#allocation3 + $0x80] sm:$0xff]  ;;  %v324_v29 = vld [vmem:[#allocation3 + $0x90] sm:$0xff] }
  0x34   : > { %v4522_v27 = vpack.c.bf16 %v325_v25, %v323_v24  ;;  %v327_v30 = vld [vmem:[#allocation3 + $0xa8] sm:$0xff]  ;;  %v329_v31 = vld [vmem:[#allocation3 + $0xb8] sm:$0xff]  ;;  %v4524_v32 = vpack.c.bf16 %v324_v29, %v322_v28  ;;  %v326_v34 = vld [vmem:[#allocation3 + $0xa0] sm:$0xff] }
  0x35   : > { %4513 = vmatpush1.bf16.msra.mxu0 %v4512_v14  ;;  %v4526_v33 = vpack.c.bf16 %v329_v31, %v327_v30  ;;  %v328_v35 = vld [vmem:[#allocation3 + $0xb0] sm:$0xff]  ;;  %v331_v36 = vld [vmem:[#allocation3 + $0xc8] sm:$0xff]  ;;  %v333_v37 = vld [vmem:[#allocation3 + $0xd8] sm:$0xff] }
  0x36   : > { %4515 = vmatprep.subr.bf16.mxu0 %v4514_v15  ;;  %v4528_v38 = vpack.c.bf16 %v328_v35, %v326_v34  ;;  %v4530_v39 = vpack.c.bf16 %v333_v37, %v331_v36  ;;  %v330_v40 = vld [vmem:[#allocation3 + $0xc0] sm:$0xff]  ;;  %v332_v41 = vld [vmem:[#allocation3 + $0xd0] sm:$0xff]  ;;  %v335_v43 = vld [vmem:[#allocation3 + $0xe8] sm:$0xff] }
  0x37   : > { %v293_v42 = vld [vmem:[%s5431_s23 + $0x8] sm:$0xff]  ;;  %v337_v44 = vld [vmem:[#allocation3 + $0xf8] sm:$0xff]  ;;  %v4532_v45 = vpack.c.bf16 %v332_v41, %v330_v40  ;;  %v336_v48 = vld [vmem:[#allocation3 + $0xf0] sm:$0xff] }
  0x38   : > { %573 = vmatprep.mubr.f32.mxu0 %v293_v42  ;;  %v4534_v46 = vpack.c.bf16 %v337_v44, %v335_v43  ;;  %v334_v47 = vld [vmem:[#allocation3 + $0xe0] sm:$0xff]  ;;  %v339_v49 = vld [vmem:[#allocation3 + $0x108] sm:$0xff]  ;;  %v341_v50 = vld [vmem:[#allocation3 + $0x118] sm:$0xff] }
  0x39   : > { %4517 = vmatpush1.bf16.msra.mxu0 %v4516_v20  ;;  %v4536_v51 = vpack.c.bf16 %v336_v48, %v334_v47  ;;  %v4538_v52 = vpack.c.bf16 %v341_v50, %v339_v49  ;;  %v338_v53 = vld [vmem:[#allocation3 + $0x100] sm:$0xff]  ;;  %v340_v54 = vld [vmem:[#allocation3 + $0x110] sm:$0xff]  ;;  %v343_v55 = vld [vmem:[#allocation3 + $0x128] sm:$0xff] }
  0x3a   : > { %4519 = vmatprep.subr.bf16.mxu0 %v4518_v21  ;;  %v345_v56 = vld [vmem:[#allocation3 + $0x138] sm:$0xff]  ;;  %v4540_v57 = vpack.c.bf16 %v340_v54, %v338_v53  ;;  %v342_v59 = vld [vmem:[#allocation3 + $0x120] sm:$0xff]  ;;  %v344_v60 = vld [vmem:[#allocation3 + $0x130] sm:$0xff] }
  0x3b   : > { %v4542_v58 = vpack.c.bf16 %v345_v56, %v343_v55  ;;  %v347_v61 = vld [vmem:[#allocation3 + $0x148] sm:$0xff]  ;;  %v349_v62 = vld [vmem:[#allocation3 + $0x158] sm:$0xff]  ;;  %v4544_v63 = vpack.c.bf16 %v344_v60, %v342_v59  ;;  %v346_v1 = vld [vmem:[#allocation3 + $0x140] sm:$0xff] }
  0x3c   : > { %v4546_v0 = vpack.c.bf16 %v349_v62, %v347_v61  ;;  %v348_v2 = vld [vmem:[#allocation3 + $0x150] sm:$0xff]  ;;  %v351_v3 = vld [vmem:[#allocation3 + $0x168] sm:$0xff]  ;;  %v353_v4 = vld [vmem:[#allocation3 + $0x178] sm:$0xff]  ;;  %v5332_v61 = vmov 0.0  }
  0x3d   : > { %4521 = vmatpush1.bf16.msra.mxu0 %v4520_v26  ;;  %v4548_v5 = vpack.c.bf16 %v348_v2, %v346_v1  ;;  %v4550_v6 = vpack.c.bf16 %v353_v4, %v351_v3  ;;  %v350_v7 = vld [vmem:[#allocation3 + $0x160] sm:$0xff]  ;;  %v352_v8 = vld [vmem:[#allocation3 + $0x170] sm:$0xff]  ;;  %v355_v9 = vld [vmem:[#allocation3 + $0x188] sm:$0xff]  ;;  %921 = vmatprep.mubr.f32.mxu1 %v5332_v61 }
  0x3e   : > { %4523 = vmatprep.subr.bf16.mxu0 %v4522_v27  ;;  %v357_v10 = vld [vmem:[#allocation3 + $0x198] sm:$0xff]  ;;  %v4552_v11 = vpack.c.bf16 %v352_v8, %v350_v7  ;;  %v354_v13 = vld [vmem:[#allocation3 + $0x180] sm:$0xff]  ;;  %v356_v14 = vld [vmem:[#allocation3 + $0x190] sm:$0xff] }
  0x3f   : > { %v4554_v12 = vpack.c.bf16 %v357_v10, %v355_v9  ;;  %v359_v15 = vld [vmem:[#allocation3 + $0x1a8] sm:$0xff]  ;;  %v361_v16 = vld [vmem:[#allocation3 + $0x1b8] sm:$0xff]  ;;  %v4556_v17 = vpack.c.bf16 %v356_v14, %v354_v13  ;;  %v358_v19 = vld [vmem:[#allocation3 + $0x1a0] sm:$0xff] }
  0x40   : > { %v4558_v18 = vpack.c.bf16 %v361_v16, %v359_v15  ;;  %v360_v20 = vld [vmem:[#allocation3 + $0x1b0] sm:$0xff]  ;;  %v363_v21 = vld [vmem:[#allocation3 + $0x1c8] sm:$0xff]  ;;  %v365_v22 = vld [vmem:[#allocation3 + $0x1d8] sm:$0xff] }
  0x41   : > { %4525 = vmatpush1.bf16.msra.mxu0 %v4524_v32  ;;  %v4560_v23 = vpack.c.bf16 %v360_v20, %v358_v19  ;;  %v4562_v24 = vpack.c.bf16 %v365_v22, %v363_v21  ;;  %v362_v25 = vld [vmem:[#allocation3 + $0x1c0] sm:$0xff]  ;;  %v364_v26 = vld [vmem:[#allocation3 + $0x1d0] sm:$0xff]  ;;  %v367_v27 = vld [vmem:[#allocation3 + $0x1e8] sm:$0xff] }
  0x42   : > { %4527 = vmatprep.subr.bf16.mxu0 %v4526_v33  ;;  %v369_v28 = vld [vmem:[#allocation3 + $0x1f8] sm:$0xff]  ;;  %v4564_v29 = vpack.c.bf16 %v364_v26, %v362_v25  ;;  %v366_v31 = vld [vmem:[#allocation3 + $0x1e0] sm:$0xff]  ;;  %v368_v32 = vld [vmem:[#allocation3 + $0x1f0] sm:$0xff] }
  0x43   : > { %v4566_v30 = vpack.c.bf16 %v369_v28, %v367_v27  ;;  %v371_v33 = vld [vmem:[#allocation3 + $0x208] sm:$0xff]  ;;  %v373_v34 = vld [vmem:[#allocation3 + $0x218] sm:$0xff]  ;;  %v4568_v35 = vpack.c.bf16 %v368_v32, %v366_v31  ;;  %v370_v37 = vld [vmem:[#allocation3 + $0x200] sm:$0xff] }
  0x44   : > { %v4570_v36 = vpack.c.bf16 %v373_v34, %v371_v33  ;;  %v377_v40 = vld [vmem:[#allocation3 + $0x238] sm:$0xff]  ;;  %v374_v44 = vld [vmem:[#allocation3 + $0x220] sm:$0xff]  ;;  %v379_v47 = vld [vmem:[#allocation3 + $0x248] sm:$0xff] }
  0x45   : > { %4529 = vmatpush1.bf16.msra.mxu0 %v4528_v38  ;;  %v372_v38 = vld [vmem:[#allocation3 + $0x210] sm:$0xff]  ;;  %v292_v41 = vld [vmem:[%s5431_s23] sm:$0xff]  ;;  %v383_v55 = vld [vmem:[#allocation3 + $0x268] sm:$0xff] }
  0x46   : > { %4531 = vmatprep.subr.bf16.mxu0 %v4530_v39  ;;  %v375_v39 = vld [vmem:[#allocation3 + $0x228] sm:$0xff]  ;;  %v4572_v42 = vpack.c.bf16 %v372_v38, %v370_v37  ;;  %v381_v48 = vld [vmem:[#allocation3 + $0x258] sm:$0xff]  ;;  %v299_v50 = vld [vmem:[%s5431_s23 + $0x38] sm:$0x1] }
  0x47   : > { %v4574_v43 = vpack.c.bf16 %v377_v40, %v375_v39  ;;  %v380_v53 = vld [vmem:[#allocation3 + $0x250] sm:$0xff]  ;;  %v385_v56 = vld [vmem:[#allocation3 + $0x278] sm:$0xff]  ;;  %v382_v59 = vld [vmem:[#allocation3 + $0x260] sm:$0xff] }
  0x48   : > { %v295_v54 = vld [vmem:[%s5431_s23 + $0x18] sm:$0xff]  ;;  %v387_v62 = vld [vmem:[#allocation3 + $0x288] sm:$0xff]  ;;  %v386_v2 = vld [vmem:[#allocation3 + $0x280] sm:$0xff] }
  0x49   : > { %4533 = vmatpush1.bf16.msra.mxu0 %v4532_v45  ;;  %v376_v45 = vld [vmem:[#allocation3 + $0x230] sm:$0xff]  ;;  %v391_v4 = vld [vmem:[#allocation3 + $0x2a8] sm:$0xff]  ;;  %v390_v8 = vld [vmem:[#allocation3 + $0x2a0] sm:$0xff] }
  0x4a   : > { %4535 = vmatprep.subr.bf16.mxu0 %v4534_v46  ;;  %v300_v46 = vld [vmem:[%s5431_s23 + $0x40] sm:$0x1]  ;;  %v4576_v49 = vpack.c.bf16 %v376_v45, %v374_v44  ;;  %v384_v60 = vld [vmem:[#allocation3 + $0x270] sm:$0xff]  ;;  %v395_v10 = vld [vmem:[#allocation3 + $0x2c8] sm:$0xff] }
  0x4b   : > { %v388_v3 = vld [vmem:[#allocation3 + $0x290] sm:$0xff]  ;;  %v394_v14 = vld [vmem:[#allocation3 + $0x2c0] sm:$0xff]  ;;  %v399_v16 = vld [vmem:[#allocation3 + $0x2e8] sm:$0xff] }
  0x4c   : > { %v392_v9 = vld [vmem:[#allocation3 + $0x2b0] sm:$0xff]  ;;  %v398_v20 = vld [vmem:[#allocation3 + $0x2e0] sm:$0xff]  ;;  %v403_v22 = vld [vmem:[#allocation3 + $0x308] sm:$0xff] }
  0x4d   : > { %4537 = vmatpush1.bf16.msra.mxu0 %v4536_v51  ;;  %v4578_v51 = vpack.c.bf16 %v381_v48, %v379_v47  ;;  %v396_v15 = vld [vmem:[#allocation3 + $0x2d0] sm:$0xff]  ;;  %v402_v26 = vld [vmem:[#allocation3 + $0x300] sm:$0xff]  ;;  %v407_v28 = vld [vmem:[#allocation3 + $0x328] sm:$0xff] }
  0x4e   : > { %4539 = vmatprep.subr.bf16.mxu0 %v4538_v52  ;;  %v378_v52 = vld [vmem:[#allocation3 + $0x240] sm:$0xff]  ;;  %v400_v21 = vld [vmem:[#allocation3 + $0x2f0] sm:$0xff]  ;;  %v411_v34 = vld [vmem:[#allocation3 + $0x348] sm:$0xff] }
  0x4f   : > { %v404_v27 = vld [vmem:[#allocation3 + $0x310] sm:$0xff]  ;;  %v406_v32 = vld [vmem:[#allocation3 + $0x320] sm:$0xff]  ;;  %v415_v40 = vld [vmem:[#allocation3 + $0x368] sm:$0xff] }
  0x50   : > { %v408_v33 = vld [vmem:[#allocation3 + $0x330] sm:$0xff]  ;;  %v410_v38 = vld [vmem:[#allocation3 + $0x340] sm:$0xff]  ;;  %v421_v47 = vld [vmem:[#allocation3 + $0x398] sm:$0xff] }
  0x51   : > { %4541 = vmatpush1.bf16.msra.mxu0 %v4540_v57  ;;  %v4580_v57 = vpack.c.bf16 %v380_v53, %v378_v52  ;;  %v412_v39 = vld [vmem:[#allocation3 + $0x350] sm:$0xff]  ;;  %v414_v44 = vld [vmem:[#allocation3 + $0x360] sm:$0xff]  ;;  %v423_v52 = vld [vmem:[#allocation3 + $0x3a8] sm:$0xff] }
  0x52   : > { %4543 = vmatprep.subr.bf16.mxu0 %v4542_v58  ;;  %v4582_v58 = vpack.c.bf16 %v385_v56, %v383_v55  ;;  %v416_v45 = vld [vmem:[#allocation3 + $0x370] sm:$0xff]  ;;  %v425_v53 = vld [vmem:[#allocation3 + $0x3b8] sm:$0xff]  ;;  %v422_v56 = vld [vmem:[#allocation3 + $0x3a0] sm:$0xff] }
  0x53   : > { %v4616_v48 = vpack.c.bf16 %v416_v45, %v414_v44  ;;  %v4622_v55 = vpack.c.bf16 %v425_v53, %v423_v52  ;;  %v454_v45 = vld [vmem:[#allocation3 + $0x4a0] sm:$0xff]  ;;  %v460_v52 = vld [vmem:[#allocation3 + $0x4d0] sm:$0xff]  ;;  %v463_v53 = vld [vmem:[#allocation3 + $0x4e8] sm:$0xff] }
  0x54   : > { %vm4703_vm3 = vmpackc.low %vm850_vm1, %vm5333_vm2 }
  0x55   : > { %4545 = vmatpush1.bf16.msra.mxu0 %v4544_v63  ;;  %v389_v63 = vld [vmem:[#allocation3 + $0x298] sm:$0xff] }
  0x56   : > { %4547 = vmatprep.subr.bf16.mxu0 %v4546_v0  ;;  %v4584_v0 = vpack.c.bf16 %v384_v60, %v382_v59  ;;  %v4586_v1 = vpack.c.bf16 %v389_v63, %v387_v62  ;;  %v429_v59 = vld [vmem:[#allocation3 + $0x3d8] sm:$0xff]  ;;  %v426_v63 = vld [vmem:[#allocation3 + $0x3c0] sm:$0xff] }
  0x59   : > { %4549 = vmatpush1.bf16.msra.mxu0 %v4548_v5  ;;  %v393_v5 = vld [vmem:[#allocation3 + $0x2b8] sm:$0xff] }
  0x5a   : > { %4551 = vmatprep.subr.bf16.mxu0 %v4550_v6  ;;  %v4588_v6 = vpack.c.bf16 %v388_v3, %v386_v2  ;;  %v4590_v7 = vpack.c.bf16 %v393_v5, %v391_v4  ;;  %v433_v2 = vld [vmem:[#allocation3 + $0x3f8] sm:$0xff]  ;;  %v430_v5 = vld [vmem:[#allocation3 + $0x3e0] sm:$0xff] }
  0x5d   : > { %4553 = vmatpush1.bf16.msra.mxu0 %v4552_v11  ;;  %v397_v11 = vld [vmem:[#allocation3 + $0x2d8] sm:$0xff] }
  0x5e   : > { %4555 = vmatprep.subr.bf16.mxu0 %v4554_v12  ;;  %v4592_v12 = vpack.c.bf16 %v392_v9, %v390_v8  ;;  %v4594_v13 = vpack.c.bf16 %v397_v11, %v395_v10  ;;  %v437_v8 = vld [vmem:[#allocation3 + $0x418] sm:$0xff]  ;;  %v434_v11 = vld [vmem:[#allocation3 + $0x400] sm:$0xff] }
  0x61   : > { %4557 = vmatpush1.bf16.msra.mxu0 %v4556_v17  ;;  %v401_v17 = vld [vmem:[#allocation3 + $0x2f8] sm:$0xff] }
  0x62   : > { %4559 = vmatprep.subr.bf16.mxu0 %v4558_v18  ;;  %v4596_v18 = vpack.c.bf16 %v396_v15, %v394_v14  ;;  %v4598_v19 = vpack.c.bf16 %v401_v17, %v399_v16  ;;  %v441_v14 = vld [vmem:[#allocation3 + $0x438] sm:$0xff]  ;;  %v294_v15 = vld [vmem:[%s5431_s23 + $0x10] sm:$0xff] }
  0x65   : > { %4561 = vmatpush1.bf16.msra.mxu0 %v4560_v23  ;;  %v405_v23 = vld [vmem:[#allocation3 + $0x318] sm:$0xff] }
  0x66   : > { %4563 = vmatprep.subr.bf16.mxu0 %v4562_v24  ;;  %v4600_v24 = vpack.c.bf16 %v400_v21, %v398_v20  ;;  %v4602_v25 = vpack.c.bf16 %v405_v23, %v403_v22  ;;  %v302_v20 = vld [vmem:[%s5431_s23 + $0x50] sm:$0x1]  ;;  %v445_v22 = vld [vmem:[#allocation3 + $0x458] sm:$0xff] }
  0x67   : > { %v443_v21 = vld [vmem:[#allocation3 + $0x448] sm:$0xff] }
  0x69   : > { %4565 = vmatpush1.bf16.msra.mxu0 %v4564_v29  ;;  %v409_v29 = vld [vmem:[#allocation3 + $0x338] sm:$0xff] }
  0x6a   : > { %4567 = vmatprep.subr.bf16.mxu0 %v4566_v30  ;;  %v4604_v30 = vpack.c.bf16 %v404_v27, %v402_v26  ;;  %v4606_v31 = vpack.c.bf16 %v409_v29, %v407_v28  ;;  %v442_v26 = vld [vmem:[#allocation3 + $0x440] sm:$0xff]  ;;  %v444_v27 = vld [vmem:[#allocation3 + $0x450] sm:$0xff]  ;;  %v447_v29 = vld [vmem:[#allocation3 + $0x468] sm:$0xff] }
  0x6b   : > { %v297_v28 = vld [vmem:[%s5431_s23 + $0x28] sm:$0xff] }
  0x6d   : > { %4569 = vmatpush1.bf16.msra.mxu0 %v4568_v35  ;;  %v413_v35 = vld [vmem:[#allocation3 + $0x358] sm:$0xff] }
  0x6e   : > { %4571 = vmatprep.subr.bf16.mxu0 %v4570_v36  ;;  %v4608_v36 = vpack.c.bf16 %v408_v33, %v406_v32  ;;  %v4610_v37 = vpack.c.bf16 %v413_v35, %v411_v34  ;;  %v446_v33 = vld [vmem:[#allocation3 + $0x460] sm:$0xff]  ;;  %v448_v34 = vld [vmem:[#allocation3 + $0x470] sm:$0xff]  ;;  %v451_v35 = vld [vmem:[#allocation3 + $0x488] sm:$0xff] }
  0x70   : > { %574 = vmatmul.mubr.f32.vlgmr.msra.gmra.mrb[0].mxu0 %v292_v41  ;;  %v417_v41 = vld [vmem:[#allocation3 + $0x378] sm:$0xff] }
  0x71   : > { %4573 = vmatpush1.bf16.msra.mxu0 %v4572_v42  ;;  %579 = vmatprep.mubr.f32.mxu0 %v300_v46  ;;  %v4612_v42 = vpack.c.bf16 %v412_v39, %v410_v38  ;;  %v419_v46 = vld [vmem:[#allocation3 + $0x388] sm:$0xff]  ;;  %v450_v39 = vld [vmem:[#allocation3 + $0x480] sm:$0xff] }
  0x72   : > { %4575 = vmatprep.subr.bf16.mxu0 %v4574_v43  ;;  %v4614_v43 = vpack.c.bf16 %v417_v41, %v415_v40  ;;  %v452_v40 = vld [vmem:[#allocation3 + $0x490] sm:$0xff]  ;;  %v455_v41 = vld [vmem:[#allocation3 + $0x4a8] sm:$0xff] }
  0x74   : > { %580 = vmatmul.mubr.f32.gmra.mrb[2].mxu0 %v299_v50  ;;  %v418_v50 = vld [vmem:[#allocation3 + $0x380] sm:$0xff] }
  0x75   : > { %4577 = vmatpush1.bf16.msra.mxu0 %v4576_v49  ;;  %650 = vmatprep.mubr.f32.mxu0 %v295_v54  ;;  %v4618_v49 = vpack.c.bf16 %v421_v47, %v419_v46  ;;  %v456_v46 = vld [vmem:[#allocation3 + $0x4b0] sm:$0xff]  ;;  %v459_v47 = vld [vmem:[#allocation3 + $0x4c8] sm:$0xff] }
  0x76   : > { %4579 = vmatprep.subr.bf16.mxu0 %v4578_v51  ;;  %v420_v51 = vld [vmem:[#allocation3 + $0x390] sm:$0xff] }
  0x77   : > { %v4620_v54 = vpack.c.bf16 %v420_v51, %v418_v50  ;;  %v458_v51 = vld [vmem:[#allocation3 + $0x4c0] sm:$0xff] }
  0x79   : > { %4581 = vmatpush1.bf16.msra.mxu0 %v4580_v57  ;;  %v424_v57 = vld [vmem:[#allocation3 + $0x3b0] sm:$0xff] }
  0x7a   : > { %4583 = vmatprep.subr.bf16.mxu0 %v4582_v58  ;;  %v427_v58 = vld [vmem:[#allocation3 + $0x3c8] sm:$0xff]  ;;  %v4624_v60 = vpack.c.bf16 %v424_v57, %v422_v56  ;;  %v462_v57 = vld [vmem:[#allocation3 + $0x4e0] sm:$0xff] }
  0x7b   : > { %v4626_v62 = vpack.c.bf16 %v429_v59, %v427_v58  ;;  %v464_v58 = vld [vmem:[#allocation3 + $0x4f0] sm:$0xff]  ;;  %v467_v59 = vld [vmem:[#allocation3 + $0x508] sm:$0xff] }
  0x7d   : > { %4585 = vmatpush1.bf16.msra.mxu0 %v4584_v0  ;;  %v428_v0 = vld [vmem:[#allocation3 + $0x3d0] sm:$0xff] }
  0x7e   : > { %4587 = vmatprep.subr.bf16.mxu0 %v4586_v1  ;;  %v431_v1 = vld [vmem:[#allocation3 + $0x3e8] sm:$0xff]  ;;  %v4628_v3 = vpack.c.bf16 %v428_v0, %v426_v63  ;;  %v466_v0 = vld [vmem:[#allocation3 + $0x500] sm:$0xff] }
  0x7f   : > { %v4630_v4 = vpack.c.bf16 %v433_v2, %v431_v1  ;;  %v468_v1 = vld [vmem:[#allocation3 + $0x510] sm:$0xff]  ;;  %v471_v2 = vld [vmem:[#allocation3 + $0x528] sm:$0xff] }
  0x81   : > { %4589 = vmatpush1.bf16.msra.mxu0 %v4588_v6  ;;  %v432_v6 = vld [vmem:[#allocation3 + $0x3f0] sm:$0xff] }
  0x82   : > { %4591 = vmatprep.subr.bf16.mxu0 %v4590_v7  ;;  %v435_v7 = vld [vmem:[#allocation3 + $0x408] sm:$0xff]  ;;  %v4632_v9 = vpack.c.bf16 %v432_v6, %v430_v5  ;;  %v470_v6 = vld [vmem:[#allocation3 + $0x520] sm:$0xff] }
  0x83   : > { %v4634_v10 = vpack.c.bf16 %v437_v8, %v435_v7  ;;  %v472_v7 = vld [vmem:[#allocation3 + $0x530] sm:$0xff]  ;;  %v475_v8 = vld [vmem:[#allocation3 + $0x548] sm:$0xff] }
  0x85   : > { %4593 = vmatpush1.bf16.msra.mxu0 %v4592_v12  ;;  %v436_v12 = vld [vmem:[#allocation3 + $0x410] sm:$0xff] }
  0x86   : > { %4595 = vmatprep.subr.bf16.mxu0 %v4594_v13  ;;  %v439_v13 = vld [vmem:[#allocation3 + $0x428] sm:$0xff]  ;;  %v4636_v16 = vpack.c.bf16 %v436_v12, %v434_v11  ;;  %v474_v12 = vld [vmem:[#allocation3 + $0x540] sm:$0xff] }
  0x87   : > { %v4638_v17 = vpack.c.bf16 %v441_v14, %v439_v13  ;;  %v476_v13 = vld [vmem:[#allocation3 + $0x550] sm:$0xff]  ;;  %v479_v14 = vld [vmem:[#allocation3 + $0x568] sm:$0xff] }
  0x89   : > { %4597 = vmatpush1.bf16.msra.mxu0 %v4596_v18  ;;  %v438_v18 = vld [vmem:[#allocation3 + $0x420] sm:$0xff] }
  0x8a   : > { %4599 = vmatprep.subr.bf16.mxu0 %v4598_v19  ;;  %v440_v19 = vld [vmem:[#allocation3 + $0x430] sm:$0xff] }
  0x8b   : > { %v4640_v23 = vpack.c.bf16 %v440_v19, %v438_v18  ;;  %v478_v18 = vld [vmem:[#allocation3 + $0x560] sm:$0xff]  ;;  %v480_v19 = vld [vmem:[#allocation3 + $0x570] sm:$0xff] }
  0x8d   : > { %4601 = vmatpush1.bf16.msra.mxu0 %v4600_v24  ;;  %v301_v24 = vld [vmem:[%s5431_s23 + $0x48] sm:$0x1] }
  0x8e   : > { %4603 = vmatprep.subr.bf16.mxu0 %v4602_v25  ;;  %v4642_v25 = vpack.c.bf16 %v445_v22, %v443_v21  ;;  %v485_v21 = vld [vmem:[#allocation3 + $0x598] sm:$0xff]  ;;  %v4680_v22 = vpack.c.bf16 %v480_v19, %v478_v18 }
  0x8f   : > { %v821_v18 = vld [vmem:[%s6922_s1 + $0x20] sm:$0xff] }
  0x91   : > { %4605 = vmatpush1.bf16.msra.mxu0 %v4604_v30  ;;  %v449_v30 = vld [vmem:[#allocation3 + $0x478] sm:$0xff] }
  0x92   : > { %4607 = vmatprep.subr.bf16.mxu0 %v4606_v31  ;;  %v4644_v31 = vpack.c.bf16 %v444_v27, %v442_v26  ;;  %v4646_v32 = vpack.c.bf16 %v449_v30, %v447_v29  ;;  %v487_v26 = vld [vmem:[#allocation3 + $0x5a8] sm:$0xff]  ;;  %v489_v27 = vld [vmem:[#allocation3 + $0x5b8] sm:$0xff]  ;;  %v486_v30 = vld [vmem:[#allocation3 + $0x5a0] sm:$0xff] }
  0x93   : > { %v4686_v29 = vpack.c.bf16 %v489_v27, %v487_v26  ;;  %v823_v26 = vld [vmem:[%s6922_s1 + $0x30] sm:$0xff] }
  0x95   : > { %4609 = vmatpush1.bf16.msra.mxu0 %v4608_v36  ;;  %v453_v36 = vld [vmem:[#allocation3 + $0x498] sm:$0xff] }
  0x96   : > { %4611 = vmatprep.subr.bf16.mxu0 %v4610_v37  ;;  %v4648_v37 = vpack.c.bf16 %v448_v34, %v446_v33  ;;  %v4650_v38 = vpack.c.bf16 %v453_v36, %v451_v35  ;;  %v493_v33 = vld [vmem:[#allocation3 + $0x5d8] sm:$0xff]  ;;  %v490_v36 = vld [vmem:[#allocation3 + $0x5c0] sm:$0xff] }
  0x99   : > { %4613 = vmatpush1.bf16.msra.mxu0 %v4612_v42  ;;  %v457_v42 = vld [vmem:[#allocation3 + $0x4b8] sm:$0xff] }
  0x9a   : > { %4615 = vmatprep.subr.bf16.mxu0 %v4614_v43  ;;  %v4652_v43 = vpack.c.bf16 %v452_v40, %v450_v39  ;;  %v4654_v44 = vpack.c.bf16 %v457_v42, %v455_v41  ;;  %v497_v39 = vld [vmem:[#allocation3 + $0x5f8] sm:$0xff]  ;;  %v494_v42 = vld [vmem:[#allocation3 + $0x5e0] sm:$0xff] }
  0x9d   : > { %4617 = vmatpush1.bf16.msra.mxu0 %v4616_v48  ;;  %v461_v48 = vld [vmem:[#allocation3 + $0x4d8] sm:$0xff] }
  0x9e   : > { %4619 = vmatprep.subr.bf16.mxu0 %v4618_v49  ;;  %v4656_v49 = vpack.c.bf16 %v456_v46, %v454_v45  ;;  %v4658_v50 = vpack.c.bf16 %v461_v48, %v459_v47  ;;  %v501_v45 = vld [vmem:[#allocation3 + $0x618] sm:$0xff]  ;;  %v498_v48 = vld [vmem:[#allocation3 + $0x600] sm:$0xff] }
  0xa1   : > { %4621 = vmatpush1.bf16.msra.mxu0 %v4620_v54  ;;  %v465_v54 = vld [vmem:[#allocation3 + $0x4f8] sm:$0xff] }
  0xa2   : > { %4623 = vmatprep.subr.bf16.mxu0 %v4622_v55  ;;  %v4660_v55 = vpack.c.bf16 %v460_v52, %v458_v51  ;;  %v4662_v56 = vpack.c.bf16 %v465_v54, %v463_v53  ;;  %v304_v52 = vld [vmem:[%s5431_s23 + $0x60] sm:$0x1]  ;;  %v303_v53 = vld [vmem:[%s5431_s23 + $0x58] sm:$0x1]  ;;  %v298_v54 = vld [vmem:[%s5431_s23 + $0x30] sm:$0xff] }
  0xa5   : > { %4625 = vmatpush1.bf16.msra.mxu0 %v4624_v60  ;;  %v469_v60 = vld [vmem:[#allocation3 + $0x518] sm:$0xff] }
  0xa6   : > { %4627 = vmatprep.subr.bf16.mxu0 %v4626_v62  ;;  %v4664_v62 = vpack.c.bf16 %v464_v58, %v462_v57  ;;  %v4666_v63 = vpack.c.bf16 %v469_v60, %v467_v59 }
  0xa9   : > { %4629 = vmatpush1.bf16.msra.mxu0 %v4628_v3  ;;  %v473_v3 = vld [vmem:[#allocation3 + $0x538] sm:$0xff] }
  0xaa   : > { %4631 = vmatprep.subr.bf16.mxu0 %v4630_v4  ;;  %v4668_v4 = vpack.c.bf16 %v468_v1, %v466_v0  ;;  %v4670_v5 = vpack.c.bf16 %v473_v3, %v471_v2  ;;  %v1003_v0 = vld [vmem:[%s6924_s3 + $0x8] sm:$0xff]  ;;  %v817_v1 = vld [vmem:[%s6922_s1] sm:$0xff]  ;;  %v5334_v3 = vmov 0.0|0.0  }
  0xad   : > { %4633 = vmatpush1.bf16.msra.mxu0 %v4632_v9  ;;  %v477_v9 = vld [vmem:[#allocation3 + $0x558] sm:$0xff] }
  0xae   : > { %4635 = vmatprep.subr.bf16.mxu0 %v4634_v10  ;;  %v4672_v10 = vpack.c.bf16 %v472_v7, %v470_v6  ;;  %v4674_v11 = vpack.c.bf16 %v477_v9, %v475_v8  ;;  %v818_v6 = vld [vmem:[%s6922_s1 + $0x8] sm:$0xff]  ;;  %v1006_v8 = vld [vmem:[%s6924_s3 + $0x20] sm:$0xff] }
  0xaf   : > { %v1007_v9 = vld [vmem:[%s6924_s3 + $0x28] sm:$0xff] }
  0xb0   : > { %651 = vmatmul.mubr.f32.vlgmr.msra.gmra.mrb[0].mxu0 %v294_v15  ;;  %v481_v15 = vld [vmem:[#allocation3 + $0x578] sm:$0xff] }
  0xb1   : > { %4637 = vmatpush1.bf16.msra.mxu0 %v4636_v16  ;;  %656 = vmatprep.mubr.f32.mxu0 %v302_v20  ;;  %v4676_v16 = vpack.c.bf16 %v476_v13, %v474_v12  ;;  %v483_v20 = vld [vmem:[#allocation3 + $0x588] sm:$0xff]  ;;  %v1009_v13 = vld [vmem:[%s6924_s3 + $0x38] sm:$0xff] }
  0xb2   : > { %4639 = vmatprep.subr.bf16.mxu0 %v4638_v17  ;;  %v4678_v17 = vpack.c.bf16 %v481_v15, %v479_v14  ;;  %v1008_v12 = vld [vmem:[%s6924_s3 + $0x30] sm:$0xff]  ;;  %v820_v14 = vld [vmem:[%s6922_s1 + $0x18] sm:$0xff] }
  0xb3   : > { %v4718_v15 = vpack.c.bf16 %v1009_v13, %v1008_v12  ;;  %v3705_v13 = vld [vmem:[%s6924_s3 + $0xf8] sm:$0xff] }
  0xb4   : > { %657 = vmatmul.mubr.f32.gmra.mrb[2].mxu0 %v301_v24  ;;  %v482_v24 = vld [vmem:[#allocation3 + $0x580] sm:$0xff] }
  0xb5   : > { %4641 = vmatpush1.bf16.msra.mxu0 %v4640_v23  ;;  %727 = vmatprep.mubr.f32.mxu0 %v297_v28  ;;  %v4682_v23 = vpack.c.bf16 %v485_v21, %v483_v20  ;;  %v1012_v20 = vld [vmem:[%s6924_s3 + $0x50] sm:$0xff]  ;;  %v1013_v21 = vld [vmem:[%s6924_s3 + $0x58] sm:$0xff] }
  0xb6   : > { %4643 = vmatprep.subr.bf16.mxu0 %v4642_v25  ;;  %v484_v25 = vld [vmem:[#allocation3 + $0x590] sm:$0xff] }
  0xb7   : > { %v4684_v28 = vpack.c.bf16 %v484_v25, %v482_v24  ;;  %v1014_v24 = vld [vmem:[%s6924_s3 + $0x60] sm:$0xff]  ;;  %v1015_v25 = vld [vmem:[%s6924_s3 + $0x68] sm:$0xff] }
  0xb8   : > { %v4727_v27 = vpack.c.bf16 %v1015_v25, %v1014_v24 }
  0xb9   : > { %4645 = vmatpush1.bf16.msra.mxu0 %v4644_v31  ;;  %v488_v31 = vld [vmem:[#allocation3 + $0x5b0] sm:$0xff] }
  0xba   : > { %4647 = vmatprep.subr.bf16.mxu0 %v4646_v32  ;;  %v491_v32 = vld [vmem:[#allocation3 + $0x5c8] sm:$0xff]  ;;  %v4688_v34 = vpack.c.bf16 %v488_v31, %v486_v30  ;;  %v824_v30 = vld [vmem:[%s6922_s1 + $0x38] sm:$0xff] }
  0xbb   : > { %v4690_v35 = vpack.c.bf16 %v493_v33, %v491_v32  ;;  %v1018_v32 = vld [vmem:[%s6924_s3 + $0x80] sm:$0xff]  ;;  %v1019_v33 = vld [vmem:[%s6924_s3 + $0x88] sm:$0xff] }
  0xbd   : > { %4649 = vmatpush1.bf16.msra.mxu0 %v4648_v37  ;;  %v492_v37 = vld [vmem:[#allocation3 + $0x5d0] sm:$0xff] }
  0xbe   : > { %4651 = vmatprep.subr.bf16.mxu0 %v4650_v38  ;;  %v495_v38 = vld [vmem:[#allocation3 + $0x5e8] sm:$0xff]  ;;  %v4692_v40 = vpack.c.bf16 %v492_v37, %v490_v36  ;;  %v1021_v36 = vld [vmem:[%s6924_s3 + $0x98] sm:$0xff] }
  0xbf   : > { %v4694_v41 = vpack.c.bf16 %v497_v39, %v495_v38  ;;  %v1022_v38 = vld [vmem:[%s6924_s3 + $0xa0] sm:$0xff]  ;;  %v1023_v39 = vld [vmem:[%s6924_s3 + $0xa8] sm:$0xff] }
  0xc1   : > { %4653 = vmatpush1.bf16.msra.mxu0 %v4652_v43  ;;  %v496_v43 = vld [vmem:[#allocation3 + $0x5f0] sm:$0xff] }
  0xc2   : > { %4655 = vmatprep.subr.bf16.mxu0 %v4654_v44  ;;  %v499_v44 = vld [vmem:[#allocation3 + $0x608] sm:$0xff]  ;;  %v4696_v46 = vpack.c.bf16 %v496_v43, %v494_v42  ;;  %v1025_v42 = vld [vmem:[%s6924_s3 + $0xb8] sm:$0xff] }
  0xc3   : > { %v4698_v47 = vpack.c.bf16 %v501_v45, %v499_v44  ;;  %v1026_v44 = vld [vmem:[%s6924_s3 + $0xc0] sm:$0xf] }
  0xc5   : > { %4657 = vmatpush1.bf16.msra.mxu0 %v4656_v49  ;;  %v500_v49 = vld [vmem:[#allocation3 + $0x610] sm:$0xff] }
  0xc6   : > { %4659 = vmatprep.subr.bf16.mxu0 %v4658_v50  ;;  %v296_v50 = vld [vmem:[%s5431_s23 + $0x20] sm:$0xff]  ;;  %v4700_v51 = vpack.c.bf16 %v500_v49, %v498_v48  ;;  %v3699_v48 = vld [vmem:[%s6924_s3 + $0xc8] sm:$0xff]  ;;  %v3700_v49 = vld [vmem:[%s6924_s3 + $0xd0] sm:$0xff] }
  0xc9   : > { %4661 = vmatpush1.bf16.msra.mxu0 %v4660_v55  ;;  %v305_v55 = vld [vmem:[%s5431_s23 + $0x68] sm:$0x1] }
  0xca   : > { %4663 = vmatprep.subr.bf16.mxu0 %v4662_v56 }
  0xcd   : > { %4665 = vmatpush1.bf16.msra.mxu0 %v4664_v62 }
  0xce   : > { %4667 = vmatprep.subr.bf16.mxu0 %v4666_v63  ;;  %v1002_v63 = vld [vmem:[%s6924_s3] sm:$0xff] }
  0xcf   : > { %v4709_v2 = vpack.c.bf16 %v1003_v0, %v1002_v63 }
  0xd1   : > { %4669 = vmatpush1.bf16.msra.mxu0 %v4668_v4  ;;  %v1004_v4 = vld [vmem:[%s6924_s3 + $0x10] sm:$0xff] }
  0xd2   : > { %4671 = vmatprep.subr.bf16.mxu0 %v4670_v5  ;;  %v1005_v5 = vld [vmem:[%s6924_s3 + $0x18] sm:$0xff] }
  0xd3   : > { %v4712_v7 = vpack.c.bf16 %v1005_v5, %v1004_v4  ;;  %v3703_v4 = vld [vmem:[%s6924_s3 + $0xe8] sm:$0xff]  ;;  %v3704_v5 = vld [vmem:[%s6924_s3 + $0xf0] sm:$0xff] }
  0xd5   : > { %4673 = vmatpush1.bf16.msra.mxu0 %v4672_v10  ;;  %v819_v10 = vld [vmem:[%s6922_s1 + $0x10] sm:$0xff] }
  0xd6   : > { %4675 = vmatprep.subr.bf16.mxu0 %v4674_v11  ;;  %v4715_v11 = vpack.c.bf16 %v1007_v9, %v1006_v8 }
  0xd9   : > { %4677 = vmatpush1.bf16.msra.mxu0 %v4676_v16  ;;  %v1010_v16 = vld [vmem:[%s6924_s3 + $0x40] sm:$0xff] }
  0xda   : > { %4679 = vmatprep.subr.bf16.mxu0 %v4678_v17  ;;  %v1011_v17 = vld [vmem:[%s6924_s3 + $0x48] sm:$0xff] }
  0xdb   : > { %v4721_v19 = vpack.c.bf16 %v1011_v17, %v1010_v16 }
  0xdd   : > { %4681 = vmatpush1.bf16.msra.mxu0 %v4680_v22  ;;  %v822_v22 = vld [vmem:[%s6922_s1 + $0x28] sm:$0xff] }
  0xde   : > { %4683 = vmatprep.subr.bf16.mxu0 %v4682_v23  ;;  %v4724_v23 = vpack.c.bf16 %v1013_v21, %v1012_v20 }
  0xe1   : > { %4685 = vmatpush1.bf16.msra.mxu0 %v4684_v28  ;;  %v1016_v28 = vld [vmem:[%s6924_s3 + $0x70] sm:$0xff] }
  0xe2   : > { %4687 = vmatprep.subr.bf16.mxu0 %v4686_v29  ;;  %v1017_v29 = vld [vmem:[%s6924_s3 + $0x78] sm:$0xff] }
  0xe3   : > { %v4730_v31 = vpack.c.bf16 %v1017_v29, %v1016_v28 }
  0xe5   : > { %4689 = vmatpush1.bf16.msra.mxu0 %v4688_v34  ;;  %v4733_v34 = vpack.c.bf16 %v1019_v33, %v1018_v32  ;;  %v3710_v32 = vld [vmem:[%s6924_s3 + $0x120] sm:$0xff] }
  0xe6   : > { %4691 = vmatprep.subr.bf16.mxu0 %v4690_v35  ;;  %v1020_v35 = vld [vmem:[%s6924_s3 + $0x90] sm:$0xff] }
  0xe7   : > { %v4736_v37 = vpack.c.bf16 %v1021_v36, %v1020_v35 }
  0xe9   : > { %4693 = vmatpush1.bf16.msra.mxu0 %v4692_v40  ;;  %v4739_v40 = vpack.c.bf16 %v1023_v39, %v1022_v38 }
  0xea   : > { %4695 = vmatprep.subr.bf16.mxu0 %v4694_v41  ;;  %v1024_v41 = vld [vmem:[%s6924_s3 + $0xb0] sm:$0xff] }
  0xeb   : > { %v4742_v43 = vpack.c.bf16 %v1025_v42, %v1024_v41  ;;  %v3712_v41 = vld [vmem:[%s6924_s3 + $0x130] sm:$0xff] }
  0xed   : > { %4697 = vmatpush1.bf16.msra.mxu0 %v4696_v46 }
  0xee   : > { %4699 = vmatprep.subr.bf16.mxu0 %v4698_v47 }
  0xf0   : > { %728 = vmatmul.mubr.f32.vlgmr.msra.gmra.mrb[0].mxu0 %v296_v50 }
  0xf1   : > { %733 = vmatprep.mubr.f32.mxu0 %v304_v52  ;;  %4701 = vmatpush1.bf16.msra.mxu0 %v4700_v51 }
  0xf4   : > { %734 = vmatmul.mubr.f32.gmra.mrb[2].mxu0 %v303_v53  ;;  %v4745_v53 = vpack.c.bf16 %v3700_v49, %v3699_v48  ;;  %v3713_v49 = vld [vmem:[%s6924_s3 + $0x138] sm:$0xff] }
  0xf5   : > { %804 = vmatprep.mubr.f32.mxu0 %v5332_v61 }
  0xf8   : > { %3678 = vmatmul.mubr.msk.f32.vlgmr.msra.gmra.mrb[0].mxu0 %vm502_vm0, %v298_v54 }
  0xf9   : > { %810 = vmatprep.mubr.f32.mxu0 %v5332_v61 }
  0xfc   : > { %3679 = vmatmul.mubr.msk.f32.gmra.mrb[2].mxu0 %vm502_vm0, %v305_v55 }
 0x1cb   : > { %v806_v56 = vpop.f32.mrb[0].mxu0 }
 0x1cc   : > { %v808_v57 = vpop.f32.mrb[1].mxu0 }
 0x1cf   : > { %v812_v58 = vpop.f32.mrb[2].mxu0 }
 0x1d0   : > { %v4705_v59 = vpack.c.bf16 %v812_v58, %v806_v56  ;;  %v814_v60 = vpop.f32.mrb[3].mxu0  ;;  %v3702_v58 = vld [vmem:[%s6924_s3 + $0xe0] sm:$0xff] }
 0x1d1   : > { %v4702_v62 = vpack.c.bf16 %v814_v60, %v808_v57  ;;  %v3701_v57 = vld [vmem:[%s6924_s3 + $0xd8] sm:$0xff] }
 0x1d2   : > { %v4748_v0 = vpack.c.bf16 %v3702_v58, %v3701_v57  ;;  %v3715_v57 = vld [vmem:[%s6924_s3 + $0x148] sm:$0xff]  ;;  %v3716_v58 = vld [vmem:[%s6924_s3 + $0x150] sm:$0xff] }
 0x1d3   : > { %4704 = vmatprep.subr.msk.bf16.mxu1 %vm4703_vm3, %v4702_v62 }
 0x1d4   : > { %4707 = vmatpush1.bf16.msk.msra.mxu1 %vm4703_vm3, %v4705_v59 }
 0x1d5   : > { %4708 = vmatprep.subr.bf16.mxu1 %v5334_v3 }
 0x1d7   : > { %3682 = vmatmul.mubr.msk.f32.vlgmr.msra.gmra.mrb[0].mxu1 %vm825_vm4, %v817_v1 }
 0x1d8   : > { %927 = vmatprep.mubr.f32.mxu1 %v5332_v61  ;;  %4710 = vmatpush1.bf16.msra.mxu1 %v4709_v2 }
 0x1d9   : > { %4711 = vmatprep.subr.bf16.mxu1 %v5334_v3 }
 0x1db   : > { %3683 = vmatmul.mubr.msk.f32.gmra.mrb[2].mxu1 %vm825_vm4, %v818_v6 }
 0x1dc   : > { %933 = vmatprep.mubr.f32.mxu1 %v5332_v61  ;;  %4713 = vmatpush1.bf16.msra.mxu1 %v4712_v7 }
 0x1dd   : > { %4714 = vmatprep.subr.bf16.mxu1 %v5334_v3 }
 0x1df   : > { %3684 = vmatmul.mubr.msk.f32.gmra.mrb[4].mxu1 %vm825_vm4, %v819_v10  ;;  %v4751_v10 = vpack.c.bf16 %v3704_v5, %v3703_v4  ;;  %v3720_v4 = vld [vmem:[%s6924_s3 + $0x170] sm:$0xff] }
 0x1e0   : > { %939 = vmatprep.mubr.f32.mxu1 %v5332_v61  ;;  %4716 = vmatpush1.bf16.msra.mxu1 %v4715_v11 }
 0x1e1   : > { %4717 = vmatprep.subr.bf16.mxu1 %v5334_v3 }
 0x1e3   : > { %3685 = vmatmul.mubr.msk.f32.gmra.mrb[6].mxu1 %vm825_vm4, %v820_v14  ;;  %v3706_v14 = vld [vmem:[%s6924_s3 + $0x100] sm:$0xff] }
 0x1e4   : > { %945 = vmatprep.mubr.f32.mxu1 %v5332_v61  ;;  %4719 = vmatpush1.bf16.msra.mxu1 %v4718_v15 }
 0x1e5   : > { %4720 = vmatprep.subr.bf16.mxu1 %v5334_v3 }
 0x1e7   : > { %3686 = vmatmul.mubr.msk.f32.gmra.mrb[8].mxu1 %vm825_vm4, %v821_v18 }
 0x1e8   : > { %951 = vmatprep.mubr.f32.mxu1 %v5332_v61  ;;  %4722 = vmatpush1.bf16.msra.mxu1 %v4721_v19  ;;  %v4754_v19 = vpack.c.bf16 %v3706_v14, %v3705_v13  ;;  %v3733_v13 = vld [vmem:[%s6925_s4 + $0x40] sm:$0xff] }
 0x1e9   : > { %4723 = vmatprep.subr.bf16.mxu1 %v5334_v3  ;;  %4270 = vmatprep.mubr.msk.f32.mxu0 %vm1312_vm7, %v3733_v13 }
 0x1eb   : > { %3687 = vmatmul.mubr.msk.f32.gmra.mrb[10].mxu1 %vm825_vm4, %v822_v22  ;;  %v3707_v22 = vld [vmem:[%s6924_s3 + $0x108] sm:$0xff] }
 0x1ec   : > { %957 = vmatprep.mubr.f32.mxu1 %v5332_v61  ;;  %4725 = vmatpush1.bf16.msra.mxu1 %v4724_v23  ;;  %v3708_v23 = vld [vmem:[%s6924_s3 + $0x110] sm:$0xff] }
 0x1ed   : > { %4726 = vmatprep.subr.bf16.mxu1 %v5334_v3  ;;  %v4757_v28 = vpack.c.bf16 %v3708_v23, %v3707_v22 }
 0x1ef   : > { %3688 = vmatmul.mubr.msk.f32.gmra.mrb[12].mxu1 %vm825_vm4, %v823_v26 }
 0x1f0   : > { %963 = vmatprep.mubr.f32.mxu1 %v5332_v61  ;;  %4728 = vmatpush1.bf16.msra.mxu1 %v4727_v27 }
 0x1f1   : > { %4729 = vmatprep.subr.bf16.mxu1 %v5334_v3 }
 0x1f3   : > { %3689 = vmatmul.mubr.msk.f32.gmra.mrb[14].mxu1 %vm825_vm4, %v824_v30 }
 0x1f4   : > { %4731 = vmatpush1.bf16.msra.mxu1 %v4730_v31  ;;  %v3709_v31 = vld [vmem:[%s6924_s3 + $0x118] sm:$0xff] }
 0x1f5   : > { %4732 = vmatprep.subr.bf16.mxu1 %v5334_v3 }
 0x1f8   : > { %4734 = vmatpush1.bf16.msra.mxu1 %v4733_v34 }
 0x1f9   : > { %4735 = vmatprep.subr.bf16.mxu1 %v5334_v3 }
 0x1fc   : > { %4737 = vmatpush1.bf16.msra.mxu1 %v4736_v37  ;;  %v4760_v37 = vpack.c.bf16 %v3710_v32, %v3709_v31 }
 0x1fd   : > { %4738 = vmatprep.subr.bf16.mxu1 %v5334_v3 }
 0x200   : > { %4740 = vmatpush1.bf16.msra.mxu1 %v4739_v40  ;;  %v3711_v40 = vld [vmem:[%s6924_s3 + $0x128] sm:$0xff] }
 0x201   : > { %4741 = vmatprep.subr.bf16.mxu1 %v5334_v3 }
 0x204   : > { %4743 = vmatpush1.bf16.msra.mxu1 %v4742_v43 }
 0x205   : > { %1104 = vmatprep.subr.mxu1 %v5332_v61 }
 0x208   : > { %3690 = vmatpush1.msk.msra.mxu1 %vm1052_vm5, %v1026_v44 }
 0x209   : > { %4744 = vmatprep.subr.bf16.mxu1 %v5334_v3 }
 0x2aa   : > { %v923_v45 = vpop.f32.mrb[0].mxu1 }
 0x2ab   : > { %v970_v46 = vmul.f32 0.2, %v923_v45  ;;  %v925_v47 = vpop.f32.mrb[1].mxu1 }
 0x2ac   : > { %v971_v50 = vmul.f32 0.2, %v925_v47 }
 0x2ad   : > { %v5587_v54 = vmax.f32 %v923_v45, %v970_v46  ;;  %v4763_v46 = vpack.c.bf16 %v3712_v41, %v3711_v40  ;;  %v3758_v40 = vld [vmem:[%s6924_s3 + $0x198] sm:$0xff] }
 0x2ae   : > { %v5585_v51 = vmax.f32 %v925_v47, %v971_v50  ;;  %v929_v52 = vpop.f32.mrb[2].mxu1  ;;  %v3714_v50 = vld [vmem:[%s6924_s3 + $0x140] sm:$0xff] }
 0x2af   : > { %v972_v55 = vmul.f32 0.2, %v929_v52  ;;  %v931_v56 = vpop.f32.mrb[3].mxu1 }
 0x2b0   : > { %v973_v59 = vmul.f32 0.2, %v931_v56  ;;  %3691 = vmatprep.mubr.msk.f32.mxu1 %vm1027_vm6, %v5585_v51 }
 0x2b1   : > { %v5597_v60 = vmax.f32 %v929_v52, %v972_v55  ;;  %1121 = vmatmul.mubr.f32.vlgmr.msra.gmra.mrb[16].mxu1 %v5587_v54 }
 0x2b2   : > { %v5600_v62 = vmax.f32 %v931_v56, %v973_v59  ;;  %4746 = vmatpush1.bf16.msra.mxu1 %v4745_v53  ;;  %v935_v63 = vpop.f32.mrb[4].mxu1  ;;  %v4766_v56 = vpack.c.bf16 %v3714_v50, %v3713_v49  ;;  %v4769_v59 = vpack.c.bf16 %v3716_v58, %v3715_v57  ;;  %v1164_v49 = vld [vmem:[%s6925_s4 + $0x18] sm:$0xff]  ;;  %v1166_v58 = vld [vmem:[%s6925_s4 + $0x28] sm:$0xff] }
 0x2b3   : > { %v974_v1 = vmul.f32 0.2, %v935_v63  ;;  %v937_v2 = vpop.f32.mrb[5].mxu1  ;;  %4747 = vmatprep.subr.bf16.mxu1 %v5334_v3  ;;  %v3762_v57 = vld [vmem:[%s6924_s3 + $0x1b8] sm:$0xff] }
 0x2b4   : > { %v975_v6 = vmul.f32 0.2, %v937_v2  ;;  %3692 = vmatprep.mubr.msk.f32.mxu1 %vm1027_vm6, %v5600_v62 }
 0x2b5   : > { %v5611_v7 = vmax.f32 %v935_v63, %v974_v1  ;;  %1126 = vmatmul.mubr.f32.gmra.mrb[18].mxu1 %v5597_v60  ;;  %v3717_v63 = vld [vmem:[%s6924_s3 + $0x158] sm:$0xff] }
 0x2b6   : > { %v5614_v8 = vmax.f32 %v937_v2, %v975_v6  ;;  %4749 = vmatpush1.bf16.msra.mxu1 %v4748_v0  ;;  %v941_v9 = vpop.f32.mrb[6].mxu1  ;;  %v3718_v0 = vld [vmem:[%s6924_s3 + $0x160] sm:$0xff]  ;;  %v3719_v2 = vld [vmem:[%s6924_s3 + $0x168] sm:$0xff]  ;;  %v3721_v6 = vld [vmem:[%s6924_s3 + $0x178] sm:$0xff] }
 0x2b7   : > { %v976_v11 = vmul.f32 0.2, %v941_v9  ;;  %v943_v12 = vpop.f32.mrb[7].mxu1  ;;  %4750 = vmatprep.subr.bf16.mxu1 %v5334_v3  ;;  %v4772_v1 = vpack.c.bf16 %v3718_v0, %v3717_v63  ;;  %v4775_v5 = vpack.c.bf16 %v3720_v4, %v3719_v2  ;;  %v1167_v63 = vld [vmem:[%s6925_s4 + $0x30] sm:$0xff]  ;;  %v3763_v0 = vld [vmem:[%s6924_s3 + $0x1c0] sm:$0xff]  ;;  %v1168_v2 = vld [vmem:[%s6925_s4 + $0x38] sm:$0xff] }
 0x2b8   : > { %v977_v15 = vmul.f32 0.2, %v943_v12  ;;  %3693 = vmatprep.mubr.msk.f32.mxu1 %vm1027_vm6, %v5614_v8 }
 0x2b9   : > { %v5625_v16 = vmax.f32 %v941_v9, %v976_v11  ;;  %1131 = vmatmul.mubr.f32.gmra.mrb[20].mxu1 %v5611_v7  ;;  %v3722_v9 = vld [vmem:[%s6924_s3 + $0x180] sm:$0xff]  ;;  %v3723_v11 = vld [vmem:[%s6924_s3 + $0x188] sm:$0xf] }
 0x2ba   : > { %v5628_v17 = vmax.f32 %v943_v12, %v977_v15  ;;  %4752 = vmatpush1.bf16.msra.mxu1 %v4751_v10  ;;  %v947_v18 = vpop.f32.mrb[8].mxu1  ;;  %v4778_v10 = vpack.c.bf16 %v3722_v9, %v3721_v6  ;;  %v1161_v12 = vld [vmem:[%s6925_s4] sm:$0xff]  ;;  %v3766_v6 = vld [vmem:[%s6924_s3 + $0x1d8] sm:$0xff] }
 0x2bb   : > { %v978_v20 = vmul.f32 0.2, %v947_v18  ;;  %v949_v21 = vpop.f32.mrb[9].mxu1  ;;  %4753 = vmatprep.subr.bf16.mxu1 %v5334_v3 }
 0x2bc   : > { %v979_v24 = vmul.f32 0.2, %v949_v21  ;;  %3694 = vmatprep.mubr.msk.f32.mxu1 %vm1027_vm6, %v5628_v17 }
 0x2bd   : > { %v5639_v25 = vmax.f32 %v947_v18, %v978_v20  ;;  %1136 = vmatmul.mubr.f32.gmra.mrb[22].mxu1 %v5625_v16 }
 0x2be   : > { %v5642_v26 = vmax.f32 %v949_v21, %v979_v24  ;;  %4755 = vmatpush1.bf16.msra.mxu1 %v4754_v19  ;;  %v953_v27 = vpop.f32.mrb[10].mxu1 }
 0x2bf   : > { %v980_v29 = vmul.f32 0.2, %v953_v27  ;;  %v955_v30 = vpop.f32.mrb[11].mxu1  ;;  %4756 = vmatprep.subr.bf16.mxu1 %v5334_v3 }
 0x2c0   : > { %v981_v33 = vmul.f32 0.2, %v955_v30  ;;  %3695 = vmatprep.mubr.msk.f32.mxu1 %vm1027_vm6, %v5642_v26 }
 0x2c1   : > { %v5653_v34 = vmax.f32 %v953_v27, %v980_v29  ;;  %1141 = vmatmul.mubr.f32.gmra.mrb[24].mxu1 %v5639_v25 }
 0x2c2   : > { %v5656_v35 = vmax.f32 %v955_v30, %v981_v33  ;;  %4758 = vmatpush1.bf16.msra.mxu1 %v4757_v28  ;;  %v959_v36 = vpop.f32.mrb[12].mxu1 }
 0x2c3   : > { %v982_v38 = vmul.f32 0.2, %v959_v36  ;;  %v961_v39 = vpop.f32.mrb[13].mxu1  ;;  %4759 = vmatprep.subr.bf16.mxu1 %v5334_v3 }
 0x2c4   : > { %v983_v42 = vmul.f32 0.2, %v961_v39  ;;  %3696 = vmatprep.mubr.msk.f32.mxu1 %vm1027_vm6, %v5656_v35 }
 0x2c5   : > { %v5667_v43 = vmax.f32 %v959_v36, %v982_v38  ;;  %1146 = vmatmul.mubr.f32.gmra.mrb[26].mxu1 %v5653_v34 }
 0x2c6   : > { %v5670_v44 = vmax.f32 %v961_v39, %v983_v42  ;;  %4761 = vmatpush1.bf16.msra.mxu1 %v4760_v37  ;;  %v965_v45 = vpop.f32.mrb[14].mxu1  ;;  %v3757_v39 = vld [vmem:[%s6924_s3 + $0x190] sm:$0xff]  ;;  %v1162_v42 = vld [vmem:[%s6925_s4 + $0x8] sm:$0xff] }
 0x2c7   : > { %v984_v47 = vmul.f32 0.2, %v965_v45  ;;  %v967_v48 = vpop.f32.mrb[15].mxu1  ;;  %4762 = vmatprep.subr.bf16.mxu1 %v5334_v3 }
 0x2c8   : > { %v985_v52 = vmul.f32 0.2, %v967_v48  ;;  %3697 = vmatprep.mubr.msk.f32.mxu1 %vm1027_vm6, %v5670_v44 }
 0x2c9   : > { %v5681_v53 = vmax.f32 %v965_v45, %v984_v47  ;;  %1151 = vmatmul.mubr.f32.gmra.mrb[28].mxu1 %v5667_v43  ;;  %v4813_v45 = vpack.c.bf16 %v3758_v40, %v3757_v39  ;;  %v3759_v47 = vld [vmem:[%s6924_s3 + $0x1a0] sm:$0xff]  ;;  %v3776_v39 = vld [vmem:[%s6924_s3 + $0x228] sm:$0xff] }
 0x2ca   : > { %v5684_v55 = vmax.f32 %v967_v48, %v985_v52  ;;  %4764 = vmatpush1.bf16.msra.mxu1 %v4763_v46  ;;  %v1163_v46 = vld [vmem:[%s6925_s4 + $0x10] sm:$0xff]  ;;  %v3760_v48 = vld [vmem:[%s6924_s3 + $0x1a8] sm:$0xff]  ;;  %v1165_v52 = vld [vmem:[%s6925_s4 + $0x20] sm:$0xff] }
 0x2cb   : > { %4765 = vmatprep.subr.bf16.mxu1 %v5334_v3  ;;  %v4816_v50 = vpack.c.bf16 %v3760_v48, %v3759_v47 }
 0x2cc   : > { %3698 = vmatprep.mubr.msk.f32.mxu1 %vm1027_vm6, %v5684_v55 }
 0x2cd   : > { %1156 = vmatmul.mubr.f32.gmra.mrb[30].mxu1 %v5681_v53 }
 0x2ce   : > { %4767 = vmatpush1.bf16.msra.mxu1 %v4766_v56  ;;  %3725 = vmatprep.mubr.msk.f32.mxu1 %vm1027_vm6, %v5585_v51  ;;  %v3761_v56 = vld [vmem:[%s6924_s3 + $0x1b0] sm:$0xff] }
 0x2cf   : > { %4768 = vmatprep.subr.bf16.mxu1 %v5334_v3 }
 0x2d2   : > { %4770 = vmatpush1.bf16.msra.mxu1 %v4769_v59  ;;  %v4819_v59 = vpack.c.bf16 %v3762_v57, %v3761_v56  ;;  %v3780_v56 = vld [vmem:[%s6924_s3 + $0x248] sm:$0xff] }
 0x2d3   : > { %4771 = vmatprep.subr.bf16.mxu1 %v5334_v3 }
 0x2d6   : > { %4773 = vmatpush1.bf16.msra.mxu1 %v4772_v1  ;;  %v3764_v1 = vld [vmem:[%s6924_s3 + $0x1c8] sm:$0xff] }
 0x2d7   : > { %4774 = vmatprep.subr.bf16.mxu1 %v5334_v3  ;;  %v4822_v4 = vpack.c.bf16 %v3764_v1, %v3763_v0 }
 0x2da   : > { %4776 = vmatpush1.bf16.msra.mxu1 %v4775_v5  ;;  %v3765_v5 = vld [vmem:[%s6924_s3 + $0x1d0] sm:$0xff] }
 0x2db   : > { %4777 = vmatprep.subr.bf16.mxu1 %v5334_v3  ;;  %v4825_v9 = vpack.c.bf16 %v3766_v6, %v3765_v5  ;;  %v3781_v5 = vld [vmem:[%s6924_s3 + $0x250] sm:$0xf]  ;;  %v3734_v6 = vld [vmem:[%s6925_s4 + $0x48] sm:$0xff] }
 0x2de   : > { %4779 = vmatpush1.bf16.msra.mxu1 %v4778_v10  ;;  %v3767_v10 = vld [vmem:[%s6924_s3 + $0x1e0] sm:$0xff] }
 0x2df   : > { %1246 = vmatprep.subr.mxu1 %v5332_v61 }
 0x2e2   : > { %3724 = vmatpush1.msk.msra.mxu1 %vm1052_vm5, %v3723_v11  ;;  %v3768_v11 = vld [vmem:[%s6924_s3 + $0x1e8] sm:$0xff] }
 0x2e3   : > { %1263 = vmatmul.mubr.f32.vlgmr.msra.gmra.mrb[32].mxu1 %v5587_v54 }
 0x2e4   : > { %3726 = vmatprep.mubr.msk.f32.mxu1 %vm1027_vm6, %v5600_v62 }
 0x2e7   : > { %1268 = vmatmul.mubr.f32.gmra.mrb[34].mxu1 %v5597_v60 }
 0x2e8   : > { %3727 = vmatprep.mubr.msk.f32.mxu1 %vm1027_vm6, %v5614_v8 }
 0x2eb   : > { %1273 = vmatmul.mubr.f32.gmra.mrb[36].mxu1 %v5611_v7 }
 0x2ec   : > { %3728 = vmatprep.mubr.msk.f32.mxu1 %vm1027_vm6, %v5628_v17 }
 0x2ef   : > { %1278 = vmatmul.mubr.f32.gmra.mrb[38].mxu1 %v5625_v16 }
 0x2f0   : > { %3729 = vmatprep.mubr.msk.f32.mxu1 %vm1027_vm6, %v5642_v26 }
 0x2f3   : > { %1283 = vmatmul.mubr.f32.gmra.mrb[40].mxu1 %v5639_v25 }
 0x2f4   : > { %3730 = vmatprep.mubr.msk.f32.mxu1 %vm1027_vm6, %v5656_v35 }
 0x2f7   : > { %1288 = vmatmul.mubr.f32.gmra.mrb[42].mxu1 %v5653_v34 }
 0x2f8   : > { %3731 = vmatprep.mubr.msk.f32.mxu1 %vm1027_vm6, %v5670_v44 }
 0x2fb   : > { %1293 = vmatmul.mubr.f32.gmra.mrb[44].mxu1 %v5667_v43 }
 0x2fc   : > { %3732 = vmatprep.mubr.msk.f32.mxu1 %vm1027_vm6, %v5684_v55 }
 0x2ff   : > { %1298 = vmatmul.mubr.f32.gmra.mrb[46].mxu1 %v5681_v53 }
 0x300   : > { %4298 = vmatprep.mubr.msk.f32.mxu1 %vm1312_vm7, %v1161_v12 }
 0x384   : > { %v1122_v14 = vpop.f32.mrb[16].mxu1 }
 0x385   : > { %v1124_v15 = vpop.f32.mrb[17].mxu1 }
 0x386   : > { %v3769_v15 = vld [vmem:[%s6924_s3 + $0x1f0] sm:$0xff] }
 0x388   : > { %v1127_v18 = vpop.f32.mrb[18].mxu1 }
 0x389   : > { %v4796_v19 = vpack.c.bf16 %v1127_v18, %v1122_v14  ;;  %v1129_v20 = vpop.f32.mrb[19].mxu1  ;;  %v4828_v14 = vpack.c.bf16 %v3768_v11, %v3767_v10  ;;  %v3770_v18 = vld [vmem:[%s6924_s3 + $0x1f8] sm:$0xff]  ;;  %v3809_v10 = vld [vmem:[%s6924_s3 + $0x268] sm:$0xff]  ;;  %v3810_v11 = vld [vmem:[%s6924_s3 + $0x270] sm:$0xff] }
 0x38b   : > { %4797 = vmatprep.subr.bf16.mxu1 %v4796_v19 }
 0x38c   : > { %4799 = vmatpush3.bf16.msra.mxu1 %v4796_v19  ;;  %v1132_v21 = vpop.f32.mrb[20].mxu1 }
 0x38d   : > { %v1134_v22 = vpop.f32.mrb[21].mxu1 }
 0x38e   : > { %v4831_v22 = vpack.c.bf16 %v3770_v18, %v3769_v15  ;;  %v3811_v15 = vld [vmem:[%s6924_s3 + $0x278] sm:$0xff]  ;;  %v3812_v18 = vld [vmem:[%s6924_s3 + $0x280] sm:$0xff] }
 0x390   : > { %v1137_v23 = vpop.f32.mrb[22].mxu1 }
 0x391   : > { %v4800_v24 = vpack.c.bf16 %v1137_v23, %v1132_v21  ;;  %v1139_v27 = vpop.f32.mrb[23].mxu1  ;;  %v3771_v23 = vld [vmem:[%s6924_s3 + $0x200] sm:$0xff] }
 0x393   : > { %4801 = vmatprep.subr.bf16.mxu1 %v4800_v24 }
 0x394   : > { %v1142_v28 = vpop.f32.mrb[24].mxu1  ;;  %4803 = vmatpush3.bf16.msra.mxu1 %v4800_v24  ;;  %v3772_v24 = vld [vmem:[%s6924_s3 + $0x208] sm:$0xff] }
 0x395   : > { %v1144_v29 = vpop.f32.mrb[25].mxu1 }
 0x396   : > { %v4834_v29 = vpack.c.bf16 %v3772_v24, %v3771_v23  ;;  %v3814_v23 = vld [vmem:[%s6924_s3 + $0x290] sm:$0xff] }
 0x397   : > { %v3739_v24 = vld [vmem:[%s6925_s4 + $0x70] sm:$0xff] }
 0x398   : > { %v1147_v30 = vpop.f32.mrb[26].mxu1 }
 0x399   : > { %v4804_v31 = vpack.c.bf16 %v1147_v30, %v1142_v28  ;;  %v1149_v32 = vpop.f32.mrb[27].mxu1  ;;  %v3773_v30 = vld [vmem:[%s6924_s3 + $0x210] sm:$0xff] }
 0x39b   : > { %4805 = vmatprep.subr.bf16.mxu1 %v4804_v31 }
 0x39c   : > { %v1152_v33 = vpop.f32.mrb[28].mxu1  ;;  %4807 = vmatpush3.bf16.msra.mxu1 %v4804_v31  ;;  %v3774_v31 = vld [vmem:[%s6924_s3 + $0x218] sm:$0xff] }
 0x39d   : > { %v1154_v36 = vpop.f32.mrb[29].mxu1 }
 0x3a0   : > { %v1157_v37 = vpop.f32.mrb[30].mxu1 }
 0x3a1   : > { %v4808_v38 = vpack.c.bf16 %v1157_v37, %v1152_v33  ;;  %v1159_v41 = vpop.f32.mrb[31].mxu1  ;;  %v4837_v37 = vpack.c.bf16 %v3774_v31, %v3773_v30  ;;  %v3816_v30 = vld [vmem:[%s6924_s3 + $0x2a0] sm:$0xff] }
 0x3a3   : > { %4809 = vmatprep.subr.bf16.mxu1 %v4808_v38 }
 0x3a4   : > { %4811 = vmatpush3.bf16.msra.mxu1 %v4808_v38  ;;  %v3775_v38 = vld [vmem:[%s6924_s3 + $0x220] sm:$0xff] }
 0x3a5   : > { %4812 = vmatprep.subr.bf16.mxu1 %v5334_v3 }
 0x3a7   : > { %4299 = vmatmul.mubr.msk.f32.vlgmr.msra.gmra.mrb[48].mxu1 %vm1312_vm7, %v1162_v42  ;;  %v4840_v42 = vpack.c.bf16 %v3776_v39, %v3775_v38  ;;  %v3820_v38 = vld [vmem:[%s6924_s3 + $0x2c0] sm:$0xff] }
 0x3a8   : > { %4814 = vmatpush1.bf16.msra.mxu1 %v4813_v45  ;;  %4301 = vmatprep.mubr.msk.f32.mxu1 %vm1312_vm7, %v1163_v46  ;;  %v3777_v45 = vld [vmem:[%s6924_s3 + $0x230] sm:$0xff]  ;;  %v3778_v46 = vld [vmem:[%s6924_s3 + $0x238] sm:$0xff] }
 0x3a9   : > { %4815 = vmatprep.subr.bf16.mxu1 %v5334_v3 }
 0x3ab   : > { %4302 = vmatmul.mubr.msk.f32.gmra.mrb[50].mxu1 %vm1312_vm7, %v1164_v49 }
 0x3ac   : > { %4817 = vmatpush1.bf16.msra.mxu1 %v4816_v50  ;;  %4304 = vmatprep.mubr.msk.f32.mxu1 %vm1312_vm7, %v1165_v52  ;;  %v4843_v50 = vpack.c.bf16 %v3778_v46, %v3777_v45  ;;  %v3779_v52 = vld [vmem:[%s6924_s3 + $0x240] sm:$0xff]  ;;  %v3823_v45 = vld [vmem:[%s6924_s3 + $0x2d8] sm:$0xff] }
 0x3ad   : > { %4818 = vmatprep.subr.bf16.mxu1 %v5334_v3  ;;  %v3824_v46 = vld [vmem:[%s6924_s3 + $0x2e0] sm:$0xff] }
 0x3af   : > { %4305 = vmatmul.mubr.msk.f32.gmra.mrb[52].mxu1 %vm1312_vm7, %v1166_v58 }
 0x3b0   : > { %4820 = vmatpush1.bf16.msra.mxu1 %v4819_v59  ;;  %4307 = vmatprep.mubr.msk.f32.mxu1 %vm1312_vm7, %v1167_v63  ;;  %v4846_v59 = vpack.c.bf16 %v3780_v56, %v3779_v52  ;;  %v3827_v52 = vld [vmem:[%s6924_s3 + $0x2f8] sm:$0xff]  ;;  %v3828_v56 = vld [vmem:[%s6924_s3 + $0x300] sm:$0xff] }
 0x3b1   : > { %4821 = vmatprep.subr.bf16.mxu1 %v5334_v3 }
 0x3b3   : > { %4308 = vmatmul.mubr.msk.f32.gmra.mrb[54].mxu1 %vm1312_vm7, %v1168_v2  ;;  %v3807_v2 = vld [vmem:[%s6924_s3 + $0x258] sm:$0xff] }
 0x3b4   : > { %4823 = vmatpush1.bf16.msra.mxu1 %v4822_v4  ;;  %3783 = vmatprep.mubr.msk.f32.mxu1 %vm1027_vm6, %v5585_v51  ;;  %v3808_v4 = vld [vmem:[%s6924_s3 + $0x260] sm:$0xff] }
 0x3b5   : > { %4824 = vmatprep.subr.bf16.mxu1 %v5334_v3 }
 0x3b6   : > { %v1264_v12 = vpop.f32.mrb[32].mxu1 }
 0x3b7   : > { %v1266_v13 = vpop.f32.mrb[33].mxu1 }
 0x3b8   : > { %4826 = vmatpush1.bf16.msra.mxu1 %v4825_v9  ;;  %v4865_v9 = vpack.c.bf16 %v3808_v4, %v3807_v2  ;;  %v3736_v13 = vld [vmem:[%s6925_s4 + $0x58] sm:$0xff] }
 0x3b9   : > { %4827 = vmatprep.subr.bf16.mxu1 %v5334_v3  ;;  %v3831_v2 = vld [vmem:[%s6924_s3 + $0x318] sm:$0xf] }
 0x3ba   : > { %v1269_v19 = vpop.f32.mrb[34].mxu1 }
 0x3bb   : > { %v4780_v20 = vpack.c.bf16 %v1269_v19, %v1264_v12  ;;  %v1271_v21 = vpop.f32.mrb[35].mxu1  ;;  %v3735_v12 = vld [vmem:[%s6925_s4 + $0x50] sm:$0xff]  ;;  %v3737_v19 = vld [vmem:[%s6925_s4 + $0x60] sm:$0xff] }
 0x3bc   : > { %4829 = vmatpush1.bf16.msra.mxu1 %v4828_v14  ;;  %v4868_v14 = vpack.c.bf16 %v3810_v11, %v3809_v10  ;;  %v4871_v21 = vpack.c.bf16 %v3812_v18, %v3811_v15  ;;  %v3861_v10 = vld [vmem:[%s6924_s3 + $0x340] sm:$0xff]  ;;  %v3862_v11 = vld [vmem:[%s6924_s3 + $0x348] sm:$0xff] }
 0x3bd   : > { %4781 = vmatprep.subr.bf16.mxu0 %v4780_v20  ;;  %4830 = vmatprep.subr.bf16.mxu1 %v5334_v3  ;;  %v3865_v18 = vld [vmem:[%s6924_s3 + $0x360] sm:$0xff] }
 0x3be   : > { %v1274_v27 = vpop.f32.mrb[36].mxu1  ;;  %4783 = vmatpush3.bf16.msra.mxu0 %v4780_v20  ;;  %v3738_v20 = vld [vmem:[%s6925_s4 + $0x68] sm:$0xff] }
 0x3bf   : > { %v1276_v28 = vpop.f32.mrb[37].mxu1 }
 0x3c0   : > { %4832 = vmatpush1.bf16.msra.mxu1 %v4831_v22  ;;  %v3813_v22 = vld [vmem:[%s6924_s3 + $0x288] sm:$0xff] }
 0x3c1   : > { %4833 = vmatprep.subr.bf16.mxu1 %v5334_v3  ;;  %v4874_v28 = vpack.c.bf16 %v3814_v23, %v3813_v22  ;;  %v3868_v22 = vld [vmem:[%s6924_s3 + $0x378] sm:$0xff] }
 0x3c2   : > { %v1279_v32 = vpop.f32.mrb[38].mxu1 }
 0x3c3   : > { %v4784_v33 = vpack.c.bf16 %v1279_v32, %v1274_v27  ;;  %v1281_v36 = vpop.f32.mrb[39].mxu1  ;;  %v3740_v27 = vld [vmem:[%s6925_s4 + $0x78] sm:$0xff]  ;;  %v3817_v32 = vld [vmem:[%s6924_s3 + $0x2a8] sm:$0xff] }
 0x3c4   : > { %4835 = vmatpush1.bf16.msra.mxu1 %v4834_v29  ;;  %v3815_v29 = vld [vmem:[%s6924_s3 + $0x298] sm:$0xff] }
 0x3c5   : > { %4785 = vmatprep.subr.bf16.mxu0 %v4784_v33  ;;  %4836 = vmatprep.subr.bf16.mxu1 %v5334_v3  ;;  %v4877_v31 = vpack.c.bf16 %v3816_v30, %v3815_v29  ;;  %v3871_v29 = vld [vmem:[%s6924_s3 + $0x390] sm:$0xff]  ;;  %v3872_v30 = vld [vmem:[%s6924_s3 + $0x398] sm:$0xff] }
 0x3c6   : > { %v1284_v40 = vpop.f32.mrb[40].mxu1  ;;  %4787 = vmatpush3.bf16.msra.mxu0 %v4784_v33  ;;  %v3818_v33 = vld [vmem:[%s6924_s3 + $0x2b0] sm:$0xff] }
 0x3c7   : > { %v1286_v41 = vpop.f32.mrb[41].mxu1  ;;  %v4880_v36 = vpack.c.bf16 %v3818_v33, %v3817_v32  ;;  %v3873_v32 = vld [vmem:[%s6924_s3 + $0x3a0] sm:$0xff]  ;;  %v3874_v33 = vld [vmem:[%s6924_s3 + $0x3a8] sm:$0xff] }
 0x3c8   : > { %4838 = vmatpush1.bf16.msra.mxu1 %v4837_v37  ;;  %v3819_v37 = vld [vmem:[%s6924_s3 + $0x2b8] sm:$0xff]  ;;  %v3822_v41 = vld [vmem:[%s6924_s3 + $0x2d0] sm:$0xff] }
 0x3c9   : > { %4839 = vmatprep.subr.bf16.mxu1 %v5334_v3  ;;  %v4883_v39 = vpack.c.bf16 %v3820_v38, %v3819_v37  ;;  %v3875_v37 = vld [vmem:[%s6924_s3 + $0x3b0] sm:$0xff]  ;;  %v3876_v38 = vld [vmem:[%s6924_s3 + $0x3b8] sm:$0xff] }
 0x3ca   : > { %v1289_v47 = vpop.f32.mrb[42].mxu1 }
 0x3cb   : > { %v4788_v48 = vpack.c.bf16 %v1289_v47, %v1284_v40  ;;  %v1291_v49 = vpop.f32.mrb[43].mxu1  ;;  %v3821_v40 = vld [vmem:[%s6924_s3 + $0x2c8] sm:$0xff]  ;;  %v4889_v47 = vpack.c.bf16 %v3824_v46, %v3823_v45  ;;  %v3879_v45 = vld [vmem:[%s6924_s3 + $0x3d0] sm:$0xff]  ;;  %v3880_v46 = vld [vmem:[%s6924_s3 + $0x3d8] sm:$0xff] }
 0x3cc   : > { %4841 = vmatpush1.bf16.msra.mxu1 %v4840_v42  ;;  %v4886_v42 = vpack.c.bf16 %v3822_v41, %v3821_v40  ;;  %v3826_v49 = vld [vmem:[%s6924_s3 + $0x2f0] sm:$0xff]  ;;  %v3877_v40 = vld [vmem:[%s6924_s3 + $0x3c0] sm:$0xff]  ;;  %v3878_v41 = vld [vmem:[%s6924_s3 + $0x3c8] sm:$0xff] }
 0x3cd   : > { %4789 = vmatprep.subr.bf16.mxu0 %v4788_v48  ;;  %4842 = vmatprep.subr.bf16.mxu1 %v5334_v3 }
 0x3ce   : > { %v1294_v57 = vpop.f32.mrb[44].mxu1  ;;  %4791 = vmatpush3.bf16.msra.mxu0 %v4788_v48  ;;  %v3825_v48 = vld [vmem:[%s6924_s3 + $0x2e8] sm:$0xff] }
 0x3cf   : > { %v1296_v58 = vpop.f32.mrb[45].mxu1 }
 0x3d0   : > { %4844 = vmatpush1.bf16.msra.mxu1 %v4843_v50  ;;  %v4892_v50 = vpack.c.bf16 %v3826_v49, %v3825_v48  ;;  %v3829_v58 = vld [vmem:[%s6924_s3 + $0x308] sm:$0xff]  ;;  %v3957_v48 = vld [vmem:[%s6924_s3 + $0x4b0] sm:$0xff]  ;;  %v3958_v49 = vld [vmem:[%s6924_s3 + $0x4b8] sm:$0xff] }
 0x3d1   : > { %4845 = vmatprep.subr.bf16.mxu1 %v5334_v3 }
 0x3d2   : > { %v1299_v63 = vpop.f32.mrb[46].mxu1 }
 0x3d3   : > { %v4792_v0 = vpack.c.bf16 %v1299_v63, %v1294_v57  ;;  %v1301_v1 = vpop.f32.mrb[47].mxu1  ;;  %v4895_v57 = vpack.c.bf16 %v3828_v56, %v3827_v52  ;;  %v5021_v52 = vpack.c.bf16 %v3958_v49, %v3957_v48  ;;  %v3959_v56 = vld [vmem:[%s6924_s3 + $0x4c0] sm:$0xff] }
 0x3d4   : > { %4847 = vmatpush1.bf16.msra.mxu1 %v4846_v59  ;;  %v3830_v59 = vld [vmem:[%s6924_s3 + $0x310] sm:$0xff]  ;;  %v3858_v1 = vld [vmem:[%s6924_s3 + $0x328] sm:$0xff]  ;;  %v4012_v48 = vld [vmem:[%s6924_s3 + $0x5a0] sm:$0xff] }
 0x3d5   : > { %4793 = vmatprep.subr.bf16.mxu0 %v4792_v0  ;;  %1648 = vmatprep.subr.mxu1 %v5332_v61  ;;  %v4898_v63 = vpack.c.bf16 %v3830_v59, %v3829_v58  ;;  %v3961_v59 = vld [vmem:[%s6924_s3 + $0x4d0] sm:$0xff] }
 0x3d6   : > { %4795 = vmatpush3.bf16.msra.mxu0 %v4792_v0  ;;  %v3857_v0 = vld [vmem:[%s6924_s3 + $0x320] sm:$0xff] }
 0x3d7   : > { %4864 = vmatprep.subr.bf16.mxu0 %v5334_v3  ;;  %v4917_v4 = vpack.c.bf16 %v3858_v1, %v3857_v0  ;;  %v3963_v1 = vld [vmem:[%s6924_s3 + $0x4e0] sm:$0xff] }
 0x3d8   : > { %3782 = vmatpush1.msk.msra.mxu1 %vm1052_vm5, %v3781_v5  ;;  %v3859_v5 = vld [vmem:[%s6924_s3 + $0x330] sm:$0xff] }
 0x3d9   : > { %4271 = vmatmul.mubr.msk.f32.vlgmr.msra.gmra.mrb[4].mxu0 %vm1312_vm7, %v3734_v6  ;;  %1665 = vmatmul.mubr.f32.vlgmr.msra.gmra.mrb[56].mxu1 %v5587_v54  ;;  %v3860_v6 = vld [vmem:[%s6924_s3 + $0x338] sm:$0xff] }
 0x3da   : > { %4866 = vmatpush1.bf16.msra.mxu0 %v4865_v9  ;;  %3784 = vmatprep.mubr.msk.f32.mxu1 %vm1027_vm6, %v5600_v62  ;;  %v4920_v9 = vpack.c.bf16 %v3860_v6, %v3859_v5  ;;  %v3965_v5 = vld [vmem:[%s6924_s3 + $0x4f0] sm:$0xff]  ;;  %v3966_v6 = vld [vmem:[%s6924_s3 + $0x4f8] sm:$0xff] }
 0x3db   : > { %4273 = vmatprep.mubr.msk.f32.mxu0 %vm1312_vm7, %v3735_v12  ;;  %4867 = vmatprep.subr.bf16.mxu0 %v5334_v3  ;;  %v4923_v12 = vpack.c.bf16 %v3862_v11, %v3861_v10  ;;  %v3967_v10 = vld [vmem:[%s6924_s3 + $0x500] sm:$0xff]  ;;  %v3968_v11 = vld [vmem:[%s6924_s3 + $0x508] sm:$0xff] }
 0x3dd   : > { %4274 = vmatmul.mubr.msk.f32.gmra.mrb[6].mxu0 %vm1312_vm7, %v3736_v13  ;;  %1670 = vmatmul.mubr.f32.gmra.mrb[58].mxu1 %v5597_v60  ;;  %v3863_v13 = vld [vmem:[%s6924_s3 + $0x350] sm:$0xff] }
 0x3de   : > { %4869 = vmatpush1.bf16.msra.mxu0 %v4868_v14  ;;  %3785 = vmatprep.mubr.msk.f32.mxu1 %vm1027_vm6, %v5614_v8  ;;  %v3864_v14 = vld [vmem:[%s6924_s3 + $0x358] sm:$0xff] }
 0x3df   : > { %4276 = vmatprep.mubr.msk.f32.mxu0 %vm1312_vm7, %v3737_v19  ;;  %4870 = vmatprep.subr.bf16.mxu0 %v5334_v3  ;;  %v4926_v15 = vpack.c.bf16 %v3864_v14, %v3863_v13  ;;  %v3866_v19 = vld [vmem:[%s6924_s3 + $0x368] sm:$0xff]  ;;  %v3969_v13 = vld [vmem:[%s6924_s3 + $0x510] sm:$0xff]  ;;  %v3970_v14 = vld [vmem:[%s6924_s3 + $0x518] sm:$0xff] }
 0x3e1   : > { %4277 = vmatmul.mubr.msk.f32.gmra.mrb[8].mxu0 %vm1312_vm7, %v3738_v20  ;;  %1675 = vmatmul.mubr.f32.gmra.mrb[60].mxu1 %v5611_v7  ;;  %v4929_v20 = vpack.c.bf16 %v3866_v19, %v3865_v18  ;;  %v3971_v18 = vld [vmem:[%s6924_s3 + $0x520] sm:$0xff]  ;;  %v3972_v19 = vld [vmem:[%s6924_s3 + $0x528] sm:$0xff] }
 0x3e2   : > { %4872 = vmatpush1.bf16.msra.mxu0 %v4871_v21  ;;  %3786 = vmatprep.mubr.msk.f32.mxu1 %vm1027_vm6, %v5628_v17  ;;  %v3867_v21 = vld [vmem:[%s6924_s3 + $0x370] sm:$0xff] }
 0x3e3   : > { %4279 = vmatprep.mubr.msk.f32.mxu0 %vm1312_vm7, %v3739_v24  ;;  %4873 = vmatprep.subr.bf16.mxu0 %v5334_v3  ;;  %v4932_v23 = vpack.c.bf16 %v3868_v22, %v3867_v21  ;;  %v3869_v24 = vld [vmem:[%s6924_s3 + $0x380] sm:$0xff]  ;;  %v3973_v21 = vld [vmem:[%s6924_s3 + $0x530] sm:$0xff]  ;;  %v3974_v22 = vld [vmem:[%s6924_s3 + $0x538] sm:$0xff] }
 0x3e5   : > { %4280 = vmatmul.mubr.msk.f32.gmra.mrb[10].mxu0 %vm1312_vm7, %v3740_v27  ;;  %1680 = vmatmul.mubr.f32.gmra.mrb[62].mxu1 %v5625_v16  ;;  %v3870_v27 = vld [vmem:[%s6924_s3 + $0x388] sm:$0xff] }
 0x3e6   : > { %4875 = vmatpush1.bf16.msra.mxu0 %v4874_v28  ;;  %3833 = vmatprep.mubr.msk.f32.mxu0 %vm1027_vm6, %v5585_v51  ;;  %v4935_v28 = vpack.c.bf16 %v3870_v27, %v3869_v24  ;;  %v3975_v24 = vld [vmem:[%s6924_s3 + $0x540] sm:$0xff]  ;;  %v3976_v27 = vld [vmem:[%s6924_s3 + $0x548] sm:$0xff] }
 0x3e7   : > { %3787 = vmatprep.mubr.msk.f32.mxu1 %vm1027_vm6, %v5642_v26  ;;  %4876 = vmatprep.subr.bf16.mxu0 %v5334_v3 }
 0x3e9   : > { %1685 = vmatmul.mubr.f32.gmra.mrb[64].mxu1 %v5639_v25 }
 0x3ea   : > { %4878 = vmatpush1.bf16.msra.mxu0 %v4877_v31  ;;  %3788 = vmatprep.mubr.msk.f32.mxu1 %vm1027_vm6, %v5656_v35  ;;  %v4938_v31 = vpack.c.bf16 %v3872_v30, %v3871_v29  ;;  %v3977_v29 = vld [vmem:[%s6924_s3 + $0x550] sm:$0xff]  ;;  %v3978_v30 = vld [vmem:[%s6924_s3 + $0x558] sm:$0xff] }
 0x3eb   : > { %4879 = vmatprep.subr.bf16.mxu0 %v5334_v3 }
 0x3ed   : > { %1690 = vmatmul.mubr.f32.gmra.mrb[66].mxu1 %v5653_v34 }
 0x3ee   : > { %4881 = vmatpush1.bf16.msra.mxu0 %v4880_v36  ;;  %3789 = vmatprep.mubr.msk.f32.mxu1 %vm1027_vm6, %v5670_v44  ;;  %v4941_v36 = vpack.c.bf16 %v3874_v33, %v3873_v32  ;;  %v3979_v32 = vld [vmem:[%s6924_s3 + $0x560] sm:$0xff]  ;;  %v3980_v33 = vld [vmem:[%s6924_s3 + $0x568] sm:$0xff] }
 0x3ef   : > { %4882 = vmatprep.subr.bf16.mxu0 %v5334_v3 }
 0x3f1   : > { %1695 = vmatmul.mubr.f32.gmra.mrb[68].mxu1 %v5667_v43 }
 0x3f2   : > { %4884 = vmatpush1.bf16.msra.mxu0 %v4883_v39  ;;  %3790 = vmatprep.mubr.msk.f32.mxu1 %vm1027_vm6, %v5684_v55  ;;  %v4944_v39 = vpack.c.bf16 %v3876_v38, %v3875_v37  ;;  %v5054_v37 = vpack.c.bf16 %v3980_v33, %v3979_v32  ;;  %v4007_v38 = vld [vmem:[%s6924_s3 + $0x578] sm:$0xff] }
 0x3f3   : > { %4885 = vmatprep.subr.bf16.mxu0 %v5334_v3 }
 0x3f5   : > { %1700 = vmatmul.mubr.f32.gmra.mrb[70].mxu1 %v5681_v53 }
 0x3f6   : > { %4887 = vmatpush1.bf16.msra.mxu0 %v4886_v42  ;;  %v4947_v42 = vpack.c.bf16 %v3878_v41, %v3877_v40  ;;  %v3981_v40 = vld [vmem:[%s6924_s3 + $0x570] sm:$0xf] }
 0x3f7   : > { %4888 = vmatprep.subr.bf16.mxu0 %v5334_v3 }
 0x3fa   : > { %4890 = vmatpush1.bf16.msra.mxu0 %v4889_v47  ;;  %v4950_v47 = vpack.c.bf16 %v3880_v46, %v3879_v45  ;;  %v4010_v45 = vld [vmem:[%s6924_s3 + $0x590] sm:$0xff] }
 0x3fb   : > { %4891 = vmatprep.subr.bf16.mxu0 %v5334_v3 }
 0x3fe   : > { %4893 = vmatpush1.bf16.msra.mxu0 %v4892_v50  ;;  %v3881_v50 = vld [vmem:[%s6924_s3 + $0x3e0] sm:$0xf] }
 0x3ff   : > { %4894 = vmatprep.subr.bf16.mxu0 %v5334_v3 }
 0x402   : > { %4896 = vmatpush1.bf16.msra.mxu0 %v4895_v57  ;;  %v3960_v57 = vld [vmem:[%s6924_s3 + $0x4c8] sm:$0xff] }
 0x403   : > { %4897 = vmatprep.subr.bf16.mxu0 %v5334_v3  ;;  %v5024_v58 = vpack.c.bf16 %v3960_v57, %v3959_v56  ;;  %v4015_v57 = vld [vmem:[%s6924_s3 + $0x5b8] sm:$0xff] }
 0x406   : > { %4899 = vmatpush1.bf16.msra.mxu0 %v4898_v63  ;;  %v3962_v63 = vld [vmem:[%s6924_s3 + $0x4d8] sm:$0xff] }
 0x407   : > { %1928 = vmatprep.subr.mxu0 %v5332_v61  ;;  %v5027_v0 = vpack.c.bf16 %v3962_v63, %v3961_v59  ;;  %v4017_v63 = vld [vmem:[%s6924_s3 + $0x5c8] sm:$0xff] }
 0x40a   : > { %3832 = vmatpush1.msk.msra.mxu0 %vm1052_vm5, %v3831_v2  ;;  %v3964_v2 = vld [vmem:[%s6924_s3 + $0x4e8] sm:$0xff] }
 0x40b   : > { %1945 = vmatmul.mubr.f32.vlgmr.msra.gmra.mrb[12].mxu0 %v5587_v54  ;;  %4916 = vmatprep.subr.bf16.mxu0 %v5334_v3 }
 0x40c   : > { %3834 = vmatprep.mubr.msk.f32.mxu0 %vm1027_vm6, %v5600_v62  ;;  %4918 = vmatpush1.bf16.msra.mxu0 %v4917_v4  ;;  %v5030_v4 = vpack.c.bf16 %v3964_v2, %v3963_v1  ;;  %v4019_v2 = vld [vmem:[%s6924_s3 + $0x5d8] sm:$0xff] }
 0x40d   : > { %4919 = vmatprep.subr.bf16.mxu0 %v5334_v3 }
 0x40f   : > { %1950 = vmatmul.mubr.f32.gmra.mrb[14].mxu0 %v5597_v60 }
 0x410   : > { %3835 = vmatprep.mubr.msk.f32.mxu0 %vm1027_vm6, %v5614_v8  ;;  %4921 = vmatpush1.bf16.msra.mxu0 %v4920_v9  ;;  %v5033_v9 = vpack.c.bf16 %v3966_v6, %v3965_v5  ;;  %v4021_v6 = vld [vmem:[%s6924_s3 + $0x5e8] sm:$0xff] }
 0x411   : > { %4922 = vmatprep.subr.bf16.mxu0 %v5334_v3 }
 0x413   : > { %1955 = vmatmul.mubr.f32.gmra.mrb[16].mxu0 %v5611_v7 }
 0x414   : > { %3836 = vmatprep.mubr.msk.f32.mxu0 %vm1027_vm6, %v5628_v17  ;;  %4924 = vmatpush1.bf16.msra.mxu0 %v4923_v12  ;;  %v5036_v12 = vpack.c.bf16 %v3968_v11, %v3967_v10  ;;  %v4023_v11 = vld [vmem:[%s6924_s3 + $0x5f8] sm:$0xff] }
 0x415   : > { %4925 = vmatprep.subr.bf16.mxu0 %v5334_v3 }
 0x417   : > { %1960 = vmatmul.mubr.f32.gmra.mrb[18].mxu0 %v5625_v16 }
 0x418   : > { %3837 = vmatprep.mubr.msk.f32.mxu0 %vm1027_vm6, %v5642_v26  ;;  %4927 = vmatpush1.bf16.msra.mxu0 %v4926_v15  ;;  %v5039_v15 = vpack.c.bf16 %v3970_v14, %v3969_v13  ;;  %v4025_v14 = vld [vmem:[%s6924_s3 + $0x608] sm:$0xff] }
 0x419   : > { %4928 = vmatprep.subr.bf16.mxu0 %v5334_v3 }
 0x41b   : > { %1965 = vmatmul.mubr.f32.gmra.mrb[20].mxu0 %v5639_v25 }
 0x41c   : > { %3838 = vmatprep.mubr.msk.f32.mxu0 %vm1027_vm6, %v5656_v35  ;;  %4930 = vmatpush1.bf16.msra.mxu0 %v4929_v20  ;;  %v5042_v20 = vpack.c.bf16 %v3972_v19, %v3971_v18  ;;  %v4027_v19 = vld [vmem:[%s6924_s3 + $0x618] sm:$0xff] }
 0x41d   : > { %4931 = vmatprep.subr.bf16.mxu0 %v5334_v3 }
 0x41f   : > { %1970 = vmatmul.mubr.f32.gmra.mrb[22].mxu0 %v5653_v34 }
 0x420   : > { %3839 = vmatprep.mubr.msk.f32.mxu0 %vm1027_vm6, %v5670_v44  ;;  %4933 = vmatpush1.bf16.msra.mxu0 %v4932_v23  ;;  %v5045_v23 = vpack.c.bf16 %v3974_v22, %v3973_v21  ;;  %v4029_v22 = vld [vmem:[%s6924_s3 + $0x628] sm:$0xff] }
 0x421   : > { %4934 = vmatprep.subr.bf16.mxu0 %v5334_v3 }
 0x423   : > { %1975 = vmatmul.mubr.f32.gmra.mrb[24].mxu0 %v5667_v43 }
 0x424   : > { %3840 = vmatprep.mubr.msk.f32.mxu0 %vm1027_vm6, %v5684_v55  ;;  %4936 = vmatpush1.bf16.msra.mxu0 %v4935_v28  ;;  %v5048_v28 = vpack.c.bf16 %v3976_v27, %v3975_v24  ;;  %v4031_v27 = vld [vmem:[%s6924_s3 + $0x638] sm:$0xf] }
 0x425   : > { %4937 = vmatprep.subr.bf16.mxu0 %v5334_v3 }
 0x427   : > { %1980 = vmatmul.mubr.f32.gmra.mrb[26].mxu0 %v5681_v53 }
 0x428   : > { %4939 = vmatpush1.bf16.msra.mxu0 %v4938_v31  ;;  %3883 = vmatprep.mubr.msk.f32.mxu0 %vm1027_vm6, %v5585_v51  ;;  %v5051_v31 = vpack.c.bf16 %v3978_v30, %v3977_v29 }
 0x429   : > { %4940 = vmatprep.subr.bf16.mxu0 %v5334_v3 }
 0x42c   : > { %4942 = vmatpush1.bf16.msra.mxu0 %v4941_v36  ;;  %v3791_v36 = vld [vmem:[%s6925_s4 + $0x80] sm:$0xff] }
 0x42d   : > { %4943 = vmatprep.subr.bf16.mxu0 %v5334_v3  ;;  %4326 = vmatprep.mubr.msk.f32.mxu1 %vm1312_vm7, %v3791_v36 }
 0x430   : > { %4945 = vmatpush1.bf16.msra.mxu0 %v4944_v39  ;;  %v4008_v39 = vld [vmem:[%s6924_s3 + $0x580] sm:$0xff] }
 0x431   : > { %4946 = vmatprep.subr.bf16.mxu0 %v5334_v3  ;;  %v5073_v41 = vpack.c.bf16 %v4008_v39, %v4007_v38 }
 0x434   : > { %4948 = vmatpush1.bf16.msra.mxu0 %v4947_v42  ;;  %v4009_v42 = vld [vmem:[%s6924_s3 + $0x588] sm:$0xff] }
 0x435   : > { %4949 = vmatprep.subr.bf16.mxu0 %v5334_v3  ;;  %v5076_v46 = vpack.c.bf16 %v4010_v45, %v4009_v42 }
 0x438   : > { %4951 = vmatpush1.bf16.msra.mxu0 %v4950_v47  ;;  %v4011_v47 = vld [vmem:[%s6924_s3 + $0x598] sm:$0xff] }
 0x439   : > { %2208 = vmatprep.subr.mxu0 %v5332_v61  ;;  %v5079_v49 = vpack.c.bf16 %v4012_v48, %v4011_v47 }
 0x43c   : > { %3882 = vmatpush1.msk.msra.mxu0 %vm1052_vm5, %v3881_v50  ;;  %v4013_v50 = vld [vmem:[%s6924_s3 + $0x5a8] sm:$0xff] }
 0x43d   : > { %2225 = vmatmul.mubr.f32.vlgmr.msra.gmra.mrb[28].mxu0 %v5587_v54  ;;  %5020 = vmatprep.subr.bf16.mxu0 %v5334_v3 }
 0x43e   : > { %3884 = vmatprep.mubr.msk.f32.mxu0 %vm1027_vm6, %v5600_v62  ;;  %5022 = vmatpush1.bf16.msra.mxu0 %v5021_v52  ;;  %v4014_v52 = vld [vmem:[%s6924_s3 + $0x5b0] sm:$0xff] }
 0x43f   : > { %5023 = vmatprep.subr.bf16.mxu0 %v5334_v3  ;;  %v5082_v56 = vpack.c.bf16 %v4014_v52, %v4013_v50 }
 0x441   : > { %2230 = vmatmul.mubr.f32.gmra.mrb[30].mxu0 %v5597_v60 }
 0x442   : > { %3885 = vmatprep.mubr.msk.f32.mxu0 %vm1027_vm6, %v5614_v8  ;;  %5025 = vmatpush1.bf16.msra.mxu0 %v5024_v58  ;;  %v4016_v58 = vld [vmem:[%s6924_s3 + $0x5c0] sm:$0xff] }
 0x443   : > { %5026 = vmatprep.subr.bf16.mxu0 %v5334_v3  ;;  %v5085_v59 = vpack.c.bf16 %v4016_v58, %v4015_v57 }
 0x445   : > { %2235 = vmatmul.mubr.f32.gmra.mrb[32].mxu0 %v5611_v7 }
 0x446   : > { %3886 = vmatprep.mubr.msk.f32.mxu0 %vm1027_vm6, %v5628_v17  ;;  %5028 = vmatpush1.bf16.msra.mxu0 %v5027_v0  ;;  %v4018_v0 = vld [vmem:[%s6924_s3 + $0x5d0] sm:$0xff] }
 0x447   : > { %5029 = vmatprep.subr.bf16.mxu0 %v5334_v3  ;;  %v5088_v1 = vpack.c.bf16 %v4018_v0, %v4017_v63 }
 0x449   : > { %2240 = vmatmul.mubr.f32.gmra.mrb[34].mxu0 %v5625_v16 }
 0x44a   : > { %3887 = vmatprep.mubr.msk.f32.mxu0 %vm1027_vm6, %v5642_v26  ;;  %5031 = vmatpush1.bf16.msra.mxu0 %v5030_v4  ;;  %v4020_v4 = vld [vmem:[%s6924_s3 + $0x5e0] sm:$0xff] }
 0x44b   : > { %5032 = vmatprep.subr.bf16.mxu0 %v5334_v3  ;;  %v5091_v5 = vpack.c.bf16 %v4020_v4, %v4019_v2  ;;  %v3792_v4 = vld [vmem:[%s6925_s4 + $0x88] sm:$0xff] }
 0x44d   : > { %2245 = vmatmul.mubr.f32.gmra.mrb[36].mxu0 %v5639_v25 }
 0x44e   : > { %3888 = vmatprep.mubr.msk.f32.mxu0 %vm1027_vm6, %v5656_v35  ;;  %5034 = vmatpush1.bf16.msra.mxu0 %v5033_v9  ;;  %v4022_v9 = vld [vmem:[%s6924_s3 + $0x5f0] sm:$0xff] }
 0x44f   : > { %5035 = vmatprep.subr.bf16.mxu0 %v5334_v3  ;;  %v5094_v10 = vpack.c.bf16 %v4022_v9, %v4021_v6  ;;  %v3794_v6 = vld [vmem:[%s6925_s4 + $0x98] sm:$0xff]  ;;  %v3795_v9 = vld [vmem:[%s6925_s4 + $0xa0] sm:$0xff] }
 0x451   : > { %2250 = vmatmul.mubr.f32.gmra.mrb[38].mxu0 %v5653_v34 }
 0x452   : > { %3889 = vmatprep.mubr.msk.f32.mxu0 %vm1027_vm6, %v5670_v44  ;;  %5037 = vmatpush1.bf16.msra.mxu0 %v5036_v12  ;;  %v4024_v12 = vld [vmem:[%s6924_s3 + $0x600] sm:$0xff] }
 0x453   : > { %5038 = vmatprep.subr.bf16.mxu0 %v5334_v3  ;;  %v5097_v13 = vpack.c.bf16 %v4024_v12, %v4023_v11  ;;  %v3797_v11 = vld [vmem:[%s6925_s4 + $0xb0] sm:$0xff]  ;;  %v3798_v12 = vld [vmem:[%s6925_s4 + $0xb8] sm:$0xff] }
 0x455   : > { %2255 = vmatmul.mubr.f32.gmra.mrb[40].mxu0 %v5667_v43 }
 0x456   : > { %3890 = vmatprep.mubr.msk.f32.mxu0 %vm1027_vm6, %v5684_v55  ;;  %5040 = vmatpush1.bf16.msra.mxu0 %v5039_v15  ;;  %v4026_v15 = vld [vmem:[%s6924_s3 + $0x610] sm:$0xff] }
 0x457   : > { %5041 = vmatprep.subr.bf16.mxu0 %v5334_v3  ;;  %v5100_v18 = vpack.c.bf16 %v4026_v15, %v4025_v14 }
 0x459   : > { %2260 = vmatmul.mubr.f32.gmra.mrb[42].mxu0 %v5681_v53 }
 0x45a   : > { %5043 = vmatpush1.bf16.msra.mxu0 %v5042_v20  ;;  %3983 = vmatprep.mubr.msk.f32.mxu0 %vm1027_vm6, %v5585_v51  ;;  %v4028_v20 = vld [vmem:[%s6924_s3 + $0x620] sm:$0xff] }
 0x45b   : > { %5044 = vmatprep.subr.bf16.mxu0 %v5334_v3  ;;  %v5103_v21 = vpack.c.bf16 %v4028_v20, %v4027_v19 }
 0x45e   : > { %5046 = vmatpush1.bf16.msra.mxu0 %v5045_v23  ;;  %v4030_v23 = vld [vmem:[%s6924_s3 + $0x630] sm:$0xff] }
 0x45f   : > { %5047 = vmatprep.subr.bf16.mxu0 %v5334_v3  ;;  %v5106_v24 = vpack.c.bf16 %v4030_v23, %v4029_v22 }
 0x462   : > { %5049 = vmatpush1.bf16.msra.mxu0 %v5048_v28 }
 0x463   : > { %5050 = vmatprep.subr.bf16.mxu0 %v5334_v3 }
 0x466   : > { %5052 = vmatpush1.bf16.msra.mxu0 %v5051_v31 }
 0x467   : > { %5053 = vmatprep.subr.bf16.mxu0 %v5334_v3 }
 0x46a   : > { %5055 = vmatpush1.bf16.msra.mxu0 %v5054_v37 }
 0x46b   : > { %2768 = vmatprep.subr.mxu0 %v5332_v61 }
 0x46e   : > { %3982 = vmatpush1.msk.msra.mxu0 %vm1052_vm5, %v3981_v40 }
 0x46f   : > { %2785 = vmatmul.mubr.f32.vlgmr.msra.gmra.mrb[44].mxu0 %v5587_v54  ;;  %5072 = vmatprep.subr.bf16.mxu0 %v5334_v3 }
 0x470   : > { %3984 = vmatprep.mubr.msk.f32.mxu0 %vm1027_vm6, %v5600_v62  ;;  %5074 = vmatpush1.bf16.msra.mxu0 %v5073_v41 }
 0x471   : > { %5075 = vmatprep.subr.bf16.mxu0 %v5334_v3 }
 0x473   : > { %2790 = vmatmul.mubr.f32.gmra.mrb[46].mxu0 %v5597_v60 }
 0x474   : > { %3985 = vmatprep.mubr.msk.f32.mxu0 %vm1027_vm6, %v5614_v8  ;;  %5077 = vmatpush1.bf16.msra.mxu0 %v5076_v46 }
 0x475   : > { %5078 = vmatprep.subr.bf16.mxu0 %v5334_v3 }
 0x477   : > { %2795 = vmatmul.mubr.f32.gmra.mrb[48].mxu0 %v5611_v7 }
 0x478   : > { %3986 = vmatprep.mubr.msk.f32.mxu0 %vm1027_vm6, %v5628_v17  ;;  %5080 = vmatpush1.bf16.msra.mxu0 %v5079_v49 }
 0x479   : > { %5081 = vmatprep.subr.bf16.mxu0 %v5334_v3 }
 0x47b   : > { %2800 = vmatmul.mubr.f32.gmra.mrb[50].mxu0 %v5625_v16 }
 0x47c   : > { %3987 = vmatprep.mubr.msk.f32.mxu0 %vm1027_vm6, %v5642_v26  ;;  %5083 = vmatpush1.bf16.msra.mxu0 %v5082_v56 }
 0x47d   : > { %5084 = vmatprep.subr.bf16.mxu0 %v5334_v3 }
 0x47f   : > { %2805 = vmatmul.mubr.f32.gmra.mrb[52].mxu0 %v5639_v25 }
 0x480   : > { %3988 = vmatprep.mubr.msk.f32.mxu0 %vm1027_vm6, %v5656_v35  ;;  %5086 = vmatpush1.bf16.msra.mxu0 %v5085_v59 }
 0x481   : > { %5087 = vmatprep.subr.bf16.mxu0 %v5334_v3 }
 0x483   : > { %2810 = vmatmul.mubr.f32.gmra.mrb[54].mxu0 %v5653_v34 }
 0x484   : > { %3989 = vmatprep.mubr.msk.f32.mxu0 %vm1027_vm6, %v5670_v44  ;;  %5089 = vmatpush1.bf16.msra.mxu0 %v5088_v1 }
 0x485   : > { %5090 = vmatprep.subr.bf16.mxu0 %v5334_v3 }
 0x487   : > { %2815 = vmatmul.mubr.f32.gmra.mrb[56].mxu0 %v5667_v43 }
 0x488   : > { %3990 = vmatprep.mubr.msk.f32.mxu0 %vm1027_vm6, %v5684_v55  ;;  %5092 = vmatpush1.bf16.msra.mxu0 %v5091_v5  ;;  %v3793_v5 = vld [vmem:[%s6925_s4 + $0x90] sm:$0xff] }
 0x489   : > { %5093 = vmatprep.subr.bf16.mxu0 %v5334_v3 }
 0x48b   : > { %2820 = vmatmul.mubr.f32.gmra.mrb[58].mxu0 %v5681_v53 }
 0x48c   : > { %5095 = vmatpush1.bf16.msra.mxu0 %v5094_v10  ;;  %4033 = vmatprep.mubr.msk.f32.mxu0 %vm1027_vm6, %v5585_v51  ;;  %v3796_v10 = vld [vmem:[%s6925_s4 + $0xa8] sm:$0xff] }
 0x48d   : > { %5096 = vmatprep.subr.bf16.mxu0 %v5334_v3 }
 0x490   : > { %5098 = vmatpush1.bf16.msra.mxu0 %v5097_v13  ;;  %v3841_v13 = vld [vmem:[%s6925_s4 + $0xc0] sm:$0xff] }
 0x491   : > { %5099 = vmatprep.subr.bf16.mxu0 %v5334_v3 }
 0x494   : > { %5101 = vmatpush1.bf16.msra.mxu0 %v5100_v18 }
 0x495   : > { %5102 = vmatprep.subr.bf16.mxu0 %v5334_v3 }
 0x498   : > { %5104 = vmatpush1.bf16.msra.mxu0 %v5103_v21 }
 0x499   : > { %5105 = vmatprep.subr.bf16.mxu0 %v5334_v3 }
 0x49c   : > { %5107 = vmatpush1.bf16.msra.mxu0 %v5106_v24 }
 0x49d   : > { %3048 = vmatprep.subr.mxu0 %v5332_v61 }
 0x4a0   : > { %4032 = vmatpush1.msk.msra.mxu0 %vm1052_vm5, %v4031_v27 }
 0x4a1   : > { %3065 = vmatmul.mubr.f32.vlgmr.msra.gmra.mrb[60].mxu0 %v5587_v54 }
 0x4a2   : > { %4034 = vmatprep.mubr.msk.f32.mxu0 %vm1027_vm6, %v5600_v62 }
 0x4a5   : > { %3070 = vmatmul.mubr.f32.gmra.mrb[62].mxu0 %v5597_v60 }
 0x4a6   : > { %4035 = vmatprep.mubr.msk.f32.mxu0 %vm1027_vm6, %v5614_v8 }
 0x4a9   : > { %3075 = vmatmul.mubr.f32.gmra.mrb[64].mxu0 %v5611_v7 }
 0x4aa   : > { %4036 = vmatprep.mubr.msk.f32.mxu0 %vm1027_vm6, %v5628_v17 }
 0x4ac   : > { %v6367_v28 = vpop.f32.mrb[4].mxu0  ;;  %v1666_v29 = vpop.f32.mrb[56].mxu1 }
 0x4ad   : > { %v6369_v30 = vpop.f32.mrb[5].mxu0  ;;  %3080 = vmatmul.mubr.f32.gmra.mrb[66].mxu0 %v5625_v16  ;;  %v1668_v31 = vpop.f32.mrb[57].mxu1 }
 0x4ae   : > { %4037 = vmatprep.mubr.msk.f32.mxu0 %vm1027_vm6, %v5642_v26 }
 0x4b0   : > { %v1671_v32 = vpop.f32.mrb[58].mxu1  ;;  %v6374_v33 = vpop.f32.mrb[6].mxu0 }
 0x4b1   : > { %v4848_v36 = vpack.c.bf16 %v1671_v32, %v1666_v29  ;;  %3085 = vmatmul.mubr.f32.gmra.mrb[68].mxu0 %v5639_v25  ;;  %v1673_v37 = vpop.f32.mrb[59].mxu1  ;;  %v6377_v38 = vpop.f32.mrb[7].mxu0 }
 0x4b2   : > { %4038 = vmatprep.mubr.msk.f32.mxu0 %vm1027_vm6, %v5656_v35 }
 0x4b3   : > { %4849 = vmatprep.subr.bf16.mxu1 %v4848_v36 }
 0x4b4   : > { %v1676_v39 = vpop.f32.mrb[60].mxu1  ;;  %4851 = vmatpush3.bf16.msra.mxu1 %v4848_v36  ;;  %v6381_v40 = vpop.f32.mrb[8].mxu0 }
 0x4b5   : > { %3090 = vmatmul.mubr.f32.gmra.mrb[70].mxu0 %v5653_v34  ;;  %v1678_v41 = vpop.f32.mrb[61].mxu1  ;;  %v6384_v42 = vpop.f32.mrb[9].mxu0 }
 0x4b6   : > { %4039 = vmatprep.mubr.msk.f32.mxu0 %vm1027_vm6, %v5670_v44 }
 0x4b8   : > { %v1681_v45 = vpop.f32.mrb[62].mxu1  ;;  %v6388_v46 = vpop.f32.mrb[10].mxu0 }
 0x4b9   : > { %v4852_v47 = vpack.c.bf16 %v1681_v45, %v1676_v39  ;;  %3095 = vmatmul.mubr.f32.gmra.mrb[72].mxu0 %v5667_v43  ;;  %v1683_v48 = vpop.f32.mrb[63].mxu1  ;;  %v6391_v49 = vpop.f32.mrb[11].mxu0 }
 0x4ba   : > { %4040 = vmatprep.mubr.msk.f32.mxu0 %vm1027_vm6, %v5684_v55 }
 0x4bb   : > { %4853 = vmatprep.subr.bf16.mxu1 %v4852_v47 }
 0x4bc   : > { %v1686_v50 = vpop.f32.mrb[64].mxu1  ;;  %4855 = vmatpush3.bf16.msra.mxu1 %v4852_v47 }
 0x4bd   : > { %3100 = vmatmul.mubr.f32.gmra.mrb[74].mxu0 %v5681_v53  ;;  %v1688_v52 = vpop.f32.mrb[65].mxu1 }
 0x4be   : > { %v3843_v52 = vld [vmem:[%s6925_s4 + $0xd0] sm:$0xff] }
 0x4c0   : > { %v1691_v56 = vpop.f32.mrb[66].mxu1 }
 0x4c1   : > { %v4856_v57 = vpack.c.bf16 %v1691_v56, %v1686_v50  ;;  %v1693_v58 = vpop.f32.mrb[67].mxu1  ;;  %v3842_v50 = vld [vmem:[%s6925_s4 + $0xc8] sm:$0xff]  ;;  %v3844_v56 = vld [vmem:[%s6925_s4 + $0xd8] sm:$0xff] }
 0x4c2   : > { %v3846_v58 = vld [vmem:[%s6925_s4 + $0xe8] sm:$0xff] }
 0x4c3   : > { %4857 = vmatprep.subr.bf16.mxu1 %v4856_v57 }
 0x4c4   : > { %v1696_v59 = vpop.f32.mrb[68].mxu1  ;;  %4859 = vmatpush3.bf16.msra.mxu1 %v4856_v57  ;;  %v3845_v57 = vld [vmem:[%s6925_s4 + $0xe0] sm:$0xff] }
 0x4c5   : > { %v1698_v63 = vpop.f32.mrb[69].mxu1 }
 0x4c6   : > { %v3848_v63 = vld [vmem:[%s6925_s4 + $0xf8] sm:$0xff] }
 0x4c8   : > { %v1701_v0 = vpop.f32.mrb[70].mxu1 }
 0x4c9   : > { %v4860_v1 = vpack.c.bf16 %v1701_v0, %v1696_v59  ;;  %v1703_v2 = vpop.f32.mrb[71].mxu1  ;;  %v3847_v59 = vld [vmem:[%s6925_s4 + $0xf0] sm:$0xff]  ;;  %v3891_v0 = vld [vmem:[%s6925_s4 + $0x100] sm:$0xff] }
 0x4cb   : > { %4861 = vmatprep.subr.bf16.mxu1 %v4860_v1 }
 0x4cc   : > { %4863 = vmatpush3.bf16.msra.mxu1 %v4860_v1 }
 0x4cf   : > { %4327 = vmatmul.mubr.msk.f32.vlgmr.msra.gmra.mrb[48].mxu1 %vm1312_vm7, %v3792_v4 }
 0x4d0   : > { %4329 = vmatprep.mubr.msk.f32.mxu1 %vm1312_vm7, %v3793_v5 }
 0x4d3   : > { %4330 = vmatmul.mubr.msk.f32.gmra.mrb[50].mxu1 %vm1312_vm7, %v3794_v6 }
 0x4d4   : > { %4332 = vmatprep.mubr.msk.f32.mxu1 %vm1312_vm7, %v3795_v9 }
 0x4d7   : > { %4333 = vmatmul.mubr.msk.f32.gmra.mrb[52].mxu1 %vm1312_vm7, %v3796_v10 }
 0x4d8   : > { %4335 = vmatprep.mubr.msk.f32.mxu1 %vm1312_vm7, %v3797_v11 }
 0x4db   : > { %4336 = vmatmul.mubr.msk.f32.gmra.mrb[54].mxu1 %vm1312_vm7, %v3798_v12 }
 0x4dc   : > { %4354 = vmatprep.mubr.msk.f32.mxu1 %vm1312_vm7, %v3841_v13 }
 0x4de   : > { %v1946_v14 = vpop.f32.mrb[12].mxu0 }
 0x4df   : > { %v1948_v15 = vpop.f32.mrb[13].mxu0 }
 0x4e2   : > { %v1951_v18 = vpop.f32.mrb[14].mxu0 }
 0x4e3   : > { %v4900_v19 = vpack.c.bf16 %v1951_v18, %v1946_v14  ;;  %v1953_v20 = vpop.f32.mrb[15].mxu0 }
 0x4e5   : > { %4901 = vmatprep.subr.bf16.mxu1 %v4900_v19 }
 0x4e6   : > { %v1956_v21 = vpop.f32.mrb[16].mxu0  ;;  %4903 = vmatpush3.bf16.msra.mxu1 %v4900_v19 }
 0x4e7   : > { %v1958_v22 = vpop.f32.mrb[17].mxu0 }
 0x4ea   : > { %v1961_v23 = vpop.f32.mrb[18].mxu0 }
 0x4eb   : > { %v4904_v24 = vpack.c.bf16 %v1961_v23, %v1956_v21  ;;  %v1963_v27 = vpop.f32.mrb[19].mxu0 }
 0x4ed   : > { %4905 = vmatprep.subr.bf16.mxu1 %v4904_v24 }
 0x4ee   : > { %v1966_v29 = vpop.f32.mrb[20].mxu0  ;;  %4907 = vmatpush3.bf16.msra.mxu1 %v4904_v24 }
 0x4ef   : > { %v1968_v31 = vpop.f32.mrb[21].mxu0 }
 0x4f0   : > { %v3908_v31 = vld [vmem:[%s6924_s3 + $0x3f0] sm:$0xff] }
 0x4f2   : > { %v1971_v32 = vpop.f32.mrb[22].mxu0 }
 0x4f3   : > { %v4908_v36 = vpack.c.bf16 %v1971_v32, %v1966_v29  ;;  %v1973_v37 = vpop.f32.mrb[23].mxu0  ;;  %v3907_v29 = vld [vmem:[%s6924_s3 + $0x3e8] sm:$0xff] }
 0x4f4   : > { %v3892_v32 = vld [vmem:[%s6925_s4 + $0x108] sm:$0xff]  ;;  %v3893_v37 = vld [vmem:[%s6925_s4 + $0x110] sm:$0xff] }
 0x4f5   : > { %4909 = vmatprep.subr.bf16.mxu1 %v4908_v36 }
 0x4f6   : > { %v1976_v39 = vpop.f32.mrb[24].mxu0  ;;  %4911 = vmatpush3.bf16.msra.mxu1 %v4908_v36  ;;  %v4969_v36 = vpack.c.bf16 %v3908_v31, %v3907_v29  ;;  %v3923_v29 = vld [vmem:[%s6924_s3 + $0x468] sm:$0xff]  ;;  %v3924_v31 = vld [vmem:[%s6924_s3 + $0x470] sm:$0xff] }
 0x4f7   : > { %v1978_v41 = vpop.f32.mrb[25].mxu0 }
 0x4f8   : > { %v3910_v41 = vld [vmem:[%s6924_s3 + $0x400] sm:$0xff] }
 0x4fa   : > { %v1981_v45 = vpop.f32.mrb[26].mxu0 }
 0x4fb   : > { %v4912_v47 = vpack.c.bf16 %v1981_v45, %v1976_v39  ;;  %v1983_v48 = vpop.f32.mrb[27].mxu0  ;;  %v3909_v39 = vld [vmem:[%s6924_s3 + $0x3f8] sm:$0xff] }
 0x4fc   : > { %v3894_v45 = vld [vmem:[%s6925_s4 + $0x118] sm:$0xff]  ;;  %v3895_v48 = vld [vmem:[%s6925_s4 + $0x120] sm:$0xff] }
 0x4fd   : > { %4913 = vmatprep.subr.bf16.mxu1 %v4912_v47 }
 0x4fe   : > { %4915 = vmatpush3.bf16.msra.mxu1 %v4912_v47  ;;  %v4972_v47 = vpack.c.bf16 %v3910_v41, %v3909_v39  ;;  %v4993_v39 = vpack.c.bf16 %v3924_v31, %v3923_v29  ;;  %v3925_v41 = vld [vmem:[%s6924_s3 + $0x478] sm:$0xff] }
 0x501   : > { %4355 = vmatmul.mubr.msk.f32.vlgmr.msra.gmra.mrb[48].mxu1 %vm1312_vm7, %v3842_v50  ;;  %v3911_v50 = vld [vmem:[%s6924_s3 + $0x408] sm:$0xff] }
 0x502   : > { %4357 = vmatprep.mubr.msk.f32.mxu1 %vm1312_vm7, %v3843_v52  ;;  %v3912_v52 = vld [vmem:[%s6924_s3 + $0x410] sm:$0xff] }
 0x505   : > { %4358 = vmatmul.mubr.msk.f32.gmra.mrb[50].mxu1 %vm1312_vm7, %v3844_v56  ;;  %v3896_v56 = vld [vmem:[%s6925_s4 + $0x128] sm:$0xff] }
 0x506   : > { %4360 = vmatprep.mubr.msk.f32.mxu1 %vm1312_vm7, %v3845_v57  ;;  %v4975_v57 = vpack.c.bf16 %v3912_v52, %v3911_v50  ;;  %v3927_v52 = vld [vmem:[%s6924_s3 + $0x488] sm:$0xff] }
 0x509   : > { %4361 = vmatmul.mubr.msk.f32.gmra.mrb[52].mxu1 %vm1312_vm7, %v3846_v58  ;;  %v3897_v58 = vld [vmem:[%s6925_s4 + $0x130] sm:$0xff] }
 0x50a   : > { %4363 = vmatprep.mubr.msk.f32.mxu1 %vm1312_vm7, %v3847_v59  ;;  %v3913_v59 = vld [vmem:[%s6924_s3 + $0x418] sm:$0xff] }
 0x50d   : > { %4364 = vmatmul.mubr.msk.f32.gmra.mrb[54].mxu1 %vm1312_vm7, %v3848_v63  ;;  %v3914_v63 = vld [vmem:[%s6924_s3 + $0x420] sm:$0xff] }
 0x50e   : > { %4382 = vmatprep.mubr.msk.f32.mxu1 %vm1312_vm7, %v3891_v0  ;;  %v3898_v0 = vld [vmem:[%s6925_s4 + $0x138] sm:$0xff] }
 0x510   : > { %v2226_v1 = vpop.f32.mrb[28].mxu0 }
 0x511   : > { %v2228_v2 = vpop.f32.mrb[29].mxu0 }
 0x512   : > { %v3915_v2 = vld [vmem:[%s6924_s3 + $0x428] sm:$0xff] }
 0x514   : > { %v2231_v4 = vpop.f32.mrb[30].mxu0 }
 0x515   : > { %v4952_v5 = vpack.c.bf16 %v2231_v4, %v2226_v1  ;;  %v2233_v6 = vpop.f32.mrb[31].mxu0  ;;  %v4978_v1 = vpack.c.bf16 %v3914_v63, %v3913_v59  ;;  %v3916_v4 = vld [vmem:[%s6924_s3 + $0x430] sm:$0xff] }
 0x516   : > { %v3917_v6 = vld [vmem:[%s6924_s3 + $0x438] sm:$0xff] }
 0x517   : > { %4953 = vmatprep.subr.bf16.mxu1 %v4952_v5 }
 0x518   : > { %v2236_v9 = vpop.f32.mrb[32].mxu0  ;;  %4955 = vmatpush3.bf16.msra.mxu1 %v4952_v5  ;;  %v4981_v5 = vpack.c.bf16 %v3916_v4, %v3915_v2 }
 0x519   : > { %v2238_v10 = vpop.f32.mrb[33].mxu0 }
 0x51c   : > { %v2241_v11 = vpop.f32.mrb[34].mxu0 }
 0x51d   : > { %v4956_v12 = vpack.c.bf16 %v2241_v11, %v2236_v9  ;;  %v2243_v13 = vpop.f32.mrb[35].mxu0  ;;  %v3918_v9 = vld [vmem:[%s6924_s3 + $0x440] sm:$0xff] }
 0x51e   : > { %v3919_v13 = vld [vmem:[%s6924_s3 + $0x448] sm:$0xff] }
 0x51f   : > { %4957 = vmatprep.subr.bf16.mxu1 %v4956_v12 }
 0x520   : > { %v2246_v14 = vpop.f32.mrb[36].mxu0  ;;  %4959 = vmatpush3.bf16.msra.mxu1 %v4956_v12  ;;  %v4984_v12 = vpack.c.bf16 %v3918_v9, %v3917_v6 }
 0x521   : > { %v2248_v15 = vpop.f32.mrb[37].mxu0 }
 0x524   : > { %v2251_v18 = vpop.f32.mrb[38].mxu0 }
 0x525   : > { %v4960_v19 = vpack.c.bf16 %v2251_v18, %v2246_v14  ;;  %v2253_v20 = vpop.f32.mrb[39].mxu0  ;;  %v3920_v14 = vld [vmem:[%s6924_s3 + $0x450] sm:$0xff] }
 0x526   : > { %v4987_v20 = vpack.c.bf16 %v3920_v14, %v3919_v13 }
 0x527   : > { %4961 = vmatprep.subr.bf16.mxu1 %v4960_v19 }
 0x528   : > { %v2256_v21 = vpop.f32.mrb[40].mxu0  ;;  %4963 = vmatpush3.bf16.msra.mxu1 %v4960_v19 }
 0x529   : > { %v2258_v22 = vpop.f32.mrb[41].mxu0 }
 0x52a   : > { %v3922_v22 = vld [vmem:[%s6924_s3 + $0x460] sm:$0xff] }
 0x52c   : > { %v2261_v23 = vpop.f32.mrb[42].mxu0 }
 0x52d   : > { %v4964_v24 = vpack.c.bf16 %v2261_v23, %v2256_v21  ;;  %v2263_v27 = vpop.f32.mrb[43].mxu0  ;;  %v3921_v21 = vld [vmem:[%s6924_s3 + $0x458] sm:$0xff] }
 0x52e   : > { %v4990_v27 = vpack.c.bf16 %v3922_v22, %v3921_v21 }
 0x52f   : > { %4965 = vmatprep.subr.bf16.mxu1 %v4964_v24 }
 0x530   : > { %4967 = vmatpush3.bf16.msra.mxu1 %v4964_v24 }
 0x531   : > { %4968 = vmatprep.subr.bf16.mxu1 %v5334_v3 }
 0x533   : > { %4383 = vmatmul.mubr.msk.f32.vlgmr.msra.gmra.mrb[48].mxu1 %vm1312_vm7, %v3892_v32 }
 0x534   : > { %4970 = vmatpush1.bf16.msra.mxu1 %v4969_v36  ;;  %4385 = vmatprep.mubr.msk.f32.mxu1 %vm1312_vm7, %v3893_v37 }
 0x535   : > { %4971 = vmatprep.subr.bf16.mxu1 %v5334_v3 }
 0x537   : > { %4386 = vmatmul.mubr.msk.f32.gmra.mrb[50].mxu1 %vm1312_vm7, %v3894_v45  ;;  %v3926_v45 = vld [vmem:[%s6924_s3 + $0x480] sm:$0xff] }
 0x538   : > { %4973 = vmatpush1.bf16.msra.mxu1 %v4972_v47  ;;  %4388 = vmatprep.mubr.msk.f32.mxu1 %vm1312_vm7, %v3895_v48  ;;  %v4996_v50 = vpack.c.bf16 %v3926_v45, %v3925_v41 }
 0x539   : > { %4974 = vmatprep.subr.bf16.mxu1 %v5334_v3 }
 0x53b   : > { %4389 = vmatmul.mubr.msk.f32.gmra.mrb[52].mxu1 %vm1312_vm7, %v3896_v56  ;;  %v3928_v56 = vld [vmem:[%s6924_s3 + $0x490] sm:$0xff] }
 0x53c   : > { %4976 = vmatpush1.bf16.msra.mxu1 %v4975_v57  ;;  %4391 = vmatprep.mubr.msk.f32.mxu1 %vm1312_vm7, %v3897_v58  ;;  %v4999_v63 = vpack.c.bf16 %v3928_v56, %v3927_v52 }
 0x53d   : > { %4977 = vmatprep.subr.bf16.mxu1 %v5334_v3 }
 0x53f   : > { %4392 = vmatmul.mubr.msk.f32.gmra.mrb[54].mxu1 %vm1312_vm7, %v3898_v0  ;;  %v3929_v0 = vld [vmem:[%s6924_s3 + $0x498] sm:$0xff] }
 0x540   : > { %4979 = vmatpush1.bf16.msra.mxu1 %v4978_v1  ;;  %3933 = vmatprep.mubr.msk.f32.mxu1 %vm1027_vm6, %v5585_v51  ;;  %v3930_v1 = vld [vmem:[%s6924_s3 + $0x4a0] sm:$0xff] }
 0x541   : > { %4980 = vmatprep.subr.bf16.mxu1 %v5334_v3 }
 0x542   : > { %v2786_v10 = vpop.f32.mrb[44].mxu0 }
 0x543   : > { %v2788_v11 = vpop.f32.mrb[45].mxu0 }
 0x544   : > { %4982 = vmatpush1.bf16.msra.mxu1 %v4981_v5  ;;  %v5002_v5 = vpack.c.bf16 %v3930_v1, %v3929_v0  ;;  %v3931_v11 = vld [vmem:[%s6924_s3 + $0x4a8] sm:$0xf] }
 0x545   : > { %4983 = vmatprep.subr.bf16.mxu1 %v5334_v3 }
 0x546   : > { %v2791_v15 = vpop.f32.mrb[46].mxu0 }
 0x547   : > { %v6538_v18 = vpack.c.bf16 %v2791_v15, %v2786_v10  ;;  %v2793_v19 = vpop.f32.mrb[47].mxu0 }
 0x548   : > { %4985 = vmatpush1.bf16.msra.mxu1 %v4984_v12 }
 0x549   : > { %4986 = vmatprep.subr.bf16.mxu1 %v5334_v3 }
 0x54a   : > { %v2796_v23 = vpop.f32.mrb[48].mxu0 }
 0x54b   : > { %v2798_v24 = vpop.f32.mrb[49].mxu0 }
 0x54c   : > { %4988 = vmatpush1.bf16.msra.mxu1 %v4987_v20 }
 0x54d   : > { %4989 = vmatprep.subr.bf16.mxu1 %v5334_v3 }
 0x54e   : > { %v2801_v32 = vpop.f32.mrb[50].mxu0 }
 0x54f   : > { %v6554_v36 = vpack.c.bf16 %v2801_v32, %v2796_v23  ;;  %v2803_v37 = vpop.f32.mrb[51].mxu0 }
 0x550   : > { %4991 = vmatpush1.bf16.msra.mxu1 %v4990_v27 }
 0x551   : > { %4992 = vmatprep.subr.bf16.mxu1 %v5334_v3 }
 0x552   : > { %v2806_v47 = vpop.f32.mrb[52].mxu0 }
 0x553   : > { %v2808_v48 = vpop.f32.mrb[53].mxu0 }
 0x554   : > { %4994 = vmatpush1.bf16.msra.mxu1 %v4993_v39 }
 0x555   : > { %4995 = vmatprep.subr.bf16.mxu1 %v5334_v3 }
 0x556   : > { %v2811_v57 = vpop.f32.mrb[54].mxu0 }
 0x557   : > { %v6570_v58 = vpack.c.bf16 %v2811_v57, %v2806_v47  ;;  %v2813_v59 = vpop.f32.mrb[55].mxu0 }
 0x558   : > { %4997 = vmatpush1.bf16.msra.mxu1 %v4996_v50  ;;  %v3941_v50 = vld [vmem:[%s6925_s4 + $0x140] sm:$0xff] }
 0x559   : > { %4998 = vmatprep.subr.bf16.mxu1 %v5334_v3 }
 0x55a   : > { %v2816_v2 = vpop.f32.mrb[56].mxu0 }
 0x55b   : > { %v2818_v4 = vpop.f32.mrb[57].mxu0 }
 0x55c   : > { %5000 = vmatpush1.bf16.msra.mxu1 %v4999_v63 }
 0x55d   : > { %5001 = vmatprep.subr.bf16.mxu1 %v5334_v3 }
 0x55e   : > { %v2821_v6 = vpop.f32.mrb[58].mxu0 }
 0x55f   : > { %v6580_v9 = vpack.c.bf16 %v2821_v6, %v2816_v2  ;;  %v2823_v10 = vpop.f32.mrb[59].mxu0 }
 0x560   : > { %5003 = vmatpush1.bf16.msra.mxu1 %v5002_v5 }
 0x561   : > { %2488 = vmatprep.subr.mxu1 %v5332_v61 }
 0x564   : > { %3932 = vmatpush1.msk.msra.mxu1 %vm1052_vm5, %v3931_v11 }
 0x565   : > { %2505 = vmatmul.mubr.f32.vlgmr.msra.gmra.mrb[72].mxu1 %v5587_v54 }
 0x566   : > { %3934 = vmatprep.mubr.msk.f32.mxu1 %vm1027_vm6, %v5600_v62 }
 0x569   : > { %2510 = vmatmul.mubr.f32.gmra.mrb[74].mxu1 %v5597_v60 }
 0x56a   : > { %3935 = vmatprep.mubr.msk.f32.mxu1 %vm1027_vm6, %v5614_v8 }
 0x56d   : > { %2515 = vmatmul.mubr.f32.gmra.mrb[76].mxu1 %v5611_v7 }
 0x56e   : > { %3936 = vmatprep.mubr.msk.f32.mxu1 %vm1027_vm6, %v5628_v17 }
 0x571   : > { %2520 = vmatmul.mubr.f32.gmra.mrb[78].mxu1 %v5625_v16 }
 0x572   : > { %3937 = vmatprep.mubr.msk.f32.mxu1 %vm1027_vm6, %v5642_v26 }
 0x574   : > { %v3066_v12 = vpop.f32.mrb[60].mxu0 }
 0x575   : > { %2525 = vmatmul.mubr.f32.gmra.mrb[80].mxu1 %v5639_v25  ;;  %v3068_v13 = vpop.f32.mrb[61].mxu0 }
 0x576   : > { %3938 = vmatprep.mubr.msk.f32.mxu1 %vm1027_vm6, %v5656_v35 }
 0x578   : > { %v3071_v14 = vpop.f32.mrb[62].mxu0 }
 0x579   : > { %v6602_v15 = vpack.c.bf16 %v3071_v14, %v3066_v12  ;;  %2530 = vmatmul.mubr.f32.gmra.mrb[82].mxu1 %v5653_v34  ;;  %v3073_v19 = vpop.f32.mrb[63].mxu0 }
 0x57a   : > { %3939 = vmatprep.mubr.msk.f32.mxu1 %vm1027_vm6, %v5670_v44 }
 0x57c   : > { %v3076_v20 = vpop.f32.mrb[64].mxu0 }
 0x57d   : > { %2535 = vmatmul.mubr.f32.gmra.mrb[84].mxu1 %v5667_v43  ;;  %v3078_v21 = vpop.f32.mrb[65].mxu0 }
 0x57e   : > { %3940 = vmatprep.mubr.msk.f32.mxu1 %vm1027_vm6, %v5684_v55 }
 0x580   : > { %v3081_v22 = vpop.f32.mrb[66].mxu0 }
 0x581   : > { %v6610_v23 = vpack.c.bf16 %v3081_v22, %v3076_v20  ;;  %2540 = vmatmul.mubr.f32.gmra.mrb[86].mxu1 %v5681_v53  ;;  %v3083_v24 = vpop.f32.mrb[67].mxu0 }
 0x582   : > { %4410 = vmatprep.mubr.msk.f32.mxu1 %vm1312_vm7, %v3941_v50  ;;  %v3942_v24 = vld [vmem:[%s6925_s4 + $0x148] sm:$0xff]  ;;  %v4041_v50 = vld [vmem:[%s6925_s4 + $0x1c0] sm:$0xff] }
 0x584   : > { %v3086_v27 = vpop.f32.mrb[68].mxu0 }
 0x585   : > { %v3088_v29 = vpop.f32.mrb[69].mxu0 }
 0x586   : > { %v3944_v29 = vld [vmem:[%s6925_s4 + $0x158] sm:$0xff] }
 0x588   : > { %v3091_v31 = vpop.f32.mrb[70].mxu0 }
 0x589   : > { %v6613_v32 = vpack.c.bf16 %v3091_v31, %v3086_v27  ;;  %v3093_v37 = vpop.f32.mrb[71].mxu0  ;;  %v3943_v27 = vld [vmem:[%s6925_s4 + $0x150] sm:$0xff]  ;;  %v3945_v31 = vld [vmem:[%s6925_s4 + $0x160] sm:$0xff] }
 0x58a   : > { %v3947_v37 = vld [vmem:[%s6925_s4 + $0x170] sm:$0xff] }
 0x58c   : > { %v3096_v39 = vpop.f32.mrb[72].mxu0 }
 0x58d   : > { %v3098_v41 = vpop.f32.mrb[73].mxu0 }
 0x58e   : > { %v3993_v41 = vld [vmem:[%s6925_s4 + $0x190] sm:$0xff] }
 0x590   : > { %v3101_v45 = vpop.f32.mrb[74].mxu0 }
 0x591   : > { %v6615_v47 = vpack.c.bf16 %v3101_v45, %v3096_v39  ;;  %v3103_v48 = vpop.f32.mrb[75].mxu0  ;;  %v3991_v39 = vld [vmem:[%s6925_s4 + $0x180] sm:$0xff] }
 0x592   : > { %v3995_v45 = vld [vmem:[%s6925_s4 + $0x1a0] sm:$0xff]  ;;  %v3997_v48 = vld [vmem:[%s6925_s4 + $0x1b0] sm:$0xff] }
 0x638   : > { %v2506_v52 = vpop.f32.mrb[72].mxu1 }
 0x639   : > { %v2508_v56 = vpop.f32.mrb[73].mxu1 }
 0x63a   : > { %v4042_v56 = vld [vmem:[%s6925_s4 + $0x1c8] sm:$0xff] }
 0x63c   : > { %v2511_v57 = vpop.f32.mrb[74].mxu1 }
 0x63d   : > { %v5004_v59 = vpack.c.bf16 %v2511_v57, %v2506_v52  ;;  %v2513_v63 = vpop.f32.mrb[75].mxu1  ;;  %v4057_v52 = vld [vmem:[%s6924_s3 + $0x640] sm:$0xff] }
 0x63e   : > { %v4059_v63 = vld [vmem:[%s6924_s3 + $0x650] sm:$0xff] }
 0x63f   : > { %5005 = vmatprep.subr.bf16.mxu1 %v5004_v59 }
 0x640   : > { %v2516_v0 = vpop.f32.mrb[76].mxu1  ;;  %5007 = vmatpush3.bf16.msra.mxu1 %v5004_v59  ;;  %v4043_v59 = vld [vmem:[%s6925_s4 + $0x1d0] sm:$0xff] }
 0x641   : > { %v2518_v1 = vpop.f32.mrb[77].mxu1 }
 0x644   : > { %v2521_v2 = vpop.f32.mrb[78].mxu1 }
 0x645   : > { %v5008_v4 = vpack.c.bf16 %v2521_v2, %v2516_v0  ;;  %v2523_v5 = vpop.f32.mrb[79].mxu1  ;;  %v4044_v0 = vld [vmem:[%s6925_s4 + $0x1d8] sm:$0xff]  ;;  %v4045_v2 = vld [vmem:[%s6925_s4 + $0x1e0] sm:$0xff] }
 0x646   : > { %v4062_v5 = vld [vmem:[%s6924_s3 + $0x668] sm:$0xff] }
 0x647   : > { %5009 = vmatprep.subr.bf16.mxu1 %v5008_v4 }
 0x648   : > { %v2526_v6 = vpop.f32.mrb[80].mxu1  ;;  %5011 = vmatpush3.bf16.msra.mxu1 %v5008_v4  ;;  %v4061_v4 = vld [vmem:[%s6924_s3 + $0x660] sm:$0xff] }
 0x649   : > { %v2528_v10 = vpop.f32.mrb[81].mxu1 }
 0x64a   : > { %v5131_v10 = vpack.c.bf16 %v4062_v5, %v4061_v4 }
 0x64c   : > { %v2531_v11 = vpop.f32.mrb[82].mxu1 }
 0x64d   : > { %v5012_v12 = vpack.c.bf16 %v2531_v11, %v2526_v6  ;;  %v2533_v13 = vpop.f32.mrb[83].mxu1  ;;  %v4046_v6 = vld [vmem:[%s6925_s4 + $0x1e8] sm:$0xff]  ;;  %v4047_v11 = vld [vmem:[%s6925_s4 + $0x1f0] sm:$0xff] }
 0x64e   : > { %v4064_v13 = vld [vmem:[%s6924_s3 + $0x678] sm:$0xff] }
 0x64f   : > { %5013 = vmatprep.subr.bf16.mxu1 %v5012_v12 }
 0x650   : > { %v2536_v14 = vpop.f32.mrb[84].mxu1  ;;  %5015 = vmatpush3.bf16.msra.mxu1 %v5012_v12  ;;  %v4063_v12 = vld [vmem:[%s6924_s3 + $0x670] sm:$0xff] }
 0x651   : > { %v2538_v19 = vpop.f32.mrb[85].mxu1 }
 0x652   : > { %v5134_v19 = vpack.c.bf16 %v4064_v13, %v4063_v12  ;;  %v4096_v12 = vld [vmem:[%s6925_s4 + $0x228] sm:$0xff]  ;;  %v4097_v13 = vld [vmem:[%s6925_s4 + $0x230] sm:$0xff] }
 0x654   : > { %v2541_v20 = vpop.f32.mrb[86].mxu1 }
 0x655   : > { %v5016_v21 = vpack.c.bf16 %v2541_v20, %v2536_v14  ;;  %v2543_v22 = vpop.f32.mrb[87].mxu1  ;;  %v4048_v14 = vld [vmem:[%s6925_s4 + $0x1f8] sm:$0xff]  ;;  %v4065_v20 = vld [vmem:[%s6924_s3 + $0x680] sm:$0xff] }
 0x657   : > { %5017 = vmatprep.subr.bf16.mxu1 %v5016_v21 }
 0x658   : > { %5019 = vmatpush3.bf16.msra.mxu1 %v5016_v21  ;;  %v4066_v21 = vld [vmem:[%s6924_s3 + $0x688] sm:$0xff] }
 0x659   : > { %5057 = vmatprep.subr.bf16.mxu1 %v6538_v18  ;;  %v5137_v22 = vpack.c.bf16 %v4066_v21, %v4065_v20 }
 0x65b   : > { %4411 = vmatmul.mubr.msk.f32.vlgmr.msra.gmra.mrb[48].mxu1 %vm1312_vm7, %v3942_v24  ;;  %v4067_v24 = vld [vmem:[%s6924_s3 + $0x690] sm:$0xff] }
 0x65c   : > { %5059 = vmatpush3.bf16.msra.mxu1 %v6538_v18  ;;  %4413 = vmatprep.mubr.msk.f32.mxu1 %vm1312_vm7, %v3943_v27  ;;  %v3946_v18 = vld [vmem:[%s6925_s4 + $0x168] sm:$0xff]  ;;  %v4068_v27 = vld [vmem:[%s6924_s3 + $0x698] sm:$0xff] }
 0x65d   : > { %5061 = vmatprep.subr.bf16.mxu1 %v6554_v36 }
 0x65f   : > { %4414 = vmatmul.mubr.msk.f32.gmra.mrb[50].mxu1 %vm1312_vm7, %v3944_v29  ;;  %v5140_v29 = vpack.c.bf16 %v4068_v27, %v4067_v24 }
 0x660   : > { %5063 = vmatpush3.bf16.msra.mxu1 %v6554_v36  ;;  %4416 = vmatprep.mubr.msk.f32.mxu1 %vm1312_vm7, %v3945_v31  ;;  %v3948_v36 = vld [vmem:[%s6925_s4 + $0x178] sm:$0xff]  ;;  %v4069_v31 = vld [vmem:[%s6924_s3 + $0x6a0] sm:$0xff] }
 0x661   : > { %5065 = vmatprep.subr.bf16.mxu1 %v6570_v58 }
 0x663   : > { %4417 = vmatmul.mubr.msk.f32.gmra.mrb[52].mxu1 %vm1312_vm7, %v3946_v18 }
 0x664   : > { %5067 = vmatpush3.bf16.msra.mxu1 %v6570_v58  ;;  %4419 = vmatprep.mubr.msk.f32.mxu1 %vm1312_vm7, %v3947_v37  ;;  %v3992_v58 = vld [vmem:[%s6925_s4 + $0x188] sm:$0xff]  ;;  %v4071_v37 = vld [vmem:[%s6924_s3 + $0x6b0] sm:$0xff] }
 0x665   : > { %5069 = vmatprep.subr.bf16.mxu1 %v6580_v9 }
 0x667   : > { %4420 = vmatmul.mubr.msk.f32.gmra.mrb[54].mxu1 %vm1312_vm7, %v3948_v36  ;;  %v4072_v36 = vld [vmem:[%s6924_s3 + $0x6b8] sm:$0xff] }
 0x668   : > { %5071 = vmatpush3.bf16.msra.mxu1 %v6580_v9  ;;  %4438 = vmatprep.mubr.msk.f32.mxu1 %vm1312_vm7, %v3991_v39  ;;  %v3994_v9 = vld [vmem:[%s6925_s4 + $0x198] sm:$0xff]  ;;  %v5146_v39 = vpack.c.bf16 %v4072_v36, %v4071_v37 }
 0x669   : > { %5109 = vmatprep.subr.bf16.mxu1 %v6602_v15 }
 0x66b   : > { %4439 = vmatmul.mubr.msk.f32.vlgmr.msra.gmra.mrb[48].mxu1 %vm1312_vm7, %v3992_v58  ;;  %v4073_v58 = vld [vmem:[%s6924_s3 + $0x6c0] sm:$0xff] }
 0x66c   : > { %5111 = vmatpush3.bf16.msra.mxu1 %v6602_v15  ;;  %4441 = vmatprep.mubr.msk.f32.mxu1 %vm1312_vm7, %v3993_v41  ;;  %v3996_v15 = vld [vmem:[%s6925_s4 + $0x1a8] sm:$0xff] }
 0x66d   : > { %5113 = vmatprep.subr.bf16.mxu1 %v6610_v23  ;;  %v4074_v41 = vld [vmem:[%s6924_s3 + $0x6c8] sm:$0xff] }
 0x66f   : > { %4442 = vmatmul.mubr.msk.f32.gmra.mrb[50].mxu1 %vm1312_vm7, %v3994_v9  ;;  %v5149_v9 = vpack.c.bf16 %v4074_v41, %v4073_v58 }
 0x670   : > { %5115 = vmatpush3.bf16.msra.mxu1 %v6610_v23  ;;  %4444 = vmatprep.mubr.msk.f32.mxu1 %vm1312_vm7, %v3995_v45  ;;  %v3998_v23 = vld [vmem:[%s6925_s4 + $0x1b8] sm:$0xff]  ;;  %v4075_v45 = vld [vmem:[%s6924_s3 + $0x6d0] sm:$0xff] }
 0x671   : > { %5117 = vmatprep.subr.bf16.mxu1 %v6613_v32 }
 0x673   : > { %4445 = vmatmul.mubr.msk.f32.gmra.mrb[52].mxu1 %vm1312_vm7, %v3996_v15  ;;  %v4076_v15 = vld [vmem:[%s6924_s3 + $0x6d8] sm:$0xff] }
 0x674   : > { %5119 = vmatpush3.bf16.msra.mxu1 %v6613_v32  ;;  %4447 = vmatprep.mubr.msk.f32.mxu1 %vm1312_vm7, %v3997_v48  ;;  %v4058_v32 = vld [vmem:[%s6924_s3 + $0x648] sm:$0xff]  ;;  %v5152_v48 = vpack.c.bf16 %v4076_v15, %v4075_v45  ;;  %v3547_v15 = vld [vmem:[%s6926_s5] sm:$0xff] }
 0x675   : > { %5121 = vmatprep.subr.bf16.mxu1 %v6615_v47  ;;  %v5125_v57 = vpack.c.bf16 %v4058_v32, %v4057_v52  ;;  %v4079_v32 = vld [vmem:[%s6924_s3 + $0x6f0] sm:$0xff] }
 0x677   : > { %4448 = vmatmul.mubr.msk.f32.gmra.mrb[54].mxu1 %vm1312_vm7, %v3998_v23  ;;  %v4077_v23 = vld [vmem:[%s6924_s3 + $0x6e0] sm:$0xff] }
 0x678   : > { %5123 = vmatpush3.bf16.msra.mxu1 %v6615_v47  ;;  %4466 = vmatprep.mubr.msk.f32.mxu1 %vm1312_vm7, %v4041_v50  ;;  %v4060_v47 = vld [vmem:[%s6924_s3 + $0x658] sm:$0xff]  ;;  %v4078_v50 = vld [vmem:[%s6924_s3 + $0x6e8] sm:$0xff] }
 0x679   : > { %5124 = vmatprep.subr.bf16.mxu1 %v5334_v3  ;;  %v5128_v1 = vpack.c.bf16 %v4060_v47, %v4059_v63  ;;  %v5155_v52 = vpack.c.bf16 %v4078_v50, %v4077_v23  ;;  %v3548_v50 = vld [vmem:[%s6926_s5 + $0x8] sm:$0xff] }
 0x67b   : > { %4467 = vmatmul.mubr.msk.f32.vlgmr.msra.gmra.mrb[48].mxu1 %vm1312_vm7, %v4042_v56  ;;  %v4080_v56 = vld [vmem:[%s6924_s3 + $0x6f8] sm:$0xff] }
 0x67c   : > { %5126 = vmatpush1.bf16.msra.mxu1 %v5125_v57  ;;  %4469 = vmatprep.mubr.msk.f32.mxu1 %vm1312_vm7, %v4043_v59  ;;  %v5158_v57 = vpack.c.bf16 %v4080_v56, %v4079_v32  ;;  %v4081_v59 = vld [vmem:[%s6924_s3 + $0x700] sm:$0xf] }
 0x67d   : > { %5127 = vmatprep.subr.bf16.mxu1 %v5334_v3 }
 0x67f   : > { %4470 = vmatmul.mubr.msk.f32.gmra.mrb[50].mxu1 %vm1312_vm7, %v4044_v0 }
 0x680   : > { %5129 = vmatpush1.bf16.msra.mxu1 %v5128_v1  ;;  %4472 = vmatprep.mubr.msk.f32.mxu1 %vm1312_vm7, %v4045_v2 }
 0x681   : > { %5130 = vmatprep.subr.bf16.mxu1 %v5334_v3 }
 0x683   : > { %4473 = vmatmul.mubr.msk.f32.gmra.mrb[52].mxu1 %vm1312_vm7, %v4046_v6  ;;  %v4092_v6 = vld [vmem:[%s6925_s4 + $0x208] sm:$0xff] }
 0x684   : > { %5132 = vmatpush1.bf16.msra.mxu1 %v5131_v10  ;;  %4475 = vmatprep.mubr.msk.f32.mxu1 %vm1312_vm7, %v4047_v11  ;;  %v4094_v10 = vld [vmem:[%s6925_s4 + $0x218] sm:$0xff]  ;;  %v4095_v11 = vld [vmem:[%s6925_s4 + $0x220] sm:$0xff] }
 0x685   : > { %5133 = vmatprep.subr.bf16.mxu1 %v5334_v3 }
 0x687   : > { %4476 = vmatmul.mubr.msk.f32.gmra.mrb[54].mxu1 %vm1312_vm7, %v4048_v14  ;;  %v4098_v14 = vld [vmem:[%s6925_s4 + $0x238] sm:$0xff] }
 0x688   : > { %5135 = vmatpush1.bf16.msra.mxu1 %v5134_v19  ;;  %4083 = vmatprep.mubr.msk.f32.mxu1 %vm1027_vm6, %v5585_v51  ;;  %v4070_v51 = vld [vmem:[%s6924_s3 + $0x6a8] sm:$0xff] }
 0x689   : > { %5136 = vmatprep.subr.bf16.mxu1 %v5334_v3  ;;  %v5143_v18 = vpack.c.bf16 %v4070_v51, %v4069_v31 }
 0x68c   : > { %5138 = vmatpush1.bf16.msra.mxu1 %v5137_v22 }
 0x68d   : > { %5139 = vmatprep.subr.bf16.mxu1 %v5334_v3 }
 0x690   : > { %5141 = vmatpush1.bf16.msra.mxu1 %v5140_v29 }
 0x691   : > { %5142 = vmatprep.subr.bf16.mxu1 %v5334_v3 }
 0x694   : > { %5144 = vmatpush1.bf16.msra.mxu1 %v5143_v18 }
 0x695   : > { %5145 = vmatprep.subr.bf16.mxu1 %v5334_v3 }
 0x698   : > { %5147 = vmatpush1.bf16.msra.mxu1 %v5146_v39 }
 0x699   : > { %5148 = vmatprep.subr.bf16.mxu1 %v5334_v3 }
 0x69c   : > { %5150 = vmatpush1.bf16.msra.mxu1 %v5149_v9 }
 0x69d   : > { %5151 = vmatprep.subr.bf16.mxu1 %v5334_v3 }
 0x6a0   : > { %5153 = vmatpush1.bf16.msra.mxu1 %v5152_v48 }
 0x6a1   : > { %5154 = vmatprep.subr.bf16.mxu1 %v5334_v3 }
 0x6a4   : > { %5156 = vmatpush1.bf16.msra.mxu1 %v5155_v52 }
 0x6a5   : > { %5157 = vmatprep.subr.bf16.mxu1 %v5334_v3  ;;  %v4093_v3 = vld [vmem:[%s6925_s4 + $0x210] sm:$0xff] }
 0x6a8   : > { %5159 = vmatpush1.bf16.msra.mxu1 %v5158_v57 }
 0x6a9   : > { %3328 = vmatprep.subr.mxu1 %v5332_v61  ;;  %v4091_v61 = vld [vmem:[%s6925_s4 + $0x200] sm:$0xff] }
 0x6aa   : > { %4494 = vmatprep.mubr.msk.f32.mxu0 %vm1312_vm7, %v4091_v61 }
 0x6ac   : > { %4082 = vmatpush1.msk.msra.mxu1 %vm1052_vm5, %v4081_v59 }
 0x6ad   : > { %3345 = vmatmul.mubr.f32.vlgmr.msra.gmra.mrb[88].mxu1 %v5587_v54 }
 0x6ae   : > { %4084 = vmatprep.mubr.msk.f32.mxu1 %vm1027_vm6, %v5600_v62 }
 0x6b1   : > { %3350 = vmatmul.mubr.f32.gmra.mrb[90].mxu1 %v5597_v60 }
 0x6b2   : > { %4085 = vmatprep.mubr.msk.f32.mxu1 %vm1027_vm6, %v5614_v8 }
 0x6b5   : > { %3355 = vmatmul.mubr.f32.gmra.mrb[92].mxu1 %v5611_v7 }
 0x6b6   : > { %4086 = vmatprep.mubr.msk.f32.mxu1 %vm1027_vm6, %v5628_v17 }
 0x6b9   : > { %3360 = vmatmul.mubr.f32.gmra.mrb[94].mxu1 %v5625_v16 }
 0x6ba   : > { %4087 = vmatprep.mubr.msk.f32.mxu1 %vm1027_vm6, %v5642_v26 }
 0x6bd   : > { %3365 = vmatmul.mubr.f32.gmra.mrb[96].mxu1 %v5639_v25 }
 0x6be   : > { %4088 = vmatprep.mubr.msk.f32.mxu1 %vm1027_vm6, %v5656_v35 }
 0x6c1   : > { %3370 = vmatmul.mubr.f32.gmra.mrb[98].mxu1 %v5653_v34 }
 0x6c2   : > { %4089 = vmatprep.mubr.msk.f32.mxu1 %vm1027_vm6, %v5670_v44 }
 0x6c5   : > { %3375 = vmatmul.mubr.f32.gmra.mrb[100].mxu1 %v5667_v43 }
 0x6c6   : > { %4090 = vmatprep.mubr.msk.f32.mxu1 %vm1027_vm6, %v5684_v55 }
 0x6c9   : > { %3380 = vmatmul.mubr.f32.gmra.mrb[102].mxu1 %v5681_v53 }
 0x6ca   : > { %4497 = vmatprep.mubr.msk.f32.mxu1 %vm1312_vm7, %v4093_v3 }
 0x74e   : > { %v4468_v54 = vpop.f32.mrb[48].mxu1 }
 0x74f   : > { %v5184_v60 = vadd.f32 %v4468_v54, %v6367_v28  ;;  %v3204_v62 = vpop.f32.mrb[49].mxu1 }
 0x750   : > { %v5186_v7 = vadd.f32 %v3204_v62, %v6369_v30 }
 0x780   : > { %v3346_v8 = vpop.f32.mrb[88].mxu1 }
 0x781   : > { %v3348_v16 = vpop.f32.mrb[89].mxu1 }
 0x784   : > { %v3351_v17 = vpop.f32.mrb[90].mxu1 }
 0x785   : > { %v5160_v25 = vpack.c.bf16 %v3351_v17, %v3346_v8  ;;  %v3353_v26 = vpop.f32.mrb[91].mxu1 }
 0x787   : > { %5161 = vmatprep.subr.bf16.mxu0 %v5160_v25  ;;  %5176 = vmatprep.subr.bf16.mxu1 %v5160_v25 }
 0x788   : > { %v3356_v34 = vpop.f32.mrb[92].mxu1  ;;  %5163 = vmatpush3.bf16.msra.mxu0 %v5160_v25  ;;  %5180 = vmatpush3.bf16.msra.mxu1 %v5160_v25  ;;  %v3552_v25 = vld [vmem:[%s6926_s5 + $0x28] sm:$0xff] }
 0x789   : > { %v3358_v35 = vpop.f32.mrb[93].mxu1 }
 0x78c   : > { %v3361_v43 = vpop.f32.mrb[94].mxu1 }
 0x78d   : > { %v5164_v44 = vpack.c.bf16 %v3361_v43, %v3356_v34  ;;  %v3363_v53 = vpop.f32.mrb[95].mxu1 }
 0x78f   : > { %5165 = vmatprep.subr.bf16.mxu0 %v5164_v44  ;;  %5177 = vmatprep.subr.bf16.mxu1 %v5164_v44 }
 0x790   : > { %v3366_v55 = vpop.f32.mrb[96].mxu1  ;;  %5167 = vmatpush3.bf16.msra.mxu0 %v5164_v44  ;;  %5181 = vmatpush3.bf16.msra.mxu1 %v5164_v44 }
 0x791   : > { %v3368_v28 = vpop.f32.mrb[97].mxu1 }
 0x792   : > { %v3553_v28 = vld [vmem:[%s6926_s5 + $0x30] sm:$0xff] }
 0x794   : > { %v3371_v30 = vpop.f32.mrb[98].mxu1 }
 0x795   : > { %v5168_v63 = vpack.c.bf16 %v3371_v30, %v3366_v55  ;;  %v3373_v47 = vpop.f32.mrb[99].mxu1  ;;  %v3554_v55 = vld [vmem:[%s6926_s5 + $0x38] sm:$0xff] }
 0x797   : > { %5169 = vmatprep.subr.bf16.mxu0 %v5168_v63  ;;  %5178 = vmatprep.subr.bf16.mxu1 %v5168_v63 }
 0x798   : > { %v3376_v0 = vpop.f32.mrb[100].mxu1  ;;  %5171 = vmatpush3.bf16.msra.mxu0 %v5168_v63  ;;  %5182 = vmatpush3.bf16.msra.mxu1 %v5168_v63 }
 0x799   : > { %v3378_v1 = vpop.f32.mrb[101].mxu1 }
 0x79c   : > { %v3381_v2 = vpop.f32.mrb[102].mxu1 }
 0x79d   : > { %v5172_v4 = vpack.c.bf16 %v3381_v2, %v3376_v0  ;;  %v3383_v5 = vpop.f32.mrb[103].mxu1 }
 0x79f   : > { %5173 = vmatprep.subr.bf16.mxu0 %v5172_v4  ;;  %5179 = vmatprep.subr.bf16.mxu1 %v5172_v4 }
 0x7a0   : > { %5175 = vmatpush3.bf16.msra.mxu0 %v5172_v4  ;;  %5183 = vmatpush3.bf16.msra.mxu1 %v5172_v4 }
 0x7a3   : > { %4495 = vmatmul.mubr.msk.f32.vlgmr.msra.gmra.mrb[76].mxu0 %vm1312_vm7, %v4092_v6  ;;  %4498 = vmatmul.mubr.msk.f32.vlgmr.msra.gmra.mrb[50].mxu1 %vm1312_vm7, %v4094_v10 }
 0x7a4   : > { %4500 = vmatprep.mubr.msk.f32.mxu1 %vm1312_vm7, %v4095_v11 }
 0x7a7   : > { %4501 = vmatmul.mubr.msk.f32.gmra.mrb[52].mxu1 %vm1312_vm7, %v4096_v12 }
 0x7a8   : > { %4503 = vmatprep.mubr.msk.f32.mxu1 %vm1312_vm7, %v4097_v13 }
 0x7ab   : > { %4504 = vmatmul.mubr.msk.f32.gmra.mrb[54].mxu1 %vm1312_vm7, %v4098_v14 }
 0x876   : > { %v4496_v19 = vpop.f32.mrb[76].mxu0  ;;  %v4499_v20 = vpop.f32.mrb[50].mxu1 }
 0x877   : > { %v5185_v21 = vadd.f32 %v5184_v60, %v4496_v19  ;;  %v5188_v22 = vadd.f32 %v4499_v20, %v6374_v33  ;;  %v3484_v24 = vpop.f32.mrb[77].mxu0  ;;  %v3494_v27 = vpop.f32.mrb[51].mxu1  ;;  %v3549_v33 = vld [vmem:[%s6926_s5 + $0x10] sm:$0xff] }
 0x878   : > { %v5187_v29 = vadd.f32 %v5186_v7, %v3484_v24  ;;  %v5189_v31 = vadd.f32 %v3494_v27, %v6377_v38 }
 0x879   : > { %v3532_v51 = vmul.f32 0.2, %v5185_v21  ;;  %v3534_v18 = vmul.f32 0.2, %v5188_v22 }
 0x87a   : > { %v3531_v37 = vmul.f32 0.2, %v5187_v29  ;;  %v3533_v36 = vmul.f32 0.2, %v5189_v31  ;;  %v4502_v39 = vpop.f32.mrb[52].mxu1 }
 0x87b   : > { %v3540_v58 = vmax.f32 %v5185_v21, %v3532_v51  ;;  %v3542_v41 = vmax.f32 %v5188_v22, %v3534_v18  ;;  %v5190_v9 = vadd.f32 %v4502_v39, %v6381_v40  ;;  %v3504_v45 = vpop.f32.mrb[53].mxu1  ;;  %v3550_v40 = vld [vmem:[%s6926_s5 + $0x18] sm:$0xff]  ;;  %v3601_v39 = vld [vmem:[#allocation2] sm:$0x1] }
 0x87c   : > { %v3539_v48 = vmax.f32 %v5187_v29, %v3531_v37  ;;  %v3541_v38 = vmax.f32 %v5189_v31, %v3533_v36  ;;  %v5191_v23 = vadd.f32 %v3504_v45, %v6384_v42 }
 0x87d   : > { %v3536_v52 = vmul.f32 0.2, %v5190_v9  ;;  %v3556_v60 = vmul.f32 %v3548_v50, %v3540_v58  ;;  %v3558_v42 = vmul.f32 %v3550_v40, %v3542_v41 }
 0x87e   : > { %v3535_v32 = vmul.f32 0.2, %v5191_v23  ;;  %v4505_v56 = vpop.f32.mrb[54].mxu1  ;;  %v3555_v57 = vmul.f32 %v3547_v15, %v3539_v48  ;;  %v3557_v59 = vmul.f32 %v3549_v33, %v3541_v38 }
 0x87f   : > { %v3544_v61 = vmax.f32 %v5190_v9, %v3536_v52  ;;  %v5192_v3 = vadd.f32 %v4505_v56, %v6388_v46  ;;  %v3514_v54 = vpop.f32.mrb[55].mxu1  ;;  %v3551_v46 = vld [vmem:[%s6926_s5 + $0x20] sm:$0xff]  ;;  %v3567_v34 = vsel %vm3563_vm8, %v3556_v60, 0.0 }
 0x880   : > { %v3543_v62 = vmax.f32 %v5191_v23, %v3535_v32  ;;  %v5193_v7 = vadd.f32 %v3514_v54, %v6391_v49  ;;  %v3564_v8 = vsel %vm3563_vm8, %v3555_v57, 0.0  ;;  %v3570_v16 = vsel %vm3563_vm8, %v3557_v59, 0.0 }
 0x881   : > { %v3538_v17 = vmul.f32 0.2, %v5192_v3  ;;  %3565 = vadd.xlane.f32.xlu0 %v3564_v8  ;;  %3571 = vadd.xlane.f32.xlu1 %v3570_v16  ;;  %v3573_v49 = vsel %vm3563_vm8, %v3558_v42, 0.0  ;;  %v3560_v44 = vmul.f32 %v3552_v25, %v3544_v61 }
 0x882   : > { %v3537_v26 = vmul.f32 0.2, %v5193_v7  ;;  %v3559_v53 = vmul.f32 %v3551_v46, %v3543_v62 }
 0x883   : > { %v3546_v35 = vmax.f32 %v5192_v3, %v3538_v17  ;;  %v3579_v30 = vsel %vm3563_vm8, %v3560_v44, 0.0 }
 0x884   : > { %v3545_v43 = vmax.f32 %v5193_v7, %v3537_v26  ;;  %v3576_v63 = vsel %vm3563_vm8, %v3559_v53, 0.0 }
 0x885   : > { %3568 = vadd.xlane.f32.xlu0 %v3567_v34  ;;  %3574 = vadd.xlane.f32.xlu1 %v3573_v49  ;;  %v3562_v47 = vmul.f32 %v3554_v55, %v3546_v35 }
 0x886   : > { %v3561_v0 = vmul.f32 %v3553_v28, %v3545_v43 }
 0x887   : > { %v3585_v1 = vsel %vm3563_vm8, %v3562_v47, 0.0 }
 0x888   : > { %v3582_v2 = vsel %vm3563_vm8, %v3561_v0, 0.0 }
 0x889   : > { %3580 = vadd.xlane.f32.xlu1 %v3579_v30  ;;  %3577 = vadd.xlane.f32.xlu0 %v3576_v63 }
 0x88d   : > { %3586 = vadd.xlane.f32.xlu1 %v3585_v1  ;;  %3583 = vadd.xlane.f32.xlu0 %v3582_v2 }
 0x90e   : > { %v3566_v4 = vpop.xlane.xlu0 %3565  ;;  %v3572_v5 = vpop.xlane.xlu1 %3571 }
 0x912   : > { %v3569_v6 = vpop.xlane.xlu0 %3568  ;;  %v3575_v10 = vpop.xlane.xlu1 %3574 }
 0x913   : > { %v3588_v11 = vadd.f32 %v3569_v6, %v3566_v4 }
 0x915   : > { %v3589_v12 = vadd.f32 %v3588_v11, %v3572_v5 }
 0x916   : > { %v3578_v13 = vpop.xlane.xlu0 %3577  ;;  %v3581_v19 = vpop.xlane.xlu1 %3580 }
 0x917   : > { %v3590_v14 = vadd.f32 %v3589_v12, %v3575_v10 }
 0x919   : > { %v3591_v20 = vadd.f32 %v3590_v14, %v3578_v13 }
 0x91a   : > { %v3584_v22 = vpop.xlane.xlu0 %3583  ;;  %v3587_v27 = vpop.xlane.xlu1 %3586 }
 0x91b   : > { %v3592_v21 = vadd.f32 %v3591_v20, %v3581_v19 }
 0x91d   : > { %v3593_v24 = vadd.f32 %v3592_v21, %v3584_v22 }
 0x91f   : > { %v3594_v29 = vadd.f32 %v3593_v24, %v3587_v27 }
 0x921   : > { %v3595_v31 = vrot.slane %v3594_v29, 4 }
 0x923   : > { %v3596_v51 = vadd.f32 %v3595_v31, %v3594_v29 }
 0x925   : > { %v3597_v18 = vrot.slane %v3596_v51, 2 }
 0x927   : > { %v3598_v37 = vadd.f32 %v3597_v18, %v3596_v51 }
 0x929   : > { %v3599_v36 = vrot.slane %v3598_v37, 1 }
 0x92b   : > { %v3600_v58 = vadd.f32 %v3599_v36, %v3598_v37 }
 0x92d   : > { %v3602_v41 = vadd.f32 %v3601_v39, %v3600_v58 }
 0x92f   : > { %v4107_v9 = vmul.f32 -1.442695, %v3602_v41 }
 0x931   : > { %5285 = vpow2.f32 %v4107_v9 }
 0x93b   : > { %v5286_v45 = vpop.eup %5285 }
 0x93c   : > { %v3606_v15 = vadd.f32 1.0, %v5286_v45 }
 0x93e   : > { %5287 = vrcp.f32 %v3606_v15 }
 0x948   : > { %v5288_v33 = vpop.eup %5287 }
 0x949   : > { %3610 = vst.msk [vmem:[%s291_s14] sm:$0x1] %vm3609_vm9, %v5288_v33 }
 0x94a PF: > { %s20_s26 = sadd.s32 1, %s5327_s26  }
 0x94b   : > { %p17_p3 = scmp.ge.s32.totalorder %s20_s26, 4  }
 0x94d   :  { %19 = sbr.rel (!%p17_p3) target bundleno = 4 (0x4), region = 99 }
 0x954   :  { %3628 = vsyncpa [#allocation4], 1 }
 0x955   :  { %3630 = vsyncpa [#allocation4 + $0x1], 1 }

</bundles_post_ra>
